<compile_context>
chip_gen: v7x
topology: tpu7x:2x2x1
jax: 0.10.0
libtpu: 0.0.40
codegen_flags: <defaults>
</compile_context>

<pallas_src>
import jax
import jax.numpy as jnp
from jax.experimental import pallas as pl
from jax.experimental.pallas import tpu as pltpu


# ----------------------------------------------------------------------------
# Fused kernel: embedding + GRU1 + (GRU2||GRU3 fused) + attention + FC.
# ----------------------------------------------------------------------------
def _model_block_kernel(x_ref, r_ref, ew_ref, eb_ref,
                        wih1_ref, whh1_ref, bx1_ref, bhn1_ref,
                        wih23_ref, w23_ref, bx23_ref, bhn23_ref,
                        wfcv_ref, wfc1_ref, wfc23_ref, bfc_ref,
                        o_ref, gx1_scr, gx23_scr):
    f32 = jnp.float32
    bf16 = jnp.bfloat16
    B = o_ref.shape[0]
    H = gx1_scr.shape[1] // 3            # hidden size
    T1 = gx1_scr.shape[0] // B           # GRU1 seq len (ptl)
    T2 = gx23_scr.shape[0] // B          # GRU2/GRU3 seq len (P)

    # ---- Phase 1: batched, lane-packed input-side gate projections (MXU) ----
    # Embedding for all timesteps in one matmul, then gx1 in one matmul.
    emb = jnp.dot(x_ref[...], ew_ref[...], preferred_element_type=f32) + eb_ref[...]
    gx1_scr[...] = (jnp.dot(emb.astype(bf16), wih1_ref[...],
                            preferred_element_type=f32) + bx1_ref[...])
    # GRU2 + GRU3 input projections fused into ONE matmul (GRU3's weight row
    # is folded into row 0 of wih23 at the GRU3 column positions).
    gx23_scr[...] = (jnp.dot(r_ref[...], wih23_ref[...],
                             preferred_element_type=f32) + bx23_ref[...])

    # Hoist loop-invariant recurrent weights / biases (and broadcasts) out
    # of the unrolled time loop.
    whh1 = whh1_ref[...]                                      # (H, 3H)  bf16
    w23 = w23_ref[...]                                        # (2H, 6H) bf16
    bhn1 = jnp.broadcast_to(bhn1_ref[...], (B, H))            # (B, H)   f32
    bhn23 = jnp.broadcast_to(bhn23_ref[...], (B, 2 * H))      # (B, 2H)  f32

    def gru_step(h, gx, gh, bhn, hd):
        # Packed gate layout along lanes: [r | z | n] (each hd wide).
        rr = jax.nn.sigmoid(gx[:, 0:hd] + gh[:, 0:hd])
        zz = jax.nn.sigmoid(gx[:, hd:2 * hd] + gh[:, hd:2 * hd])
        nn_ = jnp.tanh(gx[:, 2 * hd:3 * hd] + rr * (gh[:, 2 * hd:3 * hd] + bhn))
        return (1.0 - zz) * nn_ + zz * h

    # ---- Phase 2: interleaved recurrences (GRU1 || fused GRU2+GRU3) ----
    h1 = jnp.zeros((B, H), f32)
    h23 = jnp.zeros((B, 2 * H), f32)     # [h2 | h3] packed along lanes
    h1_traj = []                         # GRU1 trajectory stays in vregs
    for t in range(max(T1, T2)):         # static unroll; independent chains overlap
        if t < T1:
            gh = jnp.dot(h1.astype(bf16), whh1, preferred_element_type=f32)
            h1 = gru_step(h1, gx1_scr[t * B:(t + 1) * B, :], gh, bhn1, H)
            h1_traj.append(h1)
        if t < T2:
            gh = jnp.dot(h23.astype(bf16), w23, preferred_element_type=f32)
            h23 = gru_step(h23, gx23_scr[t * B:(t + 1) * B, :], gh, bhn23, 2 * H)

    # ---- Phase 3: attention over GRU1 trajectory (vreg-resident, streaming) ----
    scores = [jnp.sum(h1 * h_t, axis=-1, keepdims=True) for h_t in h1_traj]  # (B,1)
    m = scores[0]
    for s in scores[1:]:
        m = jnp.maximum(m, s)
    exps = [jnp.exp(s - m) for s in scores]
    denom = exps[0]
    for e in exps[1:]:
        denom = denom + e
    inv = pl.reciprocal(denom, approx=True)                    # EUP slot
    vt = exps[0] * h1_traj[0]
    for e, h_t in zip(exps[1:], h1_traj[1:]):
        vt = vt + e * h_t
    vt = vt * inv                                              # (B, H)

    # Concat-free FC: vh = [vt | h1 | h2 | h3]; h23 already holds [h2|h3].
    o_ref[...] = (jnp.dot(vt.astype(bf16), wfcv_ref[...], preferred_element_type=f32)
                  + jnp.dot(h1.astype(bf16), wfc1_ref[...], preferred_element_type=f32)
                  + jnp.dot(h23.astype(bf16), wfc23_ref[...], preferred_element_type=f32)
                  + bfc_ref[...])


# ----------------------------------------------------------------------------
# One-time parameter re-layout (call ONCE at load time, outside the jit path).
# ----------------------------------------------------------------------------
def prepare_params(params):
    f32, bf16 = jnp.float32, jnp.bfloat16
    H = params["gru1"][1].shape[1]

    def pack(w_ih, w_hh, b_ih, b_hh):
        # PyTorch layout: rows [0:H]=r, [H:2H]=z, [2H:3H]=n.  Transposing gives
        # lane-packed columns in [r|z|n] order directly.
        wih = w_ih.T                                              # (In, 3H)
        whh = w_hh.T                                              # (H, 3H)
        # r/z gates: fold b_ih + b_hh into the precomputed input projection;
        # n gate: b_ih only (b_hn is applied inside the reset-gate product,
        # matching PyTorch GRU semantics).
        bx = jnp.concatenate([b_ih[:2 * H] + b_hh[:2 * H],
                              b_ih[2 * H:]]).reshape(1, 3 * H)
        bhn = b_hh[2 * H:].reshape(1, H)
        return wih, whh, bx, bhn

    wih1, whh1, bx1, bhn1 = pack(*params["gru1"])
    wih2, whh2, bx2, bhn2 = pack(*params["gru2"])
    wih3, whh3, bx3, bhn3 = pack(*params["gru3"])
    ptl = wih2.shape[0]

    # Fused GRU2+GRU3 column order: [r2 | r3 | z2 | z3 | n2 | n3].
    def interleave_cols(a2, a3):
        return jnp.concatenate([a2[..., 0:H], a3[..., 0:H],
                                a2[..., H:2 * H], a3[..., H:2 * H],
                                a2[..., 2 * H:3 * H], a3[..., 2 * H:3 * H]], axis=-1)

    zH3 = jnp.zeros((H, 3 * H), f32)
    w23 = jnp.concatenate([interleave_cols(whh2, zH3),        # rows = h2
                           interleave_cols(zH3, whh3)], axis=0)  # rows = h3  -> (2H, 6H)

    # Input projection: GRU2 uses all ptl columns of the time-major input;
    # GRU3's scalar input equals column 0 of that input, so fold its (1,3H)
    # weight into row 0 at the (otherwise-zero) GRU3 column positions.
    wih23 = interleave_cols(wih2, jnp.zeros((ptl, 3 * H), f32))
    wih3_row = interleave_cols(jnp.zeros((1, 3 * H), f32), wih3)
    wih23 = wih23.at[0:1, :].add(wih3_row)                    # (ptl, 6H)
    bx23 = interleave_cols(bx2, bx3)                          # (1, 6H)
    bhn23 = jnp.concatenate([bhn2, bhn3], axis=-1)            # (1, 2H)

    fc_t = params["fc_w"].T                                   # (4H, pred_len), [vt|h1|h2|h3]
    return dict(
        ew=params["emb_w"].T.astype(bf16),                    # (P, map_len)
        eb=params["emb_b"].reshape(1, -1).astype(f32),
        wih1=wih1.astype(bf16), whh1=whh1.astype(bf16),
        bx1=bx1.astype(f32), bhn1=bhn1.astype(f32),
        wih23=wih23.astype(bf16), w23=w23.astype(bf16),
        bx23=bx23.astype(f32), bhn23=bhn23.astype(f32),
        wfc_v=fc_t[0:H].astype(bf16),
        wfc_1=fc_t[H:2 * H].astype(bf16),
        wfc_23=fc_t[2 * H:4 * H].astype(bf16),
        bfc=params["fc_b"].reshape(1, -1).astype(f32),
    )


# ----------------------------------------------------------------------------
# Forward wrapper: two tiny input transposes + one pallas_call.
# ----------------------------------------------------------------------------
@jax.jit
def model_block_forward(x, prepped):
    B, ptl, P = x.shape
    H = prepped["whh1"].shape[0]
    pred_len = prepped["bfc"].shape[1]

    # Time-major, 2-D flattened sequences (row index = t * B + b), bf16 operands.
    x_tm = jnp.transpose(x, (1, 0, 2)).reshape(ptl * B, P).astype(jnp.bfloat16)
    r2d = jnp.transpose(x, (2, 0, 1)).reshape(P * B, ptl).astype(jnp.bfloat16)

    return pl.pallas_call(
        _model_block_kernel,
        out_shape=jax.ShapeDtypeStruct((B, pred_len), jnp.float32),
        scratch_shapes=[
            pltpu.VMEM((ptl * B, 3 * H), jnp.float32),   # lane-packed gx for GRU1
            pltpu.VMEM((P * B, 6 * H), jnp.float32),     # lane-packed gx for fused GRU2+GRU3
        ],
    )(x_tm, r2d,
      prepped["ew"], prepped["eb"],
      prepped["wih1"], prepped["whh1"], prepped["bx1"], prepped["bhn1"],
      prepped["wih23"], prepped["w23"], prepped["bx23"], prepped["bhn23"],
      prepped["wfc_v"], prepped["wfc_1"], prepped["wfc_23"], prepped["bfc"])


# ----------------------------------------------------------------------------
# Pure-JAX reference (mirrors the PyTorch forward exactly, full f32).
# ----------------------------------------------------------------------------
def _gru_ref(x_seq, w_ih, w_hh, b_ih, b_hh):
    T, B, In = x_seq.shape
    H = w_hh.shape[1]

    def step(h, x_t):
        gx = x_t @ w_ih.T + b_ih
        gh = h @ w_hh.T + b_hh
        rr = jax.nn.sigmoid(gx[:, :H] + gh[:, :H])
        zz = jax.nn.sigmoid(gx[:, H:2 * H] + gh[:, H:2 * H])
        nn_ = jnp.tanh(gx[:, 2 * H:] + rr * gh[:, 2 * H:])
        h_new = (1.0 - zz) * nn_ + zz * h
        return h_new, h_new

    h_fin, h_set = jax.lax.scan(step, jnp.zeros((B, H), jnp.float32), x_seq)
    return h_set, h_fin


def model_block_ref(x, params):
    B, ptl, P = x.shape
    r = jnp.transpose(x, (2, 0, 1))
    _, h2 = _gru_ref(r, *params["gru2"])
    emb = x @ params["emb_w"].T + params["emb_b"]
    emb = jnp.transpose(emb, (1, 0, 2))
    h_set, h1 = _gru_ref(emb, *params["gru1"])
    hw = x[:, 0, :]
    lst_p = jnp.transpose(hw)[:, :, None]
    _, h3 = _gru_ref(lst_p, *params["gru3"])

    score = jnp.einsum("bh,tbh->bt", h1, h_set)
    att = jax.nn.softmax(score, axis=1)
    vt = jnp.einsum("bt,tbh->bh", att, h_set)
    vh = jnp.concatenate([vt, h1, h2, h3], axis=1)
    return vh @ params["fc_w"].T + params["fc_b"]


# ----------------------------------------------------------------------------
# Deterministic parameter construction (shapes from ModelBlock.__init__).
# ----------------------------------------------------------------------------
def make_params(key, P, ptl, map_len, hidR, pred_len):
    def uni(k, shape, bound):
        return jax.random.uniform(k, shape, jnp.float32, -bound, bound)

    keys = jax.random.split(key, 16)
    hb = 1.0 / jnp.sqrt(hidR)

    def gru_params(k0, k1, k2, k3, in_size):
        return (uni(k0, (3 * hidR, in_size), hb),
                uni(k1, (3 * hidR, hidR), hb),
                uni(k2, (3 * hidR,), hb),
                uni(k3, (3 * hidR,), hb))

    return {
        "emb_w": uni(keys[0], (map_len, P), 1.0 / jnp.sqrt(P)),
        "emb_b": uni(keys[1], (map_len,), 1.0 / jnp.sqrt(P)),
        "gru1": gru_params(keys[2], keys[3], keys[4], keys[5], map_len),
        "gru2": gru_params(keys[6], keys[7], keys[8], keys[9], ptl),
        "gru3": gru_params(keys[10], keys[11], keys[12], keys[13], 1),
        "fc_w": uni(keys[14], (pred_len, 4 * hidR), 1.0 / jnp.sqrt(4.0 * hidR)),
        "fc_b": uni(keys[15], (pred_len,), 1.0 / jnp.sqrt(4.0 * hidR)),
    }


if __name__ == "__main__":
    # Small config consistent with the module: x is (B, ptl, P).
    B, ptl, P = 8, 8, 16
    map_len, hidR, pred_len = 32, 32, 4

    key = jax.random.PRNGKey(0)
    kx, kp = jax.random.split(key)
    x = jax.random.normal(kx, (B, ptl, P), jnp.float32)
    params = make_params(kp, P, ptl, map_len, hidR, pred_len)

    prepped = prepare_params(params)      # one-time weight re-layout, outside jit

    out = model_block_forward(x, prepped)
    out = jax.block_until_ready(out)

    ref = model_block_ref(x, params)
    assert out.shape == (B, pred_len)
    # Tolerance loosened slightly vs. pure-f32 (bf16 MXU operands over the
    # recurrence + approx reciprocal in the softmax); still a tight check.
    assert jnp.allclose(out, ref, rtol=2e-2, atol=2e-2), (out, ref)

    print("KERNEL_OK")
</pallas_src>

<mosaic_0001>
module attributes {stable_mosaic.version = 11 : i64} {
  func.func @_model_block_kernel(%arg0: memref<64x16xbf16, #tpu.memory_space<vmem>>, %arg1: memref<128x8xbf16, #tpu.memory_space<vmem>>, %arg2: memref<16x32xbf16, #tpu.memory_space<vmem>>, %arg3: memref<1x32xf32, #tpu.memory_space<vmem>>, %arg4: memref<32x96xbf16, #tpu.memory_space<vmem>>, %arg5: memref<32x96xbf16, #tpu.memory_space<vmem>>, %arg6: memref<1x96xf32, #tpu.memory_space<vmem>>, %arg7: memref<1x32xf32, #tpu.memory_space<vmem>>, %arg8: memref<8x192xbf16, #tpu.memory_space<vmem>>, %arg9: memref<64x192xbf16, #tpu.memory_space<vmem>>, %arg10: memref<1x192xf32, #tpu.memory_space<vmem>>, %arg11: memref<1x64xf32, #tpu.memory_space<vmem>>, %arg12: memref<32x4xbf16, #tpu.memory_space<vmem>>, %arg13: memref<32x4xbf16, #tpu.memory_space<vmem>>, %arg14: memref<64x4xbf16, #tpu.memory_space<vmem>>, %arg15: memref<1x4xf32, #tpu.memory_space<vmem>>, %arg16: memref<8x4xf32, #tpu.memory_space<vmem>>, %arg17: memref<64x96xf32, #tpu.memory_space<vmem>>, %arg18: memref<128x192xf32, #tpu.memory_space<vmem>>) attributes {dimension_semantics = [], scalar_prefetch = 0 : i64, scratch_operands = 2 : i64, tpu.core_type = #tpu.core_type<tc>} {
    %c0 = arith.constant 0 : index
    %c0_0 = arith.constant 0 : index
    %0 = vector.load %arg0[%c0, %c0_0] : memref<64x16xbf16, #tpu.memory_space<vmem>>, vector<64x16xbf16>
    %c0_1 = arith.constant 0 : index
    %c0_2 = arith.constant 0 : index
    %1 = vector.load %arg2[%c0_1, %c0_2] : memref<16x32xbf16, #tpu.memory_space<vmem>>, vector<16x32xbf16>
    %cst = arith.constant dense<0.000000e+00> : vector<64x32xf32>
    %2 = tpu.matmul %0, %1, %cst {dimension_numbers = #tpu.dot_dimension_numbers<[1], [0], [0], [1], [0, 0, 1, 1], [], []>} : vector<64x16xbf16>, vector<16x32xbf16>, vector<64x32xf32> -> vector<64x32xf32>
    %c0_3 = arith.constant 0 : index
    %c0_4 = arith.constant 0 : index
    %3 = vector.load %arg3[%c0_3, %c0_4] : memref<1x32xf32, #tpu.memory_space<vmem>>, vector<1x32xf32>
    %4 = vector.broadcast %3 : vector<1x32xf32> to vector<64x32xf32>
    %5 = arith.addf %2, %4 : vector<64x32xf32>
    %6 = arith.truncf %5 : vector<64x32xf32> to vector<64x32xbf16>
    %c0_5 = arith.constant 0 : index
    %c0_6 = arith.constant 0 : index
    %7 = vector.load %arg4[%c0_5, %c0_6] : memref<32x96xbf16, #tpu.memory_space<vmem>>, vector<32x96xbf16>
    %cst_7 = arith.constant dense<0.000000e+00> : vector<64x96xf32>
    %8 = tpu.matmul %6, %7, %cst_7 {dimension_numbers = #tpu.dot_dimension_numbers<[1], [0], [0], [1], [0, 0, 1, 1], [], []>} : vector<64x32xbf16>, vector<32x96xbf16>, vector<64x96xf32> -> vector<64x96xf32>
    %c0_8 = arith.constant 0 : index
    %c0_9 = arith.constant 0 : index
    %9 = vector.load %arg6[%c0_8, %c0_9] : memref<1x96xf32, #tpu.memory_space<vmem>>, vector<1x96xf32>
    %10 = vector.broadcast %9 : vector<1x96xf32> to vector<64x96xf32>
    %11 = arith.addf %8, %10 : vector<64x96xf32>
    %c0_10 = arith.constant 0 : index
    %c0_11 = arith.constant 0 : index
    %12 = vector.load %arg17[%c0_10, %c0_11] : memref<64x96xf32, #tpu.memory_space<vmem>>, vector<64x96xf32>
    tpu.vector_store %arg17[%c0_10, %c0_11], %11 {strides = array<i32>} : memref<64x96xf32, #tpu.memory_space<vmem>>, vector<64x96xf32>,
    %c0_12 = arith.constant 0 : index
    %c0_13 = arith.constant 0 : index
    %13 = vector.load %arg1[%c0_12, %c0_13] : memref<128x8xbf16, #tpu.memory_space<vmem>>, vector<128x8xbf16>
    %c0_14 = arith.constant 0 : index
    %c0_15 = arith.constant 0 : index
    %14 = vector.load %arg8[%c0_14, %c0_15] : memref<8x192xbf16, #tpu.memory_space<vmem>>, vector<8x192xbf16>
    %cst_16 = arith.constant dense<0.000000e+00> : vector<128x192xf32>
    %15 = tpu.matmul %13, %14, %cst_16 {dimension_numbers = #tpu.dot_dimension_numbers<[1], [0], [0], [1], [0, 0, 1, 1], [], []>} : vector<128x8xbf16>, vector<8x192xbf16>, vector<128x192xf32> -> vector<128x192xf32>
    %c0_17 = arith.constant 0 : index
    %c0_18 = arith.constant 0 : index
    %16 = vector.load %arg10[%c0_17, %c0_18] : memref<1x192xf32, #tpu.memory_space<vmem>>, vector<1x192xf32>
    %17 = vector.broadcast %16 : vector<1x192xf32> to vector<128x192xf32>
    %18 = arith.addf %15, %17 : vector<128x192xf32>
    %c0_19 = arith.constant 0 : index
    %c0_20 = arith.constant 0 : index
    %19 = vector.load %arg18[%c0_19, %c0_20] : memref<128x192xf32, #tpu.memory_space<vmem>>, vector<128x192xf32>
    tpu.vector_store %arg18[%c0_19, %c0_20], %18 {strides = array<i32>} : memref<128x192xf32, #tpu.memory_space<vmem>>, vector<128x192xf32>,
    %c0_21 = arith.constant 0 : index
    %c0_22 = arith.constant 0 : index
    %20 = vector.load %arg5[%c0_21, %c0_22] : memref<32x96xbf16, #tpu.memory_space<vmem>>, vector<32x96xbf16>
    %c0_23 = arith.constant 0 : index
    %c0_24 = arith.constant 0 : index
    %21 = vector.load %arg9[%c0_23, %c0_24] : memref<64x192xbf16, #tpu.memory_space<vmem>>, vector<64x192xbf16>
    %c0_25 = arith.constant 0 : index
    %c0_26 = arith.constant 0 : index
    %22 = vector.load %arg7[%c0_25, %c0_26] : memref<1x32xf32, #tpu.memory_space<vmem>>, vector<1x32xf32>
    %23 = vector.shape_cast %22 : vector<1x32xf32> to vector<1x32xf32>
    %24 = vector.broadcast %23 : vector<1x32xf32> to vector<8x32xf32>
    %c0_27 = arith.constant 0 : index
    %c0_28 = arith.constant 0 : index
    %25 = vector.load %arg11[%c0_27, %c0_28] : memref<1x64xf32, #tpu.memory_space<vmem>>, vector<1x64xf32>
    %26 = vector.shape_cast %25 : vector<1x64xf32> to vector<1x64xf32>
    %27 = vector.broadcast %26 : vector<1x64xf32> to vector<8x64xf32>
    %cst_29 = arith.constant 0.000000e+00 : f32
    %28 = vector.broadcast %cst_29 : f32 to vector<8x32xf32>
    %cst_30 = arith.constant 0.000000e+00 : f32
    %29 = vector.broadcast %cst_30 : f32 to vector<8x64xf32>
    %30 = arith.truncf %28 : vector<8x32xf32> to vector<8x32xbf16>
    %cst_31 = arith.constant dense<0.000000e+00> : vector<8x96xf32>
    %31 = tpu.matmul %30, %20, %cst_31 {dimension_numbers = #tpu.dot_dimension_numbers<[1], [0], [0], [1], [0, 0, 1, 1], [], []>} : vector<8x32xbf16>, vector<32x96xbf16>, vector<8x96xf32> -> vector<8x96xf32>
    %c0_32 = arith.constant 0 : index
    %c0_33 = arith.constant 0 : index
    %32 = vector.load %arg17[%c0_32, %c0_33] : memref<64x96xf32, #tpu.memory_space<vmem>>, vector<8x96xf32>
    %33 = vector.extract_strided_slice %32 {offsets = [0, 0], sizes = [8, 32], strides = [1, 1]} : vector<8x96xf32> to vector<8x32xf32>
    %34 = vector.extract_strided_slice %31 {offsets = [0, 0], sizes = [8, 32], strides = [1, 1]} : vector<8x96xf32> to vector<8x32xf32>
    %35 = arith.addf %33, %34 : vector<8x32xf32>
    %36 = arith.negf %35 : vector<8x32xf32>
    %37 = math.exp %36 : vector<8x32xf32>
    %cst_34 = arith.constant 1.000000e+00 : f32
    %38 = vector.broadcast %cst_34 : f32 to vector<8x32xf32>
    %39 = arith.addf %38, %37 : vector<8x32xf32>
    %40 = arith.divf %38, %39 : vector<8x32xf32>
    %41 = vector.extract_strided_slice %32 {offsets = [0, 32], sizes = [8, 32], strides = [1, 1]} : vector<8x96xf32> to vector<8x32xf32>
    %42 = vector.extract_strided_slice %31 {offsets = [0, 32], sizes = [8, 32], strides = [1, 1]} : vector<8x96xf32> to vector<8x32xf32>
    %43 = arith.addf %41, %42 : vector<8x32xf32>
    %44 = arith.negf %43 : vector<8x32xf32>
    %45 = math.exp %44 : vector<8x32xf32>
    %cst_35 = arith.constant 1.000000e+00 : f32
    %46 = vector.broadcast %cst_35 : f32 to vector<8x32xf32>
    %47 = arith.addf %46, %45 : vector<8x32xf32>
    %48 = arith.divf %46, %47 : vector<8x32xf32>
    %49 = vector.extract_strided_slice %32 {offsets = [0, 64], sizes = [8, 32], strides = [1, 1]} : vector<8x96xf32> to vector<8x32xf32>
    %50 = vector.extract_strided_slice %31 {offsets = [0, 64], sizes = [8, 32], strides = [1, 1]} : vector<8x96xf32> to vector<8x32xf32>
    %51 = arith.addf %50, %24 : vector<8x32xf32>
    %52 = arith.mulf %40, %51 : vector<8x32xf32>
    %53 = arith.addf %49, %52 : vector<8x32xf32>
    %54 = math.tanh %53 : vector<8x32xf32>
    %cst_36 = arith.constant 1.000000e+00 : f32
    %55 = vector.broadcast %cst_36 : f32 to vector<8x32xf32>
    %56 = arith.subf %55, %48 : vector<8x32xf32>
    %57 = arith.mulf %56, %54 : vector<8x32xf32>
    %58 = arith.mulf %48, %28 : vector<8x32xf32>
    %59 = arith.addf %57, %58 : vector<8x32xf32>
    %60 = arith.truncf %29 : vector<8x64xf32> to vector<8x64xbf16>
    %cst_37 = arith.constant dense<0.000000e+00> : vector<8x192xf32>
    %61 = tpu.matmul %60, %21, %cst_37 {dimension_numbers = #tpu.dot_dimension_numbers<[1], [0], [0], [1], [0, 0, 1, 1], [], []>} : vector<8x64xbf16>, vector<64x192xbf16>, vector<8x192xf32> -> vector<8x192xf32>
    %c0_38 = arith.constant 0 : index
    %c0_39 = arith.constant 0 : index
    %62 = vector.load %arg18[%c0_38, %c0_39] : memref<128x192xf32, #tpu.memory_space<vmem>>, vector<8x192xf32>
    %63 = vector.extract_strided_slice %62 {offsets = [0, 0], sizes = [8, 64], strides = [1, 1]} : vector<8x192xf32> to vector<8x64xf32>
    %64 = vector.extract_strided_slice %61 {offsets = [0, 0], sizes = [8, 64], strides = [1, 1]} : vector<8x192xf32> to vector<8x64xf32>
    %65 = arith.addf %63, %64 : vector<8x64xf32>
    %66 = arith.negf %65 : vector<8x64xf32>
    %67 = math.exp %66 : vector<8x64xf32>
    %cst_40 = arith.constant 1.000000e+00 : f32
    %68 = vector.broadcast %cst_40 : f32 to vector<8x64xf32>
    %69 = arith.addf %68, %67 : vector<8x64xf32>
    %70 = arith.divf %68, %69 : vector<8x64xf32>
    %71 = vector.extract_strided_slice %62 {offsets = [0, 64], sizes = [8, 64], strides = [1, 1]} : vector<8x192xf32> to vector<8x64xf32>
    %72 = vector.extract_strided_slice %61 {offsets = [0, 64], sizes = [8, 64], strides = [1, 1]} : vector<8x192xf32> to vector<8x64xf32>
    %73 = arith.addf %71, %72 : vector<8x64xf32>
    %74 = arith.negf %73 : vector<8x64xf32>
    %75 = math.exp %74 : vector<8x64xf32>
    %cst_41 = arith.constant 1.000000e+00 : f32
    %76 = vector.broadcast %cst_41 : f32 to vector<8x64xf32>
    %77 = arith.addf %76, %75 : vector<8x64xf32>
    %78 = arith.divf %76, %77 : vector<8x64xf32>
    %79 = vector.extract_strided_slice %62 {offsets = [0, 128], sizes = [8, 64], strides = [1, 1]} : vector<8x192xf32> to vector<8x64xf32>
    %80 = vector.extract_strided_slice %61 {offsets = [0, 128], sizes = [8, 64], strides = [1, 1]} : vector<8x192xf32> to vector<8x64xf32>
    %81 = arith.addf %80, %27 : vector<8x64xf32>
    %82 = arith.mulf %70, %81 : vector<8x64xf32>
    %83 = arith.addf %79, %82 : vector<8x64xf32>
    %84 = math.tanh %83 : vector<8x64xf32>
    %cst_42 = arith.constant 1.000000e+00 : f32
    %85 = vector.broadcast %cst_42 : f32 to vector<8x64xf32>
    %86 = arith.subf %85, %78 : vector<8x64xf32>
    %87 = arith.mulf %86, %84 : vector<8x64xf32>
    %88 = arith.mulf %78, %29 : vector<8x64xf32>
    %89 = arith.addf %87, %88 : vector<8x64xf32>
    %90 = arith.truncf %59 : vector<8x32xf32> to vector<8x32xbf16>
    %cst_43 = arith.constant dense<0.000000e+00> : vector<8x96xf32>
    %91 = tpu.matmul %90, %20, %cst_43 {dimension_numbers = #tpu.dot_dimension_numbers<[1], [0], [0], [1], [0, 0, 1, 1], [], []>} : vector<8x32xbf16>, vector<32x96xbf16>, vector<8x96xf32> -> vector<8x96xf32>
    %c8 = arith.constant 8 : index
    %c0_44 = arith.constant 0 : index
    %92 = vector.load %arg17[%c8, %c0_44] : memref<64x96xf32, #tpu.memory_space<vmem>>, vector<8x96xf32>
    %93 = vector.extract_strided_slice %92 {offsets = [0, 0], sizes = [8, 32], strides = [1, 1]} : vector<8x96xf32> to vector<8x32xf32>
    %94 = vector.extract_strided_slice %91 {offsets = [0, 0], sizes = [8, 32], strides = [1, 1]} : vector<8x96xf32> to vector<8x32xf32>
    %95 = arith.addf %93, %94 : vector<8x32xf32>
    %96 = arith.negf %95 : vector<8x32xf32>
    %97 = math.exp %96 : vector<8x32xf32>
    %cst_45 = arith.constant 1.000000e+00 : f32
    %98 = vector.broadcast %cst_45 : f32 to vector<8x32xf32>
    %99 = arith.addf %98, %97 : vector<8x32xf32>
    %100 = arith.divf %98, %99 : vector<8x32xf32>
    %101 = vector.extract_strided_slice %92 {offsets = [0, 32], sizes = [8, 32], strides = [1, 1]} : vector<8x96xf32> to vector<8x32xf32>
    %102 = vector.extract_strided_slice %91 {offsets = [0, 32], sizes = [8, 32], strides = [1, 1]} : vector<8x96xf32> to vector<8x32xf32>
    %103 = arith.addf %101, %102 : vector<8x32xf32>
    %104 = arith.negf %103 : vector<8x32xf32>
    %105 = math.exp %104 : vector<8x32xf32>
    %cst_46 = arith.constant 1.000000e+00 : f32
    %106 = vector.broadcast %cst_46 : f32 to vector<8x32xf32>
    %107 = arith.addf %106, %105 : vector<8x32xf32>
    %108 = arith.divf %106, %107 : vector<8x32xf32>
    %109 = vector.extract_strided_slice %92 {offsets = [0, 64], sizes = [8, 32], strides = [1, 1]} : vector<8x96xf32> to vector<8x32xf32>
    %110 = vector.extract_strided_slice %91 {offsets = [0, 64], sizes = [8, 32], strides = [1, 1]} : vector<8x96xf32> to vector<8x32xf32>
    %111 = arith.addf %110, %24 : vector<8x32xf32>
    %112 = arith.mulf %100, %111 : vector<8x32xf32>
    %113 = arith.addf %109, %112 : vector<8x32xf32>
    %114 = math.tanh %113 : vector<8x32xf32>
    %cst_47 = arith.constant 1.000000e+00 : f32
    %115 = vector.broadcast %cst_47 : f32 to vector<8x32xf32>
    %116 = arith.subf %115, %108 : vector<8x32xf32>
    %117 = arith.mulf %116, %114 : vector<8x32xf32>
    %118 = arith.mulf %108, %59 : vector<8x32xf32>
    %119 = arith.addf %117, %118 : vector<8x32xf32>
    %120 = arith.truncf %89 : vector<8x64xf32> to vector<8x64xbf16>
    %cst_48 = arith.constant dense<0.000000e+00> : vector<8x192xf32>
    %121 = tpu.matmul %120, %21, %cst_48 {dimension_numbers = #tpu.dot_dimension_numbers<[1], [0], [0], [1], [0, 0, 1, 1], [], []>} : vector<8x64xbf16>, vector<64x192xbf16>, vector<8x192xf32> -> vector<8x192xf32>
    %c8_49 = arith.constant 8 : index
    %c0_50 = arith.constant 0 : index
    %122 = vector.load %arg18[%c8_49, %c0_50] : memref<128x192xf32, #tpu.memory_space<vmem>>, vector<8x192xf32>
    %123 = vector.extract_strided_slice %122 {offsets = [0, 0], sizes = [8, 64], strides = [1, 1]} : vector<8x192xf32> to vector<8x64xf32>
    %124 = vector.extract_strided_slice %121 {offsets = [0, 0], sizes = [8, 64], strides = [1, 1]} : vector<8x192xf32> to vector<8x64xf32>
    %125 = arith.addf %123, %124 : vector<8x64xf32>
    %126 = arith.negf %125 : vector<8x64xf32>
    %127 = math.exp %126 : vector<8x64xf32>
    %cst_51 = arith.constant 1.000000e+00 : f32
    %128 = vector.broadcast %cst_51 : f32 to vector<8x64xf32>
    %129 = arith.addf %128, %127 : vector<8x64xf32>
    %130 = arith.divf %128, %129 : vector<8x64xf32>
    %131 = vector.extract_strided_slice %122 {offsets = [0, 64], sizes = [8, 64], strides = [1, 1]} : vector<8x192xf32> to vector<8x64xf32>
    %132 = vector.extract_strided_slice %121 {offsets = [0, 64], sizes = [8, 64], strides = [1, 1]} : vector<8x192xf32> to vector<8x64xf32>
    %133 = arith.addf %131, %132 : vector<8x64xf32>
    %134 = arith.negf %133 : vector<8x64xf32>
    %135 = math.exp %134 : vector<8x64xf32>
    %cst_52 = arith.constant 1.000000e+00 : f32
    %136 = vector.broadcast %cst_52 : f32 to vector<8x64xf32>
    %137 = arith.addf %136, %135 : vector<8x64xf32>
    %138 = arith.divf %136, %137 : vector<8x64xf32>
    %139 = vector.extract_strided_slice %122 {offsets = [0, 128], sizes = [8, 64], strides = [1, 1]} : vector<8x192xf32> to vector<8x64xf32>
    %140 = vector.extract_strided_slice %121 {offsets = [0, 128], sizes = [8, 64], strides = [1, 1]} : vector<8x192xf32> to vector<8x64xf32>
    %141 = arith.addf %140, %27 : vector<8x64xf32>
    %142 = arith.mulf %130, %141 : vector<8x64xf32>
    %143 = arith.addf %139, %142 : vector<8x64xf32>
    %144 = math.tanh %143 : vector<8x64xf32>
    %cst_53 = arith.constant 1.000000e+00 : f32
    %145 = vector.broadcast %cst_53 : f32 to vector<8x64xf32>
    %146 = arith.subf %145, %138 : vector<8x64xf32>
    %147 = arith.mulf %146, %144 : vector<8x64xf32>
    %148 = arith.mulf %138, %89 : vector<8x64xf32>
    %149 = arith.addf %147, %148 : vector<8x64xf32>
    %150 = arith.truncf %119 : vector<8x32xf32> to vector<8x32xbf16>
    %cst_54 = arith.constant dense<0.000000e+00> : vector<8x96xf32>
    %151 = tpu.matmul %150, %20, %cst_54 {dimension_numbers = #tpu.dot_dimension_numbers<[1], [0], [0], [1], [0, 0, 1, 1], [], []>} : vector<8x32xbf16>, vector<32x96xbf16>, vector<8x96xf32> -> vector<8x96xf32>
    %c16 = arith.constant 16 : index
    %c0_55 = arith.constant 0 : index
    %152 = vector.load %arg17[%c16, %c0_55] : memref<64x96xf32, #tpu.memory_space<vmem>>, vector<8x96xf32>
    %153 = vector.extract_strided_slice %152 {offsets = [0, 0], sizes = [8, 32], strides = [1, 1]} : vector<8x96xf32> to vector<8x32xf32>
    %154 = vector.extract_strided_slice %151 {offsets = [0, 0], sizes = [8, 32], strides = [1, 1]} : vector<8x96xf32> to vector<8x32xf32>
    %155 = arith.addf %153, %154 : vector<8x32xf32>
    %156 = arith.negf %155 : vector<8x32xf32>
    %157 = math.exp %156 : vector<8x32xf32>
    %cst_56 = arith.constant 1.000000e+00 : f32
    %158 = vector.broadcast %cst_56 : f32 to vector<8x32xf32>
    %159 = arith.addf %158, %157 : vector<8x32xf32>
    %160 = arith.divf %158, %159 : vector<8x32xf32>
    %161 = vector.extract_strided_slice %152 {offsets = [0, 32], sizes = [8, 32], strides = [1, 1]} : vector<8x96xf32> to vector<8x32xf32>
    %162 = vector.extract_strided_slice %151 {offsets = [0, 32], sizes = [8, 32], strides = [1, 1]} : vector<8x96xf32> to vector<8x32xf32>
    %163 = arith.addf %161, %162 : vector<8x32xf32>
    %164 = arith.negf %163 : vector<8x32xf32>
    %165 = math.exp %164 : vector<8x32xf32>
    %cst_57 = arith.constant 1.000000e+00 : f32
    %166 = vector.broadcast %cst_57 : f32 to vector<8x32xf32>
    %167 = arith.addf %166, %165 : vector<8x32xf32>
    %168 = arith.divf %166, %167 : vector<8x32xf32>
    %169 = vector.extract_strided_slice %152 {offsets = [0, 64], sizes = [8, 32], strides = [1, 1]} : vector<8x96xf32> to vector<8x32xf32>
    %170 = vector.extract_strided_slice %151 {offsets = [0, 64], sizes = [8, 32], strides = [1, 1]} : vector<8x96xf32> to vector<8x32xf32>
    %171 = arith.addf %170, %24 : vector<8x32xf32>
    %172 = arith.mulf %160, %171 : vector<8x32xf32>
    %173 = arith.addf %169, %172 : vector<8x32xf32>
    %174 = math.tanh %173 : vector<8x32xf32>
    %cst_58 = arith.constant 1.000000e+00 : f32
    %175 = vector.broadcast %cst_58 : f32 to vector<8x32xf32>
    %176 = arith.subf %175, %168 : vector<8x32xf32>
    %177 = arith.mulf %176, %174 : vector<8x32xf32>
    %178 = arith.mulf %168, %119 : vector<8x32xf32>
    %179 = arith.addf %177, %178 : vector<8x32xf32>
    %180 = arith.truncf %149 : vector<8x64xf32> to vector<8x64xbf16>
    %cst_59 = arith.constant dense<0.000000e+00> : vector<8x192xf32>
    %181 = tpu.matmul %180, %21, %cst_59 {dimension_numbers = #tpu.dot_dimension_numbers<[1], [0], [0], [1], [0, 0, 1, 1], [], []>} : vector<8x64xbf16>, vector<64x192xbf16>, vector<8x192xf32> -> vector<8x192xf32>
    %c16_60 = arith.constant 16 : index
    %c0_61 = arith.constant 0 : index
    %182 = vector.load %arg18[%c16_60, %c0_61] : memref<128x192xf32, #tpu.memory_space<vmem>>, vector<8x192xf32>
    %183 = vector.extract_strided_slice %182 {offsets = [0, 0], sizes = [8, 64], strides = [1, 1]} : vector<8x192xf32> to vector<8x64xf32>
    %184 = vector.extract_strided_slice %181 {offsets = [0, 0], sizes = [8, 64], strides = [1, 1]} : vector<8x192xf32> to vector<8x64xf32>
    %185 = arith.addf %183, %184 : vector<8x64xf32>
    %186 = arith.negf %185 : vector<8x64xf32>
    %187 = math.exp %186 : vector<8x64xf32>
    %cst_62 = arith.constant 1.000000e+00 : f32
    %188 = vector.broadcast %cst_62 : f32 to vector<8x64xf32>
    %189 = arith.addf %188, %187 : vector<8x64xf32>
    %190 = arith.divf %188, %189 : vector<8x64xf32>
    %191 = vector.extract_strided_slice %182 {offsets = [0, 64], sizes = [8, 64], strides = [1, 1]} : vector<8x192xf32> to vector<8x64xf32>
    %192 = vector.extract_strided_slice %181 {offsets = [0, 64], sizes = [8, 64], strides = [1, 1]} : vector<8x192xf32> to vector<8x64xf32>
    %193 = arith.addf %191, %192 : vector<8x64xf32>
    %194 = arith.negf %193 : vector<8x64xf32>
    %195 = math.exp %194 : vector<8x64xf32>
    %cst_63 = arith.constant 1.000000e+00 : f32
    %196 = vector.broadcast %cst_63 : f32 to vector<8x64xf32>
    %197 = arith.addf %196, %195 : vector<8x64xf32>
    %198 = arith.divf %196, %197 : vector<8x64xf32>
    %199 = vector.extract_strided_slice %182 {offsets = [0, 128], sizes = [8, 64], strides = [1, 1]} : vector<8x192xf32> to vector<8x64xf32>
    %200 = vector.extract_strided_slice %181 {offsets = [0, 128], sizes = [8, 64], strides = [1, 1]} : vector<8x192xf32> to vector<8x64xf32>
    %201 = arith.addf %200, %27 : vector<8x64xf32>
    %202 = arith.mulf %190, %201 : vector<8x64xf32>
    %203 = arith.addf %199, %202 : vector<8x64xf32>
    %204 = math.tanh %203 : vector<8x64xf32>
    %cst_64 = arith.constant 1.000000e+00 : f32
    %205 = vector.broadcast %cst_64 : f32 to vector<8x64xf32>
    %206 = arith.subf %205, %198 : vector<8x64xf32>
    %207 = arith.mulf %206, %204 : vector<8x64xf32>
    %208 = arith.mulf %198, %149 : vector<8x64xf32>
    %209 = arith.addf %207, %208 : vector<8x64xf32>
    %210 = arith.truncf %179 : vector<8x32xf32> to vector<8x32xbf16>
    %cst_65 = arith.constant dense<0.000000e+00> : vector<8x96xf32>
    %211 = tpu.matmul %210, %20, %cst_65 {dimension_numbers = #tpu.dot_dimension_numbers<[1], [0], [0], [1], [0, 0, 1, 1], [], []>} : vector<8x32xbf16>, vector<32x96xbf16>, vector<8x96xf32> -> vector<8x96xf32>
    %c24 = arith.constant 24 : index
    %c0_66 = arith.constant 0 : index
    %212 = vector.load %arg17[%c24, %c0_66] : memref<64x96xf32, #tpu.memory_space<vmem>>, vector<8x96xf32>
    %213 = vector.extract_strided_slice %212 {offsets = [0, 0], sizes = [8, 32], strides = [1, 1]} : vector<8x96xf32> to vector<8x32xf32>
    %214 = vector.extract_strided_slice %211 {offsets = [0, 0], sizes = [8, 32], strides = [1, 1]} : vector<8x96xf32> to vector<8x32xf32>
    %215 = arith.addf %213, %214 : vector<8x32xf32>
    %216 = arith.negf %215 : vector<8x32xf32>
    %217 = math.exp %216 : vector<8x32xf32>
    %cst_67 = arith.constant 1.000000e+00 : f32
    %218 = vector.broadcast %cst_67 : f32 to vector<8x32xf32>
    %219 = arith.addf %218, %217 : vector<8x32xf32>
    %220 = arith.divf %218, %219 : vector<8x32xf32>
    %221 = vector.extract_strided_slice %212 {offsets = [0, 32], sizes = [8, 32], strides = [1, 1]} : vector<8x96xf32> to vector<8x32xf32>
    %222 = vector.extract_strided_slice %211 {offsets = [0, 32], sizes = [8, 32], strides = [1, 1]} : vector<8x96xf32> to vector<8x32xf32>
    %223 = arith.addf %221, %222 : vector<8x32xf32>
    %224 = arith.negf %223 : vector<8x32xf32>
    %225 = math.exp %224 : vector<8x32xf32>
    %cst_68 = arith.constant 1.000000e+00 : f32
    %226 = vector.broadcast %cst_68 : f32 to vector<8x32xf32>
    %227 = arith.addf %226, %225 : vector<8x32xf32>
    %228 = arith.divf %226, %227 : vector<8x32xf32>
    %229 = vector.extract_strided_slice %212 {offsets = [0, 64], sizes = [8, 32], strides = [1, 1]} : vector<8x96xf32> to vector<8x32xf32>
    %230 = vector.extract_strided_slice %211 {offsets = [0, 64], sizes = [8, 32], strides = [1, 1]} : vector<8x96xf32> to vector<8x32xf32>
    %231 = arith.addf %230, %24 : vector<8x32xf32>
    %232 = arith.mulf %220, %231 : vector<8x32xf32>
    %233 = arith.addf %229, %232 : vector<8x32xf32>
    %234 = math.tanh %233 : vector<8x32xf32>
    %cst_69 = arith.constant 1.000000e+00 : f32
    %235 = vector.broadcast %cst_69 : f32 to vector<8x32xf32>
    %236 = arith.subf %235, %228 : vector<8x32xf32>
    %237 = arith.mulf %236, %234 : vector<8x32xf32>
    %238 = arith.mulf %228, %179 : vector<8x32xf32>
    %239 = arith.addf %237, %238 : vector<8x32xf32>
    %240 = arith.truncf %209 : vector<8x64xf32> to vector<8x64xbf16>
    %cst_70 = arith.constant dense<0.000000e+00> : vector<8x192xf32>
    %241 = tpu.matmul %240, %21, %cst_70 {dimension_numbers = #tpu.dot_dimension_numbers<[1], [0], [0], [1], [0, 0, 1, 1], [], []>} : vector<8x64xbf16>, vector<64x192xbf16>, vector<8x192xf32> -> vector<8x192xf32>
    %c24_71 = arith.constant 24 : index
    %c0_72 = arith.constant 0 : index
    %242 = vector.load %arg18[%c24_71, %c0_72] : memref<128x192xf32, #tpu.memory_space<vmem>>, vector<8x192xf32>
    %243 = vector.extract_strided_slice %242 {offsets = [0, 0], sizes = [8, 64], strides = [1, 1]} : vector<8x192xf32> to vector<8x64xf32>
    %244 = vector.extract_strided_slice %241 {offsets = [0, 0], sizes = [8, 64], strides = [1, 1]} : vector<8x192xf32> to vector<8x64xf32>
    %245 = arith.addf %243, %244 : vector<8x64xf32>
    %246 = arith.negf %245 : vector<8x64xf32>
    %247 = math.exp %246 : vector<8x64xf32>
    %cst_73 = arith.constant 1.000000e+00 : f32
    %248 = vector.broadcast %cst_73 : f32 to vector<8x64xf32>
    %249 = arith.addf %248, %247 : vector<8x64xf32>
    %250 = arith.divf %248, %249 : vector<8x64xf32>
    %251 = vector.extract_strided_slice %242 {offsets = [0, 64], sizes = [8, 64], strides = [1, 1]} : vector<8x192xf32> to vector<8x64xf32>
    %252 = vector.extract_strided_slice %241 {offsets = [0, 64], sizes = [8, 64], strides = [1, 1]} : vector<8x192xf32> to vector<8x64xf32>
    %253 = arith.addf %251, %252 : vector<8x64xf32>
    %254 = arith.negf %253 : vector<8x64xf32>
    %255 = math.exp %254 : vector<8x64xf32>
    %cst_74 = arith.constant 1.000000e+00 : f32
    %256 = vector.broadcast %cst_74 : f32 to vector<8x64xf32>
    %257 = arith.addf %256, %255 : vector<8x64xf32>
    %258 = arith.divf %256, %257 : vector<8x64xf32>
    %259 = vector.extract_strided_slice %242 {offsets = [0, 128], sizes = [8, 64], strides = [1, 1]} : vector<8x192xf32> to vector<8x64xf32>
    %260 = vector.extract_strided_slice %241 {offsets = [0, 128], sizes = [8, 64], strides = [1, 1]} : vector<8x192xf32> to vector<8x64xf32>
    %261 = arith.addf %260, %27 : vector<8x64xf32>
    %262 = arith.mulf %250, %261 : vector<8x64xf32>
    %263 = arith.addf %259, %262 : vector<8x64xf32>
    %264 = math.tanh %263 : vector<8x64xf32>
    %cst_75 = arith.constant 1.000000e+00 : f32
    %265 = vector.broadcast %cst_75 : f32 to vector<8x64xf32>
    %266 = arith.subf %265, %258 : vector<8x64xf32>
    %267 = arith.mulf %266, %264 : vector<8x64xf32>
    %268 = arith.mulf %258, %209 : vector<8x64xf32>
    %269 = arith.addf %267, %268 : vector<8x64xf32>
    %270 = arith.truncf %239 : vector<8x32xf32> to vector<8x32xbf16>
    %cst_76 = arith.constant dense<0.000000e+00> : vector<8x96xf32>
    %271 = tpu.matmul %270, %20, %cst_76 {dimension_numbers = #tpu.dot_dimension_numbers<[1], [0], [0], [1], [0, 0, 1, 1], [], []>} : vector<8x32xbf16>, vector<32x96xbf16>, vector<8x96xf32> -> vector<8x96xf32>
    %c32 = arith.constant 32 : index
    %c0_77 = arith.constant 0 : index
    %272 = vector.load %arg17[%c32, %c0_77] : memref<64x96xf32, #tpu.memory_space<vmem>>, vector<8x96xf32>
    %273 = vector.extract_strided_slice %272 {offsets = [0, 0], sizes = [8, 32], strides = [1, 1]} : vector<8x96xf32> to vector<8x32xf32>
    %274 = vector.extract_strided_slice %271 {offsets = [0, 0], sizes = [8, 32], strides = [1, 1]} : vector<8x96xf32> to vector<8x32xf32>
    %275 = arith.addf %273, %274 : vector<8x32xf32>
    %276 = arith.negf %275 : vector<8x32xf32>
    %277 = math.exp %276 : vector<8x32xf32>
    %cst_78 = arith.constant 1.000000e+00 : f32
    %278 = vector.broadcast %cst_78 : f32 to vector<8x32xf32>
    %279 = arith.addf %278, %277 : vector<8x32xf32>
    %280 = arith.divf %278, %279 : vector<8x32xf32>
    %281 = vector.extract_strided_slice %272 {offsets = [0, 32], sizes = [8, 32], strides = [1, 1]} : vector<8x96xf32> to vector<8x32xf32>
    %282 = vector.extract_strided_slice %271 {offsets = [0, 32], sizes = [8, 32], strides = [1, 1]} : vector<8x96xf32> to vector<8x32xf32>
    %283 = arith.addf %281, %282 : vector<8x32xf32>
    %284 = arith.negf %283 : vector<8x32xf32>
    %285 = math.exp %284 : vector<8x32xf32>
    %cst_79 = arith.constant 1.000000e+00 : f32
    %286 = vector.broadcast %cst_79 : f32 to vector<8x32xf32>
    %287 = arith.addf %286, %285 : vector<8x32xf32>
    %288 = arith.divf %286, %287 : vector<8x32xf32>
    %289 = vector.extract_strided_slice %272 {offsets = [0, 64], sizes = [8, 32], strides = [1, 1]} : vector<8x96xf32> to vector<8x32xf32>
    %290 = vector.extract_strided_slice %271 {offsets = [0, 64], sizes = [8, 32], strides = [1, 1]} : vector<8x96xf32> to vector<8x32xf32>
    %291 = arith.addf %290, %24 : vector<8x32xf32>
    %292 = arith.mulf %280, %291 : vector<8x32xf32>
    %293 = arith.addf %289, %292 : vector<8x32xf32>
    %294 = math.tanh %293 : vector<8x32xf32>
    %cst_80 = arith.constant 1.000000e+00 : f32
    %295 = vector.broadcast %cst_80 : f32 to vector<8x32xf32>
    %296 = arith.subf %295, %288 : vector<8x32xf32>
    %297 = arith.mulf %296, %294 : vector<8x32xf32>
    %298 = arith.mulf %288, %239 : vector<8x32xf32>
    %299 = arith.addf %297, %298 : vector<8x32xf32>
    %300 = arith.truncf %269 : vector<8x64xf32> to vector<8x64xbf16>
    %cst_81 = arith.constant dense<0.000000e+00> : vector<8x192xf32>
    %301 = tpu.matmul %300, %21, %cst_81 {dimension_numbers = #tpu.dot_dimension_numbers<[1], [0], [0], [1], [0, 0, 1, 1], [], []>} : vector<8x64xbf16>, vector<64x192xbf16>, vector<8x192xf32> -> vector<8x192xf32>
    %c32_82 = arith.constant 32 : index
    %c0_83 = arith.constant 0 : index
    %302 = vector.load %arg18[%c32_82, %c0_83] : memref<128x192xf32, #tpu.memory_space<vmem>>, vector<8x192xf32>
    %303 = vector.extract_strided_slice %302 {offsets = [0, 0], sizes = [8, 64], strides = [1, 1]} : vector<8x192xf32> to vector<8x64xf32>
    %304 = vector.extract_strided_slice %301 {offsets = [0, 0], sizes = [8, 64], strides = [1, 1]} : vector<8x192xf32> to vector<8x64xf32>
    %305 = arith.addf %303, %304 : vector<8x64xf32>
    %306 = arith.negf %305 : vector<8x64xf32>
    %307 = math.exp %306 : vector<8x64xf32>
    %cst_84 = arith.constant 1.000000e+00 : f32
    %308 = vector.broadcast %cst_84 : f32 to vector<8x64xf32>
    %309 = arith.addf %308, %307 : vector<8x64xf32>
    %310 = arith.divf %308, %309 : vector<8x64xf32>
    %311 = vector.extract_strided_slice %302 {offsets = [0, 64], sizes = [8, 64], strides = [1, 1]} : vector<8x192xf32> to vector<8x64xf32>
    %312 = vector.extract_strided_slice %301 {offsets = [0, 64], sizes = [8, 64], strides = [1, 1]} : vector<8x192xf32> to vector<8x64xf32>
    %313 = arith.addf %311, %312 : vector<8x64xf32>
    %314 = arith.negf %313 : vector<8x64xf32>
    %315 = math.exp %314 : vector<8x64xf32>
    %cst_85 = arith.constant 1.000000e+00 : f32
    %316 = vector.broadcast %cst_85 : f32 to vector<8x64xf32>
    %317 = arith.addf %316, %315 : vector<8x64xf32>
    %318 = arith.divf %316, %317 : vector<8x64xf32>
    %319 = vector.extract_strided_slice %302 {offsets = [0, 128], sizes = [8, 64], strides = [1, 1]} : vector<8x192xf32> to vector<8x64xf32>
    %320 = vector.extract_strided_slice %301 {offsets = [0, 128], sizes = [8, 64], strides = [1, 1]} : vector<8x192xf32> to vector<8x64xf32>
    %321 = arith.addf %320, %27 : vector<8x64xf32>
    %322 = arith.mulf %310, %321 : vector<8x64xf32>
    %323 = arith.addf %319, %322 : vector<8x64xf32>
    %324 = math.tanh %323 : vector<8x64xf32>
    %cst_86 = arith.constant 1.000000e+00 : f32
    %325 = vector.broadcast %cst_86 : f32 to vector<8x64xf32>
    %326 = arith.subf %325, %318 : vector<8x64xf32>
    %327 = arith.mulf %326, %324 : vector<8x64xf32>
    %328 = arith.mulf %318, %269 : vector<8x64xf32>
    %329 = arith.addf %327, %328 : vector<8x64xf32>
    %330 = arith.truncf %299 : vector<8x32xf32> to vector<8x32xbf16>
    %cst_87 = arith.constant dense<0.000000e+00> : vector<8x96xf32>
    %331 = tpu.matmul %330, %20, %cst_87 {dimension_numbers = #tpu.dot_dimension_numbers<[1], [0], [0], [1], [0, 0, 1, 1], [], []>} : vector<8x32xbf16>, vector<32x96xbf16>, vector<8x96xf32> -> vector<8x96xf32>
    %c40 = arith.constant 40 : index
    %c0_88 = arith.constant 0 : index
    %332 = vector.load %arg17[%c40, %c0_88] : memref<64x96xf32, #tpu.memory_space<vmem>>, vector<8x96xf32>
    %333 = vector.extract_strided_slice %332 {offsets = [0, 0], sizes = [8, 32], strides = [1, 1]} : vector<8x96xf32> to vector<8x32xf32>
    %334 = vector.extract_strided_slice %331 {offsets = [0, 0], sizes = [8, 32], strides = [1, 1]} : vector<8x96xf32> to vector<8x32xf32>
    %335 = arith.addf %333, %334 : vector<8x32xf32>
    %336 = arith.negf %335 : vector<8x32xf32>
    %337 = math.exp %336 : vector<8x32xf32>
    %cst_89 = arith.constant 1.000000e+00 : f32
    %338 = vector.broadcast %cst_89 : f32 to vector<8x32xf32>
    %339 = arith.addf %338, %337 : vector<8x32xf32>
    %340 = arith.divf %338, %339 : vector<8x32xf32>
    %341 = vector.extract_strided_slice %332 {offsets = [0, 32], sizes = [8, 32], strides = [1, 1]} : vector<8x96xf32> to vector<8x32xf32>
    %342 = vector.extract_strided_slice %331 {offsets = [0, 32], sizes = [8, 32], strides = [1, 1]} : vector<8x96xf32> to vector<8x32xf32>
    %343 = arith.addf %341, %342 : vector<8x32xf32>
    %344 = arith.negf %343 : vector<8x32xf32>
    %345 = math.exp %344 : vector<8x32xf32>
    %cst_90 = arith.constant 1.000000e+00 : f32
    %346 = vector.broadcast %cst_90 : f32 to vector<8x32xf32>
    %347 = arith.addf %346, %345 : vector<8x32xf32>
    %348 = arith.divf %346, %347 : vector<8x32xf32>
    %349 = vector.extract_strided_slice %332 {offsets = [0, 64], sizes = [8, 32], strides = [1, 1]} : vector<8x96xf32> to vector<8x32xf32>
    %350 = vector.extract_strided_slice %331 {offsets = [0, 64], sizes = [8, 32], strides = [1, 1]} : vector<8x96xf32> to vector<8x32xf32>
    %351 = arith.addf %350, %24 : vector<8x32xf32>
    %352 = arith.mulf %340, %351 : vector<8x32xf32>
    %353 = arith.addf %349, %352 : vector<8x32xf32>
    %354 = math.tanh %353 : vector<8x32xf32>
    %cst_91 = arith.constant 1.000000e+00 : f32
    %355 = vector.broadcast %cst_91 : f32 to vector<8x32xf32>
    %356 = arith.subf %355, %348 : vector<8x32xf32>
    %357 = arith.mulf %356, %354 : vector<8x32xf32>
    %358 = arith.mulf %348, %299 : vector<8x32xf32>
    %359 = arith.addf %357, %358 : vector<8x32xf32>
    %360 = arith.truncf %329 : vector<8x64xf32> to vector<8x64xbf16>
    %cst_92 = arith.constant dense<0.000000e+00> : vector<8x192xf32>
    %361 = tpu.matmul %360, %21, %cst_92 {dimension_numbers = #tpu.dot_dimension_numbers<[1], [0], [0], [1], [0, 0, 1, 1], [], []>} : vector<8x64xbf16>, vector<64x192xbf16>, vector<8x192xf32> -> vector<8x192xf32>
    %c40_93 = arith.constant 40 : index
    %c0_94 = arith.constant 0 : index
    %362 = vector.load %arg18[%c40_93, %c0_94] : memref<128x192xf32, #tpu.memory_space<vmem>>, vector<8x192xf32>
    %363 = vector.extract_strided_slice %362 {offsets = [0, 0], sizes = [8, 64], strides = [1, 1]} : vector<8x192xf32> to vector<8x64xf32>
    %364 = vector.extract_strided_slice %361 {offsets = [0, 0], sizes = [8, 64], strides = [1, 1]} : vector<8x192xf32> to vector<8x64xf32>
    %365 = arith.addf %363, %364 : vector<8x64xf32>
    %366 = arith.negf %365 : vector<8x64xf32>
    %367 = math.exp %366 : vector<8x64xf32>
    %cst_95 = arith.constant 1.000000e+00 : f32
    %368 = vector.broadcast %cst_95 : f32 to vector<8x64xf32>
    %369 = arith.addf %368, %367 : vector<8x64xf32>
    %370 = arith.divf %368, %369 : vector<8x64xf32>
    %371 = vector.extract_strided_slice %362 {offsets = [0, 64], sizes = [8, 64], strides = [1, 1]} : vector<8x192xf32> to vector<8x64xf32>
    %372 = vector.extract_strided_slice %361 {offsets = [0, 64], sizes = [8, 64], strides = [1, 1]} : vector<8x192xf32> to vector<8x64xf32>
    %373 = arith.addf %371, %372 : vector<8x64xf32>
    %374 = arith.negf %373 : vector<8x64xf32>
    %375 = math.exp %374 : vector<8x64xf32>
    %cst_96 = arith.constant 1.000000e+00 : f32
    %376 = vector.broadcast %cst_96 : f32 to vector<8x64xf32>
    %377 = arith.addf %376, %375 : vector<8x64xf32>
    %378 = arith.divf %376, %377 : vector<8x64xf32>
    %379 = vector.extract_strided_slice %362 {offsets = [0, 128], sizes = [8, 64], strides = [1, 1]} : vector<8x192xf32> to vector<8x64xf32>
    %380 = vector.extract_strided_slice %361 {offsets = [0, 128], sizes = [8, 64], strides = [1, 1]} : vector<8x192xf32> to vector<8x64xf32>
    %381 = arith.addf %380, %27 : vector<8x64xf32>
    %382 = arith.mulf %370, %381 : vector<8x64xf32>
    %383 = arith.addf %379, %382 : vector<8x64xf32>
    %384 = math.tanh %383 : vector<8x64xf32>
    %cst_97 = arith.constant 1.000000e+00 : f32
    %385 = vector.broadcast %cst_97 : f32 to vector<8x64xf32>
    %386 = arith.subf %385, %378 : vector<8x64xf32>
    %387 = arith.mulf %386, %384 : vector<8x64xf32>
    %388 = arith.mulf %378, %329 : vector<8x64xf32>
    %389 = arith.addf %387, %388 : vector<8x64xf32>
    %390 = arith.truncf %359 : vector<8x32xf32> to vector<8x32xbf16>
    %cst_98 = arith.constant dense<0.000000e+00> : vector<8x96xf32>
    %391 = tpu.matmul %390, %20, %cst_98 {dimension_numbers = #tpu.dot_dimension_numbers<[1], [0], [0], [1], [0, 0, 1, 1], [], []>} : vector<8x32xbf16>, vector<32x96xbf16>, vector<8x96xf32> -> vector<8x96xf32>
    %c48 = arith.constant 48 : index
    %c0_99 = arith.constant 0 : index
    %392 = vector.load %arg17[%c48, %c0_99] : memref<64x96xf32, #tpu.memory_space<vmem>>, vector<8x96xf32>
    %393 = vector.extract_strided_slice %392 {offsets = [0, 0], sizes = [8, 32], strides = [1, 1]} : vector<8x96xf32> to vector<8x32xf32>
    %394 = vector.extract_strided_slice %391 {offsets = [0, 0], sizes = [8, 32], strides = [1, 1]} : vector<8x96xf32> to vector<8x32xf32>
    %395 = arith.addf %393, %394 : vector<8x32xf32>
    %396 = arith.negf %395 : vector<8x32xf32>
    %397 = math.exp %396 : vector<8x32xf32>
    %cst_100 = arith.constant 1.000000e+00 : f32
    %398 = vector.broadcast %cst_100 : f32 to vector<8x32xf32>
    %399 = arith.addf %398, %397 : vector<8x32xf32>
    %400 = arith.divf %398, %399 : vector<8x32xf32>
    %401 = vector.extract_strided_slice %392 {offsets = [0, 32], sizes = [8, 32], strides = [1, 1]} : vector<8x96xf32> to vector<8x32xf32>
    %402 = vector.extract_strided_slice %391 {offsets = [0, 32], sizes = [8, 32], strides = [1, 1]} : vector<8x96xf32> to vector<8x32xf32>
    %403 = arith.addf %401, %402 : vector<8x32xf32>
    %404 = arith.negf %403 : vector<8x32xf32>
    %405 = math.exp %404 : vector<8x32xf32>
    %cst_101 = arith.constant 1.000000e+00 : f32
    %406 = vector.broadcast %cst_101 : f32 to vector<8x32xf32>
    %407 = arith.addf %406, %405 : vector<8x32xf32>
    %408 = arith.divf %406, %407 : vector<8x32xf32>
    %409 = vector.extract_strided_slice %392 {offsets = [0, 64], sizes = [8, 32], strides = [1, 1]} : vector<8x96xf32> to vector<8x32xf32>
    %410 = vector.extract_strided_slice %391 {offsets = [0, 64], sizes = [8, 32], strides = [1, 1]} : vector<8x96xf32> to vector<8x32xf32>
    %411 = arith.addf %410, %24 : vector<8x32xf32>
    %412 = arith.mulf %400, %411 : vector<8x32xf32>
    %413 = arith.addf %409, %412 : vector<8x32xf32>
    %414 = math.tanh %413 : vector<8x32xf32>
    %cst_102 = arith.constant 1.000000e+00 : f32
    %415 = vector.broadcast %cst_102 : f32 to vector<8x32xf32>
    %416 = arith.subf %415, %408 : vector<8x32xf32>
    %417 = arith.mulf %416, %414 : vector<8x32xf32>
    %418 = arith.mulf %408, %359 : vector<8x32xf32>
    %419 = arith.addf %417, %418 : vector<8x32xf32>
    %420 = arith.truncf %389 : vector<8x64xf32> to vector<8x64xbf16>
    %cst_103 = arith.constant dense<0.000000e+00> : vector<8x192xf32>
    %421 = tpu.matmul %420, %21, %cst_103 {dimension_numbers = #tpu.dot_dimension_numbers<[1], [0], [0], [1], [0, 0, 1, 1], [], []>} : vector<8x64xbf16>, vector<64x192xbf16>, vector<8x192xf32> -> vector<8x192xf32>
    %c48_104 = arith.constant 48 : index
    %c0_105 = arith.constant 0 : index
    %422 = vector.load %arg18[%c48_104, %c0_105] : memref<128x192xf32, #tpu.memory_space<vmem>>, vector<8x192xf32>
    %423 = vector.extract_strided_slice %422 {offsets = [0, 0], sizes = [8, 64], strides = [1, 1]} : vector<8x192xf32> to vector<8x64xf32>
    %424 = vector.extract_strided_slice %421 {offsets = [0, 0], sizes = [8, 64], strides = [1, 1]} : vector<8x192xf32> to vector<8x64xf32>
    %425 = arith.addf %423, %424 : vector<8x64xf32>
    %426 = arith.negf %425 : vector<8x64xf32>
    %427 = math.exp %426 : vector<8x64xf32>
    %cst_106 = arith.constant 1.000000e+00 : f32
    %428 = vector.broadcast %cst_106 : f32 to vector<8x64xf32>
    %429 = arith.addf %428, %427 : vector<8x64xf32>
    %430 = arith.divf %428, %429 : vector<8x64xf32>
    %431 = vector.extract_strided_slice %422 {offsets = [0, 64], sizes = [8, 64], strides = [1, 1]} : vector<8x192xf32> to vector<8x64xf32>
    %432 = vector.extract_strided_slice %421 {offsets = [0, 64], sizes = [8, 64], strides = [1, 1]} : vector<8x192xf32> to vector<8x64xf32>
    %433 = arith.addf %431, %432 : vector<8x64xf32>
    %434 = arith.negf %433 : vector<8x64xf32>
    %435 = math.exp %434 : vector<8x64xf32>
    %cst_107 = arith.constant 1.000000e+00 : f32
    %436 = vector.broadcast %cst_107 : f32 to vector<8x64xf32>
    %437 = arith.addf %436, %435 : vector<8x64xf32>
    %438 = arith.divf %436, %437 : vector<8x64xf32>
    %439 = vector.extract_strided_slice %422 {offsets = [0, 128], sizes = [8, 64], strides = [1, 1]} : vector<8x192xf32> to vector<8x64xf32>
    %440 = vector.extract_strided_slice %421 {offsets = [0, 128], sizes = [8, 64], strides = [1, 1]} : vector<8x192xf32> to vector<8x64xf32>
    %441 = arith.addf %440, %27 : vector<8x64xf32>
    %442 = arith.mulf %430, %441 : vector<8x64xf32>
    %443 = arith.addf %439, %442 : vector<8x64xf32>
    %444 = math.tanh %443 : vector<8x64xf32>
    %cst_108 = arith.constant 1.000000e+00 : f32
    %445 = vector.broadcast %cst_108 : f32 to vector<8x64xf32>
    %446 = arith.subf %445, %438 : vector<8x64xf32>
    %447 = arith.mulf %446, %444 : vector<8x64xf32>
    %448 = arith.mulf %438, %389 : vector<8x64xf32>
    %449 = arith.addf %447, %448 : vector<8x64xf32>
    %450 = arith.truncf %419 : vector<8x32xf32> to vector<8x32xbf16>
    %cst_109 = arith.constant dense<0.000000e+00> : vector<8x96xf32>
    %451 = tpu.matmul %450, %20, %cst_109 {dimension_numbers = #tpu.dot_dimension_numbers<[1], [0], [0], [1], [0, 0, 1, 1], [], []>} : vector<8x32xbf16>, vector<32x96xbf16>, vector<8x96xf32> -> vector<8x96xf32>
    %c56 = arith.constant 56 : index
    %c0_110 = arith.constant 0 : index
    %452 = vector.load %arg17[%c56, %c0_110] : memref<64x96xf32, #tpu.memory_space<vmem>>, vector<8x96xf32>
    %453 = vector.extract_strided_slice %452 {offsets = [0, 0], sizes = [8, 32], strides = [1, 1]} : vector<8x96xf32> to vector<8x32xf32>
    %454 = vector.extract_strided_slice %451 {offsets = [0, 0], sizes = [8, 32], strides = [1, 1]} : vector<8x96xf32> to vector<8x32xf32>
    %455 = arith.addf %453, %454 : vector<8x32xf32>
    %456 = arith.negf %455 : vector<8x32xf32>
    %457 = math.exp %456 : vector<8x32xf32>
    %cst_111 = arith.constant 1.000000e+00 : f32
    %458 = vector.broadcast %cst_111 : f32 to vector<8x32xf32>
    %459 = arith.addf %458, %457 : vector<8x32xf32>
    %460 = arith.divf %458, %459 : vector<8x32xf32>
    %461 = vector.extract_strided_slice %452 {offsets = [0, 32], sizes = [8, 32], strides = [1, 1]} : vector<8x96xf32> to vector<8x32xf32>
    %462 = vector.extract_strided_slice %451 {offsets = [0, 32], sizes = [8, 32], strides = [1, 1]} : vector<8x96xf32> to vector<8x32xf32>
    %463 = arith.addf %461, %462 : vector<8x32xf32>
    %464 = arith.negf %463 : vector<8x32xf32>
    %465 = math.exp %464 : vector<8x32xf32>
    %cst_112 = arith.constant 1.000000e+00 : f32
    %466 = vector.broadcast %cst_112 : f32 to vector<8x32xf32>
    %467 = arith.addf %466, %465 : vector<8x32xf32>
    %468 = arith.divf %466, %467 : vector<8x32xf32>
    %469 = vector.extract_strided_slice %452 {offsets = [0, 64], sizes = [8, 32], strides = [1, 1]} : vector<8x96xf32> to vector<8x32xf32>
    %470 = vector.extract_strided_slice %451 {offsets = [0, 64], sizes = [8, 32], strides = [1, 1]} : vector<8x96xf32> to vector<8x32xf32>
    %471 = arith.addf %470, %24 : vector<8x32xf32>
    %472 = arith.mulf %460, %471 : vector<8x32xf32>
    %473 = arith.addf %469, %472 : vector<8x32xf32>
    %474 = math.tanh %473 : vector<8x32xf32>
    %cst_113 = arith.constant 1.000000e+00 : f32
    %475 = vector.broadcast %cst_113 : f32 to vector<8x32xf32>
    %476 = arith.subf %475, %468 : vector<8x32xf32>
    %477 = arith.mulf %476, %474 : vector<8x32xf32>
    %478 = arith.mulf %468, %419 : vector<8x32xf32>
    %479 = arith.addf %477, %478 : vector<8x32xf32>
    %480 = arith.truncf %449 : vector<8x64xf32> to vector<8x64xbf16>
    %cst_114 = arith.constant dense<0.000000e+00> : vector<8x192xf32>
    %481 = tpu.matmul %480, %21, %cst_114 {dimension_numbers = #tpu.dot_dimension_numbers<[1], [0], [0], [1], [0, 0, 1, 1], [], []>} : vector<8x64xbf16>, vector<64x192xbf16>, vector<8x192xf32> -> vector<8x192xf32>
    %c56_115 = arith.constant 56 : index
    %c0_116 = arith.constant 0 : index
    %482 = vector.load %arg18[%c56_115, %c0_116] : memref<128x192xf32, #tpu.memory_space<vmem>>, vector<8x192xf32>
    %483 = vector.extract_strided_slice %482 {offsets = [0, 0], sizes = [8, 64], strides = [1, 1]} : vector<8x192xf32> to vector<8x64xf32>
    %484 = vector.extract_strided_slice %481 {offsets = [0, 0], sizes = [8, 64], strides = [1, 1]} : vector<8x192xf32> to vector<8x64xf32>
    %485 = arith.addf %483, %484 : vector<8x64xf32>
    %486 = arith.negf %485 : vector<8x64xf32>
    %487 = math.exp %486 : vector<8x64xf32>
    %cst_117 = arith.constant 1.000000e+00 : f32
    %488 = vector.broadcast %cst_117 : f32 to vector<8x64xf32>
    %489 = arith.addf %488, %487 : vector<8x64xf32>
    %490 = arith.divf %488, %489 : vector<8x64xf32>
    %491 = vector.extract_strided_slice %482 {offsets = [0, 64], sizes = [8, 64], strides = [1, 1]} : vector<8x192xf32> to vector<8x64xf32>
    %492 = vector.extract_strided_slice %481 {offsets = [0, 64], sizes = [8, 64], strides = [1, 1]} : vector<8x192xf32> to vector<8x64xf32>
    %493 = arith.addf %491, %492 : vector<8x64xf32>
    %494 = arith.negf %493 : vector<8x64xf32>
    %495 = math.exp %494 : vector<8x64xf32>
    %cst_118 = arith.constant 1.000000e+00 : f32
    %496 = vector.broadcast %cst_118 : f32 to vector<8x64xf32>
    %497 = arith.addf %496, %495 : vector<8x64xf32>
    %498 = arith.divf %496, %497 : vector<8x64xf32>
    %499 = vector.extract_strided_slice %482 {offsets = [0, 128], sizes = [8, 64], strides = [1, 1]} : vector<8x192xf32> to vector<8x64xf32>
    %500 = vector.extract_strided_slice %481 {offsets = [0, 128], sizes = [8, 64], strides = [1, 1]} : vector<8x192xf32> to vector<8x64xf32>
    %501 = arith.addf %500, %27 : vector<8x64xf32>
    %502 = arith.mulf %490, %501 : vector<8x64xf32>
    %503 = arith.addf %499, %502 : vector<8x64xf32>
    %504 = math.tanh %503 : vector<8x64xf32>
    %cst_119 = arith.constant 1.000000e+00 : f32
    %505 = vector.broadcast %cst_119 : f32 to vector<8x64xf32>
    %506 = arith.subf %505, %498 : vector<8x64xf32>
    %507 = arith.mulf %506, %504 : vector<8x64xf32>
    %508 = arith.mulf %498, %449 : vector<8x64xf32>
    %509 = arith.addf %507, %508 : vector<8x64xf32>
    %510 = arith.truncf %509 : vector<8x64xf32> to vector<8x64xbf16>
    %cst_120 = arith.constant dense<0.000000e+00> : vector<8x192xf32>
    %511 = tpu.matmul %510, %21, %cst_120 {dimension_numbers = #tpu.dot_dimension_numbers<[1], [0], [0], [1], [0, 0, 1, 1], [], []>} : vector<8x64xbf16>, vector<64x192xbf16>, vector<8x192xf32> -> vector<8x192xf32>
    %c64 = arith.constant 64 : index
    %c0_121 = arith.constant 0 : index
    %512 = vector.load %arg18[%c64, %c0_121] : memref<128x192xf32, #tpu.memory_space<vmem>>, vector<8x192xf32>
    %513 = vector.extract_strided_slice %512 {offsets = [0, 0], sizes = [8, 64], strides = [1, 1]} : vector<8x192xf32> to vector<8x64xf32>
    %514 = vector.extract_strided_slice %511 {offsets = [0, 0], sizes = [8, 64], strides = [1, 1]} : vector<8x192xf32> to vector<8x64xf32>
    %515 = arith.addf %513, %514 : vector<8x64xf32>
    %516 = arith.negf %515 : vector<8x64xf32>
    %517 = math.exp %516 : vector<8x64xf32>
    %cst_122 = arith.constant 1.000000e+00 : f32
    %518 = vector.broadcast %cst_122 : f32 to vector<8x64xf32>
    %519 = arith.addf %518, %517 : vector<8x64xf32>
    %520 = arith.divf %518, %519 : vector<8x64xf32>
    %521 = vector.extract_strided_slice %512 {offsets = [0, 64], sizes = [8, 64], strides = [1, 1]} : vector<8x192xf32> to vector<8x64xf32>
    %522 = vector.extract_strided_slice %511 {offsets = [0, 64], sizes = [8, 64], strides = [1, 1]} : vector<8x192xf32> to vector<8x64xf32>
    %523 = arith.addf %521, %522 : vector<8x64xf32>
    %524 = arith.negf %523 : vector<8x64xf32>
    %525 = math.exp %524 : vector<8x64xf32>
    %cst_123 = arith.constant 1.000000e+00 : f32
    %526 = vector.broadcast %cst_123 : f32 to vector<8x64xf32>
    %527 = arith.addf %526, %525 : vector<8x64xf32>
    %528 = arith.divf %526, %527 : vector<8x64xf32>
    %529 = vector.extract_strided_slice %512 {offsets = [0, 128], sizes = [8, 64], strides = [1, 1]} : vector<8x192xf32> to vector<8x64xf32>
    %530 = vector.extract_strided_slice %511 {offsets = [0, 128], sizes = [8, 64], strides = [1, 1]} : vector<8x192xf32> to vector<8x64xf32>
    %531 = arith.addf %530, %27 : vector<8x64xf32>
    %532 = arith.mulf %520, %531 : vector<8x64xf32>
    %533 = arith.addf %529, %532 : vector<8x64xf32>
    %534 = math.tanh %533 : vector<8x64xf32>
    %cst_124 = arith.constant 1.000000e+00 : f32
    %535 = vector.broadcast %cst_124 : f32 to vector<8x64xf32>
    %536 = arith.subf %535, %528 : vector<8x64xf32>
    %537 = arith.mulf %536, %534 : vector<8x64xf32>
    %538 = arith.mulf %528, %509 : vector<8x64xf32>
    %539 = arith.addf %537, %538 : vector<8x64xf32>
    %540 = arith.truncf %539 : vector<8x64xf32> to vector<8x64xbf16>
    %cst_125 = arith.constant dense<0.000000e+00> : vector<8x192xf32>
    %541 = tpu.matmul %540, %21, %cst_125 {dimension_numbers = #tpu.dot_dimension_numbers<[1], [0], [0], [1], [0, 0, 1, 1], [], []>} : vector<8x64xbf16>, vector<64x192xbf16>, vector<8x192xf32> -> vector<8x192xf32>
    %c72 = arith.constant 72 : index
    %c0_126 = arith.constant 0 : index
    %542 = vector.load %arg18[%c72, %c0_126] : memref<128x192xf32, #tpu.memory_space<vmem>>, vector<8x192xf32>
    %543 = vector.extract_strided_slice %542 {offsets = [0, 0], sizes = [8, 64], strides = [1, 1]} : vector<8x192xf32> to vector<8x64xf32>
    %544 = vector.extract_strided_slice %541 {offsets = [0, 0], sizes = [8, 64], strides = [1, 1]} : vector<8x192xf32> to vector<8x64xf32>
    %545 = arith.addf %543, %544 : vector<8x64xf32>
    %546 = arith.negf %545 : vector<8x64xf32>
    %547 = math.exp %546 : vector<8x64xf32>
    %cst_127 = arith.constant 1.000000e+00 : f32
    %548 = vector.broadcast %cst_127 : f32 to vector<8x64xf32>
    %549 = arith.addf %548, %547 : vector<8x64xf32>
    %550 = arith.divf %548, %549 : vector<8x64xf32>
    %551 = vector.extract_strided_slice %542 {offsets = [0, 64], sizes = [8, 64], strides = [1, 1]} : vector<8x192xf32> to vector<8x64xf32>
    %552 = vector.extract_strided_slice %541 {offsets = [0, 64], sizes = [8, 64], strides = [1, 1]} : vector<8x192xf32> to vector<8x64xf32>
    %553 = arith.addf %551, %552 : vector<8x64xf32>
    %554 = arith.negf %553 : vector<8x64xf32>
    %555 = math.exp %554 : vector<8x64xf32>
    %cst_128 = arith.constant 1.000000e+00 : f32
    %556 = vector.broadcast %cst_128 : f32 to vector<8x64xf32>
    %557 = arith.addf %556, %555 : vector<8x64xf32>
    %558 = arith.divf %556, %557 : vector<8x64xf32>
    %559 = vector.extract_strided_slice %542 {offsets = [0, 128], sizes = [8, 64], strides = [1, 1]} : vector<8x192xf32> to vector<8x64xf32>
    %560 = vector.extract_strided_slice %541 {offsets = [0, 128], sizes = [8, 64], strides = [1, 1]} : vector<8x192xf32> to vector<8x64xf32>
    %561 = arith.addf %560, %27 : vector<8x64xf32>
    %562 = arith.mulf %550, %561 : vector<8x64xf32>
    %563 = arith.addf %559, %562 : vector<8x64xf32>
    %564 = math.tanh %563 : vector<8x64xf32>
    %cst_129 = arith.constant 1.000000e+00 : f32
    %565 = vector.broadcast %cst_129 : f32 to vector<8x64xf32>
    %566 = arith.subf %565, %558 : vector<8x64xf32>
    %567 = arith.mulf %566, %564 : vector<8x64xf32>
    %568 = arith.mulf %558, %539 : vector<8x64xf32>
    %569 = arith.addf %567, %568 : vector<8x64xf32>
    %570 = arith.truncf %569 : vector<8x64xf32> to vector<8x64xbf16>
    %cst_130 = arith.constant dense<0.000000e+00> : vector<8x192xf32>
    %571 = tpu.matmul %570, %21, %cst_130 {dimension_numbers = #tpu.dot_dimension_numbers<[1], [0], [0], [1], [0, 0, 1, 1], [], []>} : vector<8x64xbf16>, vector<64x192xbf16>, vector<8x192xf32> -> vector<8x192xf32>
    %c80 = arith.constant 80 : index
    %c0_131 = arith.constant 0 : index
    %572 = vector.load %arg18[%c80, %c0_131] : memref<128x192xf32, #tpu.memory_space<vmem>>, vector<8x192xf32>
    %573 = vector.extract_strided_slice %572 {offsets = [0, 0], sizes = [8, 64], strides = [1, 1]} : vector<8x192xf32> to vector<8x64xf32>
    %574 = vector.extract_strided_slice %571 {offsets = [0, 0], sizes = [8, 64], strides = [1, 1]} : vector<8x192xf32> to vector<8x64xf32>
    %575 = arith.addf %573, %574 : vector<8x64xf32>
    %576 = arith.negf %575 : vector<8x64xf32>
    %577 = math.exp %576 : vector<8x64xf32>
    %cst_132 = arith.constant 1.000000e+00 : f32
    %578 = vector.broadcast %cst_132 : f32 to vector<8x64xf32>
    %579 = arith.addf %578, %577 : vector<8x64xf32>
    %580 = arith.divf %578, %579 : vector<8x64xf32>
    %581 = vector.extract_strided_slice %572 {offsets = [0, 64], sizes = [8, 64], strides = [1, 1]} : vector<8x192xf32> to vector<8x64xf32>
    %582 = vector.extract_strided_slice %571 {offsets = [0, 64], sizes = [8, 64], strides = [1, 1]} : vector<8x192xf32> to vector<8x64xf32>
    %583 = arith.addf %581, %582 : vector<8x64xf32>
    %584 = arith.negf %583 : vector<8x64xf32>
    %585 = math.exp %584 : vector<8x64xf32>
    %cst_133 = arith.constant 1.000000e+00 : f32
    %586 = vector.broadcast %cst_133 : f32 to vector<8x64xf32>
    %587 = arith.addf %586, %585 : vector<8x64xf32>
    %588 = arith.divf %586, %587 : vector<8x64xf32>
    %589 = vector.extract_strided_slice %572 {offsets = [0, 128], sizes = [8, 64], strides = [1, 1]} : vector<8x192xf32> to vector<8x64xf32>
    %590 = vector.extract_strided_slice %571 {offsets = [0, 128], sizes = [8, 64], strides = [1, 1]} : vector<8x192xf32> to vector<8x64xf32>
    %591 = arith.addf %590, %27 : vector<8x64xf32>
    %592 = arith.mulf %580, %591 : vector<8x64xf32>
    %593 = arith.addf %589, %592 : vector<8x64xf32>
    %594 = math.tanh %593 : vector<8x64xf32>
    %cst_134 = arith.constant 1.000000e+00 : f32
    %595 = vector.broadcast %cst_134 : f32 to vector<8x64xf32>
    %596 = arith.subf %595, %588 : vector<8x64xf32>
    %597 = arith.mulf %596, %594 : vector<8x64xf32>
    %598 = arith.mulf %588, %569 : vector<8x64xf32>
    %599 = arith.addf %597, %598 : vector<8x64xf32>
    %600 = arith.truncf %599 : vector<8x64xf32> to vector<8x64xbf16>
    %cst_135 = arith.constant dense<0.000000e+00> : vector<8x192xf32>
    %601 = tpu.matmul %600, %21, %cst_135 {dimension_numbers = #tpu.dot_dimension_numbers<[1], [0], [0], [1], [0, 0, 1, 1], [], []>} : vector<8x64xbf16>, vector<64x192xbf16>, vector<8x192xf32> -> vector<8x192xf32>
    %c88 = arith.constant 88 : index
    %c0_136 = arith.constant 0 : index
    %602 = vector.load %arg18[%c88, %c0_136] : memref<128x192xf32, #tpu.memory_space<vmem>>, vector<8x192xf32>
    %603 = vector.extract_strided_slice %602 {offsets = [0, 0], sizes = [8, 64], strides = [1, 1]} : vector<8x192xf32> to vector<8x64xf32>
    %604 = vector.extract_strided_slice %601 {offsets = [0, 0], sizes = [8, 64], strides = [1, 1]} : vector<8x192xf32> to vector<8x64xf32>
    %605 = arith.addf %603, %604 : vector<8x64xf32>
    %606 = arith.negf %605 : vector<8x64xf32>
    %607 = math.exp %606 : vector<8x64xf32>
    %cst_137 = arith.constant 1.000000e+00 : f32
    %608 = vector.broadcast %cst_137 : f32 to vector<8x64xf32>
    %609 = arith.addf %608, %607 : vector<8x64xf32>
    %610 = arith.divf %608, %609 : vector<8x64xf32>
    %611 = vector.extract_strided_slice %602 {offsets = [0, 64], sizes = [8, 64], strides = [1, 1]} : vector<8x192xf32> to vector<8x64xf32>
    %612 = vector.extract_strided_slice %601 {offsets = [0, 64], sizes = [8, 64], strides = [1, 1]} : vector<8x192xf32> to vector<8x64xf32>
    %613 = arith.addf %611, %612 : vector<8x64xf32>
    %614 = arith.negf %613 : vector<8x64xf32>
    %615 = math.exp %614 : vector<8x64xf32>
    %cst_138 = arith.constant 1.000000e+00 : f32
    %616 = vector.broadcast %cst_138 : f32 to vector<8x64xf32>
    %617 = arith.addf %616, %615 : vector<8x64xf32>
    %618 = arith.divf %616, %617 : vector<8x64xf32>
    %619 = vector.extract_strided_slice %602 {offsets = [0, 128], sizes = [8, 64], strides = [1, 1]} : vector<8x192xf32> to vector<8x64xf32>
    %620 = vector.extract_strided_slice %601 {offsets = [0, 128], sizes = [8, 64], strides = [1, 1]} : vector<8x192xf32> to vector<8x64xf32>
    %621 = arith.addf %620, %27 : vector<8x64xf32>
    %622 = arith.mulf %610, %621 : vector<8x64xf32>
    %623 = arith.addf %619, %622 : vector<8x64xf32>
    %624 = math.tanh %623 : vector<8x64xf32>
    %cst_139 = arith.constant 1.000000e+00 : f32
    %625 = vector.broadcast %cst_139 : f32 to vector<8x64xf32>
    %626 = arith.subf %625, %618 : vector<8x64xf32>
    %627 = arith.mulf %626, %624 : vector<8x64xf32>
    %628 = arith.mulf %618, %599 : vector<8x64xf32>
    %629 = arith.addf %627, %628 : vector<8x64xf32>
    %630 = arith.truncf %629 : vector<8x64xf32> to vector<8x64xbf16>
    %cst_140 = arith.constant dense<0.000000e+00> : vector<8x192xf32>
    %631 = tpu.matmul %630, %21, %cst_140 {dimension_numbers = #tpu.dot_dimension_numbers<[1], [0], [0], [1], [0, 0, 1, 1], [], []>} : vector<8x64xbf16>, vector<64x192xbf16>, vector<8x192xf32> -> vector<8x192xf32>
    %c96 = arith.constant 96 : index
    %c0_141 = arith.constant 0 : index
    %632 = vector.load %arg18[%c96, %c0_141] : memref<128x192xf32, #tpu.memory_space<vmem>>, vector<8x192xf32>
    %633 = vector.extract_strided_slice %632 {offsets = [0, 0], sizes = [8, 64], strides = [1, 1]} : vector<8x192xf32> to vector<8x64xf32>
    %634 = vector.extract_strided_slice %631 {offsets = [0, 0], sizes = [8, 64], strides = [1, 1]} : vector<8x192xf32> to vector<8x64xf32>
    %635 = arith.addf %633, %634 : vector<8x64xf32>
    %636 = arith.negf %635 : vector<8x64xf32>
    %637 = math.exp %636 : vector<8x64xf32>
    %cst_142 = arith.constant 1.000000e+00 : f32
    %638 = vector.broadcast %cst_142 : f32 to vector<8x64xf32>
    %639 = arith.addf %638, %637 : vector<8x64xf32>
    %640 = arith.divf %638, %639 : vector<8x64xf32>
    %641 = vector.extract_strided_slice %632 {offsets = [0, 64], sizes = [8, 64], strides = [1, 1]} : vector<8x192xf32> to vector<8x64xf32>
    %642 = vector.extract_strided_slice %631 {offsets = [0, 64], sizes = [8, 64], strides = [1, 1]} : vector<8x192xf32> to vector<8x64xf32>
    %643 = arith.addf %641, %642 : vector<8x64xf32>
    %644 = arith.negf %643 : vector<8x64xf32>
    %645 = math.exp %644 : vector<8x64xf32>
    %cst_143 = arith.constant 1.000000e+00 : f32
    %646 = vector.broadcast %cst_143 : f32 to vector<8x64xf32>
    %647 = arith.addf %646, %645 : vector<8x64xf32>
    %648 = arith.divf %646, %647 : vector<8x64xf32>
    %649 = vector.extract_strided_slice %632 {offsets = [0, 128], sizes = [8, 64], strides = [1, 1]} : vector<8x192xf32> to vector<8x64xf32>
    %650 = vector.extract_strided_slice %631 {offsets = [0, 128], sizes = [8, 64], strides = [1, 1]} : vector<8x192xf32> to vector<8x64xf32>
    %651 = arith.addf %650, %27 : vector<8x64xf32>
    %652 = arith.mulf %640, %651 : vector<8x64xf32>
    %653 = arith.addf %649, %652 : vector<8x64xf32>
    %654 = math.tanh %653 : vector<8x64xf32>
    %cst_144 = arith.constant 1.000000e+00 : f32
    %655 = vector.broadcast %cst_144 : f32 to vector<8x64xf32>
    %656 = arith.subf %655, %648 : vector<8x64xf32>
    %657 = arith.mulf %656, %654 : vector<8x64xf32>
    %658 = arith.mulf %648, %629 : vector<8x64xf32>
    %659 = arith.addf %657, %658 : vector<8x64xf32>
    %660 = arith.truncf %659 : vector<8x64xf32> to vector<8x64xbf16>
    %cst_145 = arith.constant dense<0.000000e+00> : vector<8x192xf32>
    %661 = tpu.matmul %660, %21, %cst_145 {dimension_numbers = #tpu.dot_dimension_numbers<[1], [0], [0], [1], [0, 0, 1, 1], [], []>} : vector<8x64xbf16>, vector<64x192xbf16>, vector<8x192xf32> -> vector<8x192xf32>
    %c104 = arith.constant 104 : index
    %c0_146 = arith.constant 0 : index
    %662 = vector.load %arg18[%c104, %c0_146] : memref<128x192xf32, #tpu.memory_space<vmem>>, vector<8x192xf32>
    %663 = vector.extract_strided_slice %662 {offsets = [0, 0], sizes = [8, 64], strides = [1, 1]} : vector<8x192xf32> to vector<8x64xf32>
    %664 = vector.extract_strided_slice %661 {offsets = [0, 0], sizes = [8, 64], strides = [1, 1]} : vector<8x192xf32> to vector<8x64xf32>
    %665 = arith.addf %663, %664 : vector<8x64xf32>
    %666 = arith.negf %665 : vector<8x64xf32>
    %667 = math.exp %666 : vector<8x64xf32>
    %cst_147 = arith.constant 1.000000e+00 : f32
    %668 = vector.broadcast %cst_147 : f32 to vector<8x64xf32>
    %669 = arith.addf %668, %667 : vector<8x64xf32>
    %670 = arith.divf %668, %669 : vector<8x64xf32>
    %671 = vector.extract_strided_slice %662 {offsets = [0, 64], sizes = [8, 64], strides = [1, 1]} : vector<8x192xf32> to vector<8x64xf32>
    %672 = vector.extract_strided_slice %661 {offsets = [0, 64], sizes = [8, 64], strides = [1, 1]} : vector<8x192xf32> to vector<8x64xf32>
    %673 = arith.addf %671, %672 : vector<8x64xf32>
    %674 = arith.negf %673 : vector<8x64xf32>
    %675 = math.exp %674 : vector<8x64xf32>
    %cst_148 = arith.constant 1.000000e+00 : f32
    %676 = vector.broadcast %cst_148 : f32 to vector<8x64xf32>
    %677 = arith.addf %676, %675 : vector<8x64xf32>
    %678 = arith.divf %676, %677 : vector<8x64xf32>
    %679 = vector.extract_strided_slice %662 {offsets = [0, 128], sizes = [8, 64], strides = [1, 1]} : vector<8x192xf32> to vector<8x64xf32>
    %680 = vector.extract_strided_slice %661 {offsets = [0, 128], sizes = [8, 64], strides = [1, 1]} : vector<8x192xf32> to vector<8x64xf32>
    %681 = arith.addf %680, %27 : vector<8x64xf32>
    %682 = arith.mulf %670, %681 : vector<8x64xf32>
    %683 = arith.addf %679, %682 : vector<8x64xf32>
    %684 = math.tanh %683 : vector<8x64xf32>
    %cst_149 = arith.constant 1.000000e+00 : f32
    %685 = vector.broadcast %cst_149 : f32 to vector<8x64xf32>
    %686 = arith.subf %685, %678 : vector<8x64xf32>
    %687 = arith.mulf %686, %684 : vector<8x64xf32>
    %688 = arith.mulf %678, %659 : vector<8x64xf32>
    %689 = arith.addf %687, %688 : vector<8x64xf32>
    %690 = arith.truncf %689 : vector<8x64xf32> to vector<8x64xbf16>
    %cst_150 = arith.constant dense<0.000000e+00> : vector<8x192xf32>
    %691 = tpu.matmul %690, %21, %cst_150 {dimension_numbers = #tpu.dot_dimension_numbers<[1], [0], [0], [1], [0, 0, 1, 1], [], []>} : vector<8x64xbf16>, vector<64x192xbf16>, vector<8x192xf32> -> vector<8x192xf32>
    %c112 = arith.constant 112 : index
    %c0_151 = arith.constant 0 : index
    %692 = vector.load %arg18[%c112, %c0_151] : memref<128x192xf32, #tpu.memory_space<vmem>>, vector<8x192xf32>
    %693 = vector.extract_strided_slice %692 {offsets = [0, 0], sizes = [8, 64], strides = [1, 1]} : vector<8x192xf32> to vector<8x64xf32>
    %694 = vector.extract_strided_slice %691 {offsets = [0, 0], sizes = [8, 64], strides = [1, 1]} : vector<8x192xf32> to vector<8x64xf32>
    %695 = arith.addf %693, %694 : vector<8x64xf32>
    %696 = arith.negf %695 : vector<8x64xf32>
    %697 = math.exp %696 : vector<8x64xf32>
    %cst_152 = arith.constant 1.000000e+00 : f32
    %698 = vector.broadcast %cst_152 : f32 to vector<8x64xf32>
    %699 = arith.addf %698, %697 : vector<8x64xf32>
    %700 = arith.divf %698, %699 : vector<8x64xf32>
    %701 = vector.extract_strided_slice %692 {offsets = [0, 64], sizes = [8, 64], strides = [1, 1]} : vector<8x192xf32> to vector<8x64xf32>
    %702 = vector.extract_strided_slice %691 {offsets = [0, 64], sizes = [8, 64], strides = [1, 1]} : vector<8x192xf32> to vector<8x64xf32>
    %703 = arith.addf %701, %702 : vector<8x64xf32>
    %704 = arith.negf %703 : vector<8x64xf32>
    %705 = math.exp %704 : vector<8x64xf32>
    %cst_153 = arith.constant 1.000000e+00 : f32
    %706 = vector.broadcast %cst_153 : f32 to vector<8x64xf32>
    %707 = arith.addf %706, %705 : vector<8x64xf32>
    %708 = arith.divf %706, %707 : vector<8x64xf32>
    %709 = vector.extract_strided_slice %692 {offsets = [0, 128], sizes = [8, 64], strides = [1, 1]} : vector<8x192xf32> to vector<8x64xf32>
    %710 = vector.extract_strided_slice %691 {offsets = [0, 128], sizes = [8, 64], strides = [1, 1]} : vector<8x192xf32> to vector<8x64xf32>
    %711 = arith.addf %710, %27 : vector<8x64xf32>
    %712 = arith.mulf %700, %711 : vector<8x64xf32>
    %713 = arith.addf %709, %712 : vector<8x64xf32>
    %714 = math.tanh %713 : vector<8x64xf32>
    %cst_154 = arith.constant 1.000000e+00 : f32
    %715 = vector.broadcast %cst_154 : f32 to vector<8x64xf32>
    %716 = arith.subf %715, %708 : vector<8x64xf32>
    %717 = arith.mulf %716, %714 : vector<8x64xf32>
    %718 = arith.mulf %708, %689 : vector<8x64xf32>
    %719 = arith.addf %717, %718 : vector<8x64xf32>
    %720 = arith.truncf %719 : vector<8x64xf32> to vector<8x64xbf16>
    %cst_155 = arith.constant dense<0.000000e+00> : vector<8x192xf32>
    %721 = tpu.matmul %720, %21, %cst_155 {dimension_numbers = #tpu.dot_dimension_numbers<[1], [0], [0], [1], [0, 0, 1, 1], [], []>} : vector<8x64xbf16>, vector<64x192xbf16>, vector<8x192xf32> -> vector<8x192xf32>
    %c120 = arith.constant 120 : index
    %c0_156 = arith.constant 0 : index
    %722 = vector.load %arg18[%c120, %c0_156] : memref<128x192xf32, #tpu.memory_space<vmem>>, vector<8x192xf32>
    %723 = vector.extract_strided_slice %722 {offsets = [0, 0], sizes = [8, 64], strides = [1, 1]} : vector<8x192xf32> to vector<8x64xf32>
    %724 = vector.extract_strided_slice %721 {offsets = [0, 0], sizes = [8, 64], strides = [1, 1]} : vector<8x192xf32> to vector<8x64xf32>
    %725 = arith.addf %723, %724 : vector<8x64xf32>
    %726 = arith.negf %725 : vector<8x64xf32>
    %727 = math.exp %726 : vector<8x64xf32>
    %cst_157 = arith.constant 1.000000e+00 : f32
    %728 = vector.broadcast %cst_157 : f32 to vector<8x64xf32>
    %729 = arith.addf %728, %727 : vector<8x64xf32>
    %730 = arith.divf %728, %729 : vector<8x64xf32>
    %731 = vector.extract_strided_slice %722 {offsets = [0, 64], sizes = [8, 64], strides = [1, 1]} : vector<8x192xf32> to vector<8x64xf32>
    %732 = vector.extract_strided_slice %721 {offsets = [0, 64], sizes = [8, 64], strides = [1, 1]} : vector<8x192xf32> to vector<8x64xf32>
    %733 = arith.addf %731, %732 : vector<8x64xf32>
    %734 = arith.negf %733 : vector<8x64xf32>
    %735 = math.exp %734 : vector<8x64xf32>
    %cst_158 = arith.constant 1.000000e+00 : f32
    %736 = vector.broadcast %cst_158 : f32 to vector<8x64xf32>
    %737 = arith.addf %736, %735 : vector<8x64xf32>
    %738 = arith.divf %736, %737 : vector<8x64xf32>
    %739 = vector.extract_strided_slice %722 {offsets = [0, 128], sizes = [8, 64], strides = [1, 1]} : vector<8x192xf32> to vector<8x64xf32>
    %740 = vector.extract_strided_slice %721 {offsets = [0, 128], sizes = [8, 64], strides = [1, 1]} : vector<8x192xf32> to vector<8x64xf32>
    %741 = arith.addf %740, %27 : vector<8x64xf32>
    %742 = arith.mulf %730, %741 : vector<8x64xf32>
    %743 = arith.addf %739, %742 : vector<8x64xf32>
    %744 = math.tanh %743 : vector<8x64xf32>
    %cst_159 = arith.constant 1.000000e+00 : f32
    %745 = vector.broadcast %cst_159 : f32 to vector<8x64xf32>
    %746 = arith.subf %745, %738 : vector<8x64xf32>
    %747 = arith.mulf %746, %744 : vector<8x64xf32>
    %748 = arith.mulf %738, %719 : vector<8x64xf32>
    %749 = arith.addf %747, %748 : vector<8x64xf32>
    %750 = arith.mulf %479, %59 : vector<8x32xf32>
    %cst_160 = arith.constant dense<0.000000e+00> : vector<8xf32>
    %751 = vector.multi_reduction <add>, %750, %cst_160 [1] : vector<8x32xf32> to vector<8xf32>
    %752 = vector.shape_cast %751 : vector<8xf32> to vector<8x1xf32>
    %753 = arith.mulf %479, %119 : vector<8x32xf32>
    %cst_161 = arith.constant dense<0.000000e+00> : vector<8xf32>
    %754 = vector.multi_reduction <add>, %753, %cst_161 [1] : vector<8x32xf32> to vector<8xf32>
    %755 = vector.shape_cast %754 : vector<8xf32> to vector<8x1xf32>
    %756 = arith.mulf %479, %179 : vector<8x32xf32>
    %cst_162 = arith.constant dense<0.000000e+00> : vector<8xf32>
    %757 = vector.multi_reduction <add>, %756, %cst_162 [1] : vector<8x32xf32> to vector<8xf32>
    %758 = vector.shape_cast %757 : vector<8xf32> to vector<8x1xf32>
    %759 = arith.mulf %479, %239 : vector<8x32xf32>
    %cst_163 = arith.constant dense<0.000000e+00> : vector<8xf32>
    %760 = vector.multi_reduction <add>, %759, %cst_163 [1] : vector<8x32xf32> to vector<8xf32>
    %761 = vector.shape_cast %760 : vector<8xf32> to vector<8x1xf32>
    %762 = arith.mulf %479, %299 : vector<8x32xf32>
    %cst_164 = arith.constant dense<0.000000e+00> : vector<8xf32>
    %763 = vector.multi_reduction <add>, %762, %cst_164 [1] : vector<8x32xf32> to vector<8xf32>
    %764 = vector.shape_cast %763 : vector<8xf32> to vector<8x1xf32>
    %765 = arith.mulf %479, %359 : vector<8x32xf32>
    %cst_165 = arith.constant dense<0.000000e+00> : vector<8xf32>
    %766 = vector.multi_reduction <add>, %765, %cst_165 [1] : vector<8x32xf32> to vector<8xf32>
    %767 = vector.shape_cast %766 : vector<8xf32> to vector<8x1xf32>
    %768 = arith.mulf %479, %419 : vector<8x32xf32>
    %cst_166 = arith.constant dense<0.000000e+00> : vector<8xf32>
    %769 = vector.multi_reduction <add>, %768, %cst_166 [1] : vector<8x32xf32> to vector<8xf32>
    %770 = vector.shape_cast %769 : vector<8xf32> to vector<8x1xf32>
    %771 = arith.mulf %479, %479 : vector<8x32xf32>
    %cst_167 = arith.constant dense<0.000000e+00> : vector<8xf32>
    %772 = vector.multi_reduction <add>, %771, %cst_167 [1] : vector<8x32xf32> to vector<8xf32>
    %773 = vector.shape_cast %772 : vector<8xf32> to vector<8x1xf32>
    %774 = arith.maximumf %752, %755 : vector<8x1xf32>
    %775 = arith.maximumf %774, %758 : vector<8x1xf32>
    %776 = arith.maximumf %775, %761 : vector<8x1xf32>
    %777 = arith.maximumf %776, %764 : vector<8x1xf32>
    %778 = arith.maximumf %777, %767 : vector<8x1xf32>
    %779 = arith.maximumf %778, %770 : vector<8x1xf32>
    %780 = arith.maximumf %779, %773 : vector<8x1xf32>
    %781 = arith.subf %752, %780 : vector<8x1xf32>
    %782 = math.exp %781 : vector<8x1xf32>
    %783 = arith.subf %755, %780 : vector<8x1xf32>
    %784 = math.exp %783 : vector<8x1xf32>
    %785 = arith.subf %758, %780 : vector<8x1xf32>
    %786 = math.exp %785 : vector<8x1xf32>
    %787 = arith.subf %761, %780 : vector<8x1xf32>
    %788 = math.exp %787 : vector<8x1xf32>
    %789 = arith.subf %764, %780 : vector<8x1xf32>
    %790 = math.exp %789 : vector<8x1xf32>
    %791 = arith.subf %767, %780 : vector<8x1xf32>
    %792 = math.exp %791 : vector<8x1xf32>
    %793 = arith.subf %770, %780 : vector<8x1xf32>
    %794 = math.exp %793 : vector<8x1xf32>
    %795 = arith.subf %773, %780 : vector<8x1xf32>
    %796 = math.exp %795 : vector<8x1xf32>
    %797 = arith.addf %782, %784 : vector<8x1xf32>
    %798 = arith.addf %797, %786 : vector<8x1xf32>
    %799 = arith.addf %798, %788 : vector<8x1xf32>
    %800 = arith.addf %799, %790 : vector<8x1xf32>
    %801 = arith.addf %800, %792 : vector<8x1xf32>
    %802 = arith.addf %801, %794 : vector<8x1xf32>
    %803 = arith.addf %802, %796 : vector<8x1xf32>
    %804 = tpu.reciprocal %803 {approx = true} : vector<8x1xf32> -> vector<8x1xf32>
    %805 = vector.broadcast %782 : vector<8x1xf32> to vector<8x32xf32>
    %806 = arith.mulf %805, %59 : vector<8x32xf32>
    %807 = vector.broadcast %784 : vector<8x1xf32> to vector<8x32xf32>
    %808 = arith.mulf %807, %119 : vector<8x32xf32>
    %809 = arith.addf %806, %808 : vector<8x32xf32>
    %810 = vector.broadcast %786 : vector<8x1xf32> to vector<8x32xf32>
    %811 = arith.mulf %810, %179 : vector<8x32xf32>
    %812 = arith.addf %809, %811 : vector<8x32xf32>
    %813 = vector.broadcast %788 : vector<8x1xf32> to vector<8x32xf32>
    %814 = arith.mulf %813, %239 : vector<8x32xf32>
    %815 = arith.addf %812, %814 : vector<8x32xf32>
    %816 = vector.broadcast %790 : vector<8x1xf32> to vector<8x32xf32>
    %817 = arith.mulf %816, %299 : vector<8x32xf32>
    %818 = arith.addf %815, %817 : vector<8x32xf32>
    %819 = vector.broadcast %792 : vector<8x1xf32> to vector<8x32xf32>
    %820 = arith.mulf %819, %359 : vector<8x32xf32>
    %821 = arith.addf %818, %820 : vector<8x32xf32>
    %822 = vector.broadcast %794 : vector<8x1xf32> to vector<8x32xf32>
    %823 = arith.mulf %822, %419 : vector<8x32xf32>
    %824 = arith.addf %821, %823 : vector<8x32xf32>
    %825 = vector.broadcast %796 : vector<8x1xf32> to vector<8x32xf32>
    %826 = arith.mulf %825, %479 : vector<8x32xf32>
    %827 = arith.addf %824, %826 : vector<8x32xf32>
    %828 = vector.broadcast %804 : vector<8x1xf32> to vector<8x32xf32>
    %829 = arith.mulf %827, %828 : vector<8x32xf32>
    %830 = arith.truncf %829 : vector<8x32xf32> to vector<8x32xbf16>
    %c0_168 = arith.constant 0 : index
    %c0_169 = arith.constant 0 : index
    %831 = vector.load %arg12[%c0_168, %c0_169] : memref<32x4xbf16, #tpu.memory_space<vmem>>, vector<32x4xbf16>
    %cst_170 = arith.constant dense<0.000000e+00> : vector<8x4xf32>
    %832 = tpu.matmul %830, %831, %cst_170 {dimension_numbers = #tpu.dot_dimension_numbers<[1], [0], [0], [1], [0, 0, 1, 1], [], []>} : vector<8x32xbf16>, vector<32x4xbf16>, vector<8x4xf32> -> vector<8x4xf32>
    %833 = arith.truncf %479 : vector<8x32xf32> to vector<8x32xbf16>
    %c0_171 = arith.constant 0 : index
    %c0_172 = arith.constant 0 : index
    %834 = vector.load %arg13[%c0_171, %c0_172] : memref<32x4xbf16, #tpu.memory_space<vmem>>, vector<32x4xbf16>
    %cst_173 = arith.constant dense<0.000000e+00> : vector<8x4xf32>
    %835 = tpu.matmul %833, %834, %cst_173 {dimension_numbers = #tpu.dot_dimension_numbers<[1], [0], [0], [1], [0, 0, 1, 1], [], []>} : vector<8x32xbf16>, vector<32x4xbf16>, vector<8x4xf32> -> vector<8x4xf32>
    %836 = arith.addf %832, %835 : vector<8x4xf32>
    %837 = arith.truncf %749 : vector<8x64xf32> to vector<8x64xbf16>
    %c0_174 = arith.constant 0 : index
    %c0_175 = arith.constant 0 : index
    %838 = vector.load %arg14[%c0_174, %c0_175] : memref<64x4xbf16, #tpu.memory_space<vmem>>, vector<64x4xbf16>
    %cst_176 = arith.constant dense<0.000000e+00> : vector<8x4xf32>
    %839 = tpu.matmul %837, %838, %cst_176 {dimension_numbers = #tpu.dot_dimension_numbers<[1], [0], [0], [1], [0, 0, 1, 1], [], []>} : vector<8x64xbf16>, vector<64x4xbf16>, vector<8x4xf32> -> vector<8x4xf32>
    %840 = arith.addf %836, %839 : vector<8x4xf32>
    %c0_177 = arith.constant 0 : index
    %c0_178 = arith.constant 0 : index
    %841 = vector.load %arg15[%c0_177, %c0_178] : memref<1x4xf32, #tpu.memory_space<vmem>>, vector<1x4xf32>
    %842 = vector.broadcast %841 : vector<1x4xf32> to vector<8x4xf32>
    %843 = arith.addf %840, %842 : vector<8x4xf32>
    %c0_179 = arith.constant 0 : index
    %c0_180 = arith.constant 0 : index
    %844 = vector.load %arg16[%c0_179, %c0_180] : memref<8x4xf32, #tpu.memory_space<vmem>>, vector<8x4xf32>
    tpu.vector_store %arg16[%c0_179, %c0_180], %843 {strides = array<i32>} : memref<8x4xf32, #tpu.memory_space<vmem>>, vector<8x4xf32>,
    return
  }
}

</mosaic_0001>

<bundles_post_ra>
// kernel: model_block_forward.1
= control target key start
LH: loop header
LB: loop body
LE: loop exit
PB: predicated region body
PF: predicated region fallthrough
CT: control target
= control target key end

     0   :  { %vm97_vm0 = vcmask 130048   ;;  %v3143_v7 = vmov 0.0   ;;  %s3144_s22 = smov 64   ;;  %vm202_vm1 = vcmask 261120   ;;  %v3145_v23 = vmov 0   ;;  %s3988_s2 = inlined_call_operand.vmem [shape: bf16[16,32], index: 2, kind: input, shape index: {}]   ;;  %s3989_s0 = inlined_call_operand.vmem [shape: bf16[64,16], index: 0, kind: input, shape index: {}]   ;;  %s3990_s4 = inlined_call_operand.vmem [shape: bf16[32,96], index: 4, kind: input, shape index: {}]   ;;  %s3991_s5 = inlined_call_operand.vmem [shape: bf16[32,96], index: 5, kind: input, shape index: {}]   ;;  %s3992_s7 = inlined_call_operand.vmem [shape: f32[1,32], index: 7, kind: input, shape index: {}]   ;;  %s3993_s3 = inlined_call_operand.vmem [shape: f32[1,32], index: 3, kind: input, shape index: {}]   ;;  %s3994_s6 = inlined_call_operand.vmem [shape: f32[1,96], index: 6, kind: input, shape index: {}]   ;;  %s3995_s9 = inlined_call_operand.vmem [shape: bf16[64,192], index: 9, kind: input, shape index: {}]   ;;  %s3996_s8 = inlined_call_operand.vmem [shape: bf16[8,192], index: 8, kind: input, shape index: {}]   ;;  %s3997_s1 = inlined_call_operand.vmem [shape: bf16[128,8], index: 1, kind: input, shape index: {}]   ;;  %s3998_s10 = inlined_call_operand.vmem [shape: f32[1,192], index: 10, kind: input, shape index: {}]   ;;  %s3999_s11 = inlined_call_operand.vmem [shape: f32[1,64], index: 11, kind: input, shape index: {}]   ;;  %s4000_s13 = inlined_call_operand.vmem [shape: bf16[32,4], index: 13, kind: input, shape index: {}]   ;;  %s4001_s12 = inlined_call_operand.vmem [shape: bf16[32,4], index: 12, kind: input, shape index: {}]   ;;  %s4002_s14 = inlined_call_operand.vmem [shape: bf16[64,4], index: 14, kind: input, shape index: {}]   ;;  %s4003_s15 = inlined_call_operand.vmem [shape: f32[1,4], index: 15, kind: input, shape index: {}]   ;;  %s4004_s16 = inlined_call_operand.vmem [shape: f32[8,4], index: 16, kind: output, shape index: {}]  }
   0x1   :  { %4005 = sst [smem:[#allocation4_spill]] %s3988_s2  ;;  %v2931_v1 = vld [vmem:[%s3989_s0] sm:$0xff]   ;;  %v2932_v2 = vld [vmem:[%s3989_s0 + $0x8] sm:$0xff]   ;;  %v2933_v3 = vld [vmem:[%s3989_s0 + $0x10] sm:$0xff]   ;;  %vm3146_vm2 = vmmov 0   ;;  %vm280_vm3 = vcmask 785408  }
   0x2   :  { %s4006_s23 = sld [smem:[#allocation4_spill]]  ;;  %2809 = vmatprep.mubr.msk.bf16.mxu0 %vm97_vm0, %v2931_v1  ;;  %v2934_v4 = vld [vmem:[%s3989_s0 + $0x18] sm:$0xff]   ;;  %v2935_v5 = vld [vmem:[%s3990_s4] sm:$0xff]   ;;  %v2936_v6 = vld [vmem:[%s3990_s4 + $0x8] sm:$0xff]   ;;  %vm388_vm4 = vcmask 1043456   ;;  %vm363_vm5 = vcmask 64512  }
   0x3   :  { %2921 = vmatprep.subr.bf16.mxu1 %v2935_v5  ;;  %v2691_v8 = vld [vmem:[%s3992_s7] ss:$0 sm:$0xff]  ;;  %v3276_v32 = vld [vmem:[%s3991_s5 + $0x8] sm:$0xff]   ;;  %vm509_vm6 = vcmask 523264   ;;  %vm2649_vm7 = vcmask 31744  }
   0x4   :  { %2923 = vmatpush3.bf16.msra.mxu1 %v2935_v5  ;;  %629 = vrot.lane.b32.xlu0 %v2691_v8, %s3144_s22  ;;  %v2655_v10 = vld [vmem:[%s3993_s3] ss:$0 sm:$0xff]  ;;  %v3317_v8 = vld [vmem:[%s3995_s9 + $0x14] ss:$8 sps:$4 sm:$0xff]   ;;  %s3147_s3 = smov 96  }
   0x5   :  { %2922 = vmatprep.subr.bf16.mxu1 %v2936_v6  ;;  %v3268_v31 = vld [vmem:[%s3991_s5] sm:$0xff]  }
   0x6   :  { %v2665_v33 = vld [vmem:[%s3994_s6] ss:$0 sm:$0xff] }
   0x8   :  { %v2930_v0 = vld [vmem:[%s4006_s23] sm:$0xff]   ;;  %2924 = vmatpush3.bf16.msra.mxu1 %v2936_v6 }
   0x9   :  { %2807 = vmatprep.subr.bf16.mxu0 %v2930_v0  ;;  %2829 = vmatprep.subr.bf16.mxu1 %v3143_v7 }
   0xa   :  { %2808 = vmatpush3.bf16.msra.mxu0 %v2930_v0 }
   0xb   :  { %2817 = vmatprep.subr.bf16.mxu0 %v2935_v5 }
   0xd   :  { %2810 = vmatmul.mubr.msk.bf16.vlgmr.msra.gmra.mrb[0].mxu0 %vm97_vm0, %v2932_v2  ;;  %v3303_v2 = vld [vmem:[%s3995_s9 + $0x4] ss:$8 sps:$4 sm:$0xff]  }
   0xe   :  { %2813 = vmatprep.mubr.msk.bf16.mxu0 %vm97_vm0, %v2933_v3  ;;  %2818 = vmatpush3.bf16.msra.mxu0 %v2935_v5  ;;  %v3308_v3 = vld [vmem:[%s3995_s9] ss:$8 sps:$4 sm:$0xff]  }
   0xf   :  { %2819 = vmatprep.subr.bf16.mxu0 %v2936_v6 }
  0x12   :  { %2820 = vmatpush3.bf16.msra.mxu0 %v2936_v6 }
  0x15   :  { %2814 = vmatmul.mubr.msk.bf16.gmra.mrb[4].mxu0 %vm97_vm0, %v2934_v4  ;;  %v305_v4 = vld [vmem:[%s3996_s8] sm:$0xff] }
  0x16   :  { %v2681_v5 = vcombine.high %v305_v4, %v305_v4  ;;  %v2680_v6 = vcombine.low %v305_v4, %v305_v4 }
  0x18   :  { %2682 = vmatprep.subr.msk.bf16.mxu0 %vm388_vm4, %v2681_v5 }
  0x76   :  { %v3295_v50 = vpop.permute.xlu0 %629 }
  0xe0   :  { %v2811_v9 = vpop.f32.mrb[0].mxu0 }
  0xe1   :  { %v144_v11 = vpop.f32.mrb[1].mxu0  ;;  %v153_v13 = vadd.f32 %v2811_v9, %v2655_v10  ;;  %v3322_v9 = vld [vmem:[%s3995_s9 + $0x10] ss:$8 sps:$4 sm:$0xff]  }
  0xe2   :  { %v2812_v12 = vpop.f32.mrb[2].mxu0  ;;  %v145_v16 = vadd.f32 %v2655_v10, %v144_v11  ;;  %v390_v11 = vsel %vm388_vm4, %v2680_v6, 0 }
  0xe3   :  { %v156_v14 = vadd.f32 %v2812_v12, %v2655_v10  ;;  %v147_v15 = vpop.f32.mrb[3].mxu0  ;;  %v3332_v12 = vld [vmem:[%s3995_s9 + $0x24] ss:$8 sps:$4 sm:$0xff]  }
  0xe4   :  { %v148_v17 = vadd.f32 %v2655_v10, %v147_v15  ;;  %v3343_v15 = vld [vmem:[%s3995_s9 + $0x34] ss:$8 sps:$4 sm:$0xff]  }
  0xe5   :  { %v176_v18 = vpack.c.bf16 %v156_v14, %v153_v13  ;;  %v3338_v14 = vld [vmem:[%s3995_s9 + $0x20] ss:$8 sps:$4 sm:$0xff]  }
  0xe6   :  { %v175_v19 = vpack.c.bf16 %v148_v17, %v145_v16  ;;  %v3356_v16 = vld [vmem:[%s3995_s9 + $0x30] ss:$8 sps:$4 sm:$0xff]  }
  0xe8   :  { %v2815_v20 = vpop.f32.mrb[4].mxu0  ;;  %2821 = vmatprep.mubr.msk.bf16.mxu0 %vm202_vm1, %v175_v19 }
  0xe9   :  { %v160_v21 = vpop.f32.mrb[5].mxu0  ;;  %2822 = vmatmul.mubr.msk.bf16.vlgmr.msra.gmra.mrb[8].mxu0 %vm202_vm1, %v176_v18  ;;  %v169_v24 = vadd.f32 %v2815_v20, %v2655_v10 }
  0xea   :  { %v2816_v22 = vpop.f32.mrb[6].mxu0  ;;  %427 = vmatprep.mubr.bf16.mxu0 %v3145_v23  ;;  %v161_v27 = vadd.f32 %v2655_v10, %v160_v21  ;;  %396 = vmatpush1.bf16.msra.mxu0 %v390_v11 }
  0xeb   :  { %v172_v25 = vadd.f32 %v2816_v22, %v2655_v10  ;;  %v163_v26 = vpop.f32.mrb[7].mxu0  ;;  %982 = vmatprep.subr.bf16.mxu0 %v3303_v2 }
  0xec   :  { %v164_v28 = vadd.f32 %v2655_v10, %v163_v26  ;;  %v2947_v10 = vld [vmem:[%s3997_s1] sm:$0xff]  }
  0xed   :  { %v178_v29 = vpack.c.bf16 %v172_v25, %v169_v24  ;;  %v308_v24 = vlaneseq }
  0xee   :  { %v177_v30 = vpack.c.bf16 %v164_v28, %v161_v27  ;;  %v306_v27 = vld [vmem:[%s3998_s10] sm:$0x3] }
  0xef   :  { %v309_v25 = vshrl.u32 %v308_v24, 7 }
  0xf0   :  { %2825 = vmatprep.mubr.msk.bf16.mxu1 %vm202_vm1, %v177_v30 }
  0xf1   :  { %2826 = vmatmul.mubr.msk.bf16.vlgmr.msra.gmra.mrb[0].mxu1 %vm202_vm1, %v178_v29  ;;  %2683 = vmatmul.mubr.msk.bf16.vlgmr.msra.gmra.mrb[12].mxu0 %vm363_vm5, %v2947_v10  ;;  %v310_v26 = vsub.s32 0, %v309_v25  ;;  %v314_v28 = vsub.s32 1, %v309_v25 }
  0xf2   :  { %2830 = vmatpush3.bf16.msra.mxu1 %v3268_v31  ;;  %2833 = vmatprep.mubr.msk.bf16.mxu1 %vm3146_vm2, %v3143_v7 }
  0xf3   :  { %2831 = vmatprep.subr.bf16.mxu1 %v3143_v7  ;;  %437 = vmatprep.mubr.bf16.mxu0 %v3145_v23  ;;  %v3382_v29 = vrot.slane %v306_v27, %v310_v26  ;;  %v3384_v30 = vrot.slane %v306_v27, %v314_v28 }
  0xf4   :  { %983 = vmatpush1.bf16.msra.mxu0 %v3308_v3 }
  0xf5   :  { %984 = vmatprep.subr.bf16.mxu0 %v3317_v8 }
  0xf6   :  { %2832 = vmatpush3.bf16.msra.mxu1 %v3276_v32 }
  0xf7   :  { %694 = vmatprep.subr.bf16.mxu1 %v3303_v2 }
  0xf8   :  { %985 = vmatpush1.bf16.msra.mxu0 %v3322_v9 }
  0xf9   :  { %2834 = vmatmul.mubr.bf16.vlgmr.msra.gmra.mrb[4].mxu1 %v3145_v23  ;;  %986 = vmatprep.subr.bf16.mxu0 %v3332_v12 }
  0xfa   :  { %726 = vmatprep.mubr.bf16.mxu1 %v3145_v23  ;;  %695 = vmatpush1.bf16.msra.mxu1 %v3308_v3 }
  0xfb   :  { %696 = vmatprep.subr.bf16.mxu1 %v3317_v8 }
  0xfc   :  { %987 = vmatpush1.bf16.msra.mxu0 %v3338_v14 }
  0xfd   :  { %988 = vmatprep.subr.bf16.mxu0 %v3343_v15 }
  0xfe   :  { %697 = vmatpush1.bf16.msra.mxu1 %v3322_v9 }
  0xff   :  { %698 = vmatprep.subr.bf16.mxu1 %v3332_v12 }
 0x100   :  { %989 = vmatpush1.bf16.msra.mxu0 %v3356_v16 }
 0x101   :  { %2861 = vmatprep.subr.bf16.mxu0 %v3143_v7 }
 0x102   :  { %699 = vmatpush1.bf16.msra.mxu1 %v3338_v14 }
 0x103   :  { %700 = vmatprep.subr.bf16.mxu1 %v3343_v15 }
 0x106   :  { %701 = vmatpush1.bf16.msra.mxu1 %v3356_v16 }
 0x107   :  { %2837 = vmatprep.subr.bf16.mxu1 %v3143_v7 }
 0x109   :  { %727 = vmatmul.mubr.bf16.vlgmr.msra.gmra.mrb[8].mxu1 %v3145_v23 }
 0x10a   :  { %2838 = vmatpush3.bf16.msra.mxu1 %v3268_v31  ;;  %2841 = vmatprep.mubr.msk.bf16.mxu1 %vm3146_vm2, %v3143_v7 }
 0x10b   :  { %2839 = vmatprep.subr.bf16.mxu1 %v3143_v7 }
 0x10e   :  { %2840 = vmatpush3.bf16.msra.mxu1 %v3276_v32 }
 0x10f   :  { %838 = vmatprep.subr.bf16.mxu1 %v3303_v2 }
 0x1bc   :  { %v2823_v34 = vpop.f32.mrb[8].mxu0 }
 0x1bd   :  { %v258_v35 = vadd.f32 %v2823_v34, %v2665_v33  ;;  %v249_v36 = vpop.f32.mrb[9].mxu0 }
 0x1be   :  { %v250_v37 = vadd.f32 %v2665_v33, %v249_v36  ;;  %v2824_v38 = vpop.f32.mrb[10].mxu0 }
 0x1bf   :  { %283 = vst.msk [vmem:[#allocation2 + $0x10] sm:$0xff] %vm280_vm3, %v258_v35  ;;  %v261_v39 = vadd.f32 %v2824_v38, %v2665_v33  ;;  %v252_v40 = vpop.f32.mrb[11].mxu0 }
 0x1c0   :  { %281 = vst.msk [vmem:[#allocation2] sm:$0xff] %vm280_vm3, %v250_v37  ;;  %v253_v41 = vadd.f32 %v2665_v33, %v252_v40 }
 0x1c1   :  { %284 = vst.msk [vmem:[#allocation2 + $0x18] sm:$0xff] %vm280_vm3, %v261_v39 }
 0x1c2   :  { %282 = vst.msk [vmem:[#allocation2 + $0x8] sm:$0xff] %vm280_vm3, %v253_v41 }
 0x1c4   :  { %v2827_v42 = vpop.f32.mrb[0].mxu1 }
 0x1c5   :  { %v274_v43 = vadd.f32 %v2827_v42, %v2665_v33  ;;  %v265_v44 = vpop.f32.mrb[1].mxu1 }
 0x1c6   :  { %v266_v45 = vadd.f32 %v2665_v33, %v265_v44  ;;  %v2828_v46 = vpop.f32.mrb[2].mxu1 }
 0x1c7   :  { %287 = vst.msk [vmem:[#allocation2 + $0x30] sm:$0xff] %vm280_vm3, %v274_v43  ;;  %v277_v47 = vadd.f32 %v2828_v46, %v2665_v33  ;;  %v268_v48 = vpop.f32.mrb[3].mxu1  ;;  %v621_v56 = vld [vmem:[#allocation2] sm:$0xff] }
 0x1c8   :  { %285 = vst.msk [vmem:[#allocation2 + $0x20] sm:$0xff] %vm280_vm3, %v266_v45  ;;  %v269_v49 = vadd.f32 %v2665_v33, %v268_v48  ;;  %v429_v33 = vpop.f32.mrb[12].mxu0  ;;  %v3402_v46 = vld [vmem:[%s3999_s11] ss:$0 sm:$0xff] }
 0x1c9   :  { %288 = vst.msk [vmem:[#allocation2 + $0x38] sm:$0xff] %vm280_vm3, %v277_v47  ;;  %v430_v34 = vadd.f32 %v429_v33, %v3382_v29  ;;  %v431_v35 = vpop.f32.mrb[13].mxu0 }
 0x1ca   :  { %286 = vst.msk [vmem:[#allocation2 + $0x28] sm:$0xff] %vm280_vm3, %v269_v49  ;;  %v432_v36 = vadd.f32 %v431_v35, %v3384_v30 }
 0x1cc   :  { %v615_v51 = vpop.f32.mrb[4].mxu1  ;;  %510 = vst.msk [vmem:[#allocation3 + $0x8] sm:$0xff] %vm509_vm6, %v432_v36 }
 0x1cd   :  { %v632_v52 = vadd.f32 %v3295_v50, %v615_v51  ;;  %v2835_v53 = vpop.f32.mrb[5].mxu1  ;;  %v622_v57 = vadd.f32 %v621_v56, %v615_v51 }
 0x1ce   :  { %v618_v54 = vpop.f32.mrb[6].mxu1 }
 0x1cf   :  { %634 = vrot.lane.b32.xlu0 %v632_v52, %s3144_s22  ;;  %v2836_v55 = vpop.f32.mrb[7].mxu1  ;;  %v2695_v58 = vmul.f32 -1.442695, %v622_v57  ;;  %v433_v54 = vpop.f32.mrb[14].mxu0 }
 0x1d0   :  { %v434_v57 = vadd.f32 %v433_v54, %v3382_v29 }
 0x1d1   :  { %2969 = vpow2.f32 %v2695_v58  ;;  %v435_v58 = vpop.f32.mrb[15].mxu0 }
 0x1d3   :  { %v736_v51 = vld [vmem:[#allocation3 + $0x8] sm:$0xff] }
 0x1db   :  { %v2970_v59 = vpop.eup %2969 }
 0x1dc   :  { %v626_v60 = vadd.f32 1.0, %v2970_v59  ;;  %v728_v37 = vpop.f32.mrb[8].mxu1 }
 0x1dd   :  { %v737_v38 = vadd.f32 %v728_v37, %v430_v34  ;;  %v730_v39 = vpop.f32.mrb[9].mxu1 }
 0x1de   :  { %2971 = vrcp.f32 %v626_v60  ;;  %v732_v40 = vpop.f32.mrb[10].mxu1  ;;  %v744_v47 = vadd.f32 %v3402_v46, %v730_v39  ;;  %v436_v60 = vadd.f32 %v435_v58, %v3384_v30 }
 0x1df   :  { %v733_v41 = vpop.f32.mrb[11].mxu1  ;;  %v2704_v43 = vmul.f32 -1.442695, %v737_v38 }
 0x1e0   :  { %512 = vst.msk [vmem:[#allocation3 + $0x18] sm:$0xff] %vm509_vm6, %v436_v60 }
 0x1e8   :  { %v2972_v61 = vpop.eup %2971 }
 0x1e9   :  { %v644_v17 = vsub.f32 1.0, %v2972_v61  ;;  %v650_v19 = vmul.f32 0.0, %v2972_v61 }
 0x241   :  { %v635_v62 = vpop.permute.xlu0 %634 }
 0x242   :  { %v637_v63 = vmul.f32 %v2972_v61, %v635_v62 }
 0x244   :  { %639 = vrot.lane.b32.xlu1 %v637_v63, %s3144_s22  ;;  %v803_v63 = vld [vmem:[#allocation2 + $0x8] sm:$0xff] }
 0x2b6   :  { %v640_v0 = vpop.permute.xlu1 %639 }
 0x2b7   :  { %v642_v1 = vadd.f32 %v640_v0, %v621_v56 }
 0x2b9   :  { %2973 = vtanh.f32 %v642_v1 }
 0x2ba   :  { %2975 = vpow2.f32 %v2704_v43 }
 0x2c3   :  { %v2974_v13 = vpop.eup %2973 }
 0x2c4   :  { %646 = vrot.lane.b32.xlu1 %v2974_v13, %s3147_s3  ;;  %v2976_v44 = vpop.eup %2975 }
 0x2c5   :  { %v741_v45 = vadd.f32 1.0, %v2976_v44 }
 0x2c7   :  { %2977 = vrcp.f32 %v741_v45 }
 0x2d1   :  { %v2978_v48 = vpop.eup %2977 }
 0x2d2   :  { %v745_v49 = vmul.f32 %v2978_v48, %v744_v47  ;;  %v748_v13 = vsub.f32 1.0, %v2978_v48 }
 0x2d4   :  { %v746_v52 = vadd.f32 %v745_v49, %v736_v51 }
 0x2d6   :  { %2979 = vtanh.f32 %v746_v52  ;;  %v880_v52 = vld [vmem:[#allocation3 + $0x18] sm:$0xff] }
 0x2e0   :  { %v2980_v62 = vpop.eup %2979 }
 0x336   :  { %v647_v18 = vpop.permute.xlu1 %646 }
 0x337   :  { %v649_v20 = vmul.f32 %v647_v18, %v644_v17  ;;  %v754_v18 = vmul.f32 0.0, %v2978_v48 }
 0x339   :  { %v3374_v21 = vadd.f32 %v650_v19, %v649_v20 }
 0x33b   :  { %v756_v22 = vpack.c.bf16 %v3374_v21, %v3374_v21 }
 0x33d   :  { %758 = vrot.lane.b32.xlu0 %v756_v22, %s3147_s3 }
 0x3af   :  { %v759_v42 = vpop.permute.xlu0 %758 }
 0x3b0   :  { %2842 = vmatmul.mubr.msk.bf16.vlgmr.msra.gmra.mrb[12].mxu1 %vm202_vm1, %v759_v42 }
 0x3b1   :  { %839 = vmatpush1.bf16.msra.mxu1 %v3308_v3  ;;  %870 = vmatprep.mubr.bf16.mxu1 %v3145_v23 }
 0x3b2   :  { %840 = vmatprep.subr.bf16.mxu1 %v3317_v8 }
 0x3b5   :  { %841 = vmatpush1.bf16.msra.mxu1 %v3322_v9 }
 0x3b6   :  { %842 = vmatprep.subr.bf16.mxu1 %v3332_v12 }
 0x3b9   :  { %843 = vmatpush1.bf16.msra.mxu1 %v3338_v14 }
 0x3ba   :  { %844 = vmatprep.subr.bf16.mxu1 %v3343_v15 }
 0x3bd   :  { %845 = vmatpush1.bf16.msra.mxu1 %v3356_v16 }
 0x3be   :  { %2845 = vmatprep.subr.bf16.mxu1 %v3143_v7 }
 0x483   :  { %v797_v53 = vpop.f32.mrb[12].mxu1 }
 0x484   :  { %v811_v55 = vadd.f32 %v797_v53, %v3295_v50  ;;  %v2843_v56 = vpop.f32.mrb[13].mxu1  ;;  %v804_v0 = vadd.f32 %v803_v63, %v797_v53 }
 0x485   :  { %v800_v59 = vpop.f32.mrb[14].mxu1 }
 0x486   :  { %813 = vrot.lane.b32.xlu1 %v811_v55, %s3144_s22  ;;  %v2844_v61 = vpop.f32.mrb[15].mxu1  ;;  %v2706_v1 = vmul.f32 -1.442695, %v804_v0  ;;  %v2954_v55 = vld [vmem:[%s3997_s1 + $0x8] sm:$0xff]  }
 0x487   :  { %2684 = vmatmul.mubr.msk.bf16.gmra.mrb[16].mxu0 %vm363_vm5, %v2954_v55  ;;  %v2955_v61 = vld [vmem:[%s3997_s1 + $0x10] sm:$0xff]   ;;  %v2958_v0 = vld [vmem:[%s3997_s1 + $0x28] sm:$0xff]  }
 0x488   :  { %2981 = vpow2.f32 %v2706_v1  ;;  %447 = vmatprep.mubr.bf16.mxu0 %v3145_v23  ;;  %v2959_v1 = vld [vmem:[%s3997_s1 + $0x30] sm:$0xff]  }
 0x48a   :  { %750 = vrot.lane.b32.xlu1 %v2980_v62, %s3144_s22  ;;  %v2956_v62 = vld [vmem:[%s3997_s1 + $0x18] sm:$0xff]  }
 0x48f   :  { %2685 = vmatmul.mubr.msk.bf16.gmra.mrb[20].mxu0 %vm363_vm5, %v2955_v61 }
 0x490   :  { %457 = vmatprep.mubr.bf16.mxu0 %v3145_v23 }
 0x492   :  { %v2982_v4 = vpop.eup %2981 }
 0x493   :  { %v808_v5 = vadd.f32 1.0, %v2982_v4  ;;  %v947_v4 = vld [vmem:[#allocation2 + $0x10] sm:$0xff] }
 0x495   :  { %2983 = vrcp.f32 %v808_v5 }
 0x497   :  { %2686 = vmatmul.mubr.msk.bf16.gmra.mrb[24].mxu0 %vm363_vm5, %v2956_v62 }
 0x498   :  { %467 = vmatprep.mubr.bf16.mxu0 %v3145_v23 }
 0x49f   :  { %v2984_v6 = vpop.eup %2983 }
 0x4a0   :  { %v823_v28 = vsub.f32 1.0, %v2984_v6  ;;  %v829_v34 = vmul.f32 %v2984_v6, %v3374_v21 }
 0x4f8   :  { %v814_v10 = vpop.permute.xlu1 %813 }
 0x4f9   :  { %v816_v11 = vmul.f32 %v2984_v6, %v814_v10 }
 0x4fb   :  { %818 = vrot.lane.b32.xlu0 %v816_v11, %s3144_s22 }
 0x4fc   :  { %v751_v17 = vpop.permute.xlu1 %750 }
 0x4fd   :  { %v753_v19 = vmul.f32 %v751_v17, %v748_v13  ;;  %v2960_v13 = vld [vmem:[%s3997_s1 + $0x38] sm:$0xff]  }
 0x4ff   :  { %v3412_v20 = vadd.f32 %v754_v18, %v753_v19 }
 0x501   :  { %v831_v22 = vpack.c.bf16 %v3412_v20, %v3412_v20 }
 0x503   :  { %833 = vrot.lane.b32.xlu1 %v831_v22, %s3144_s22 }
 0x56d   :  { %v819_v24 = vpop.permute.xlu0 %818 }
 0x56e   :  { %v821_v25 = vadd.f32 %v819_v24, %v803_v63  ;;  %v2957_v63 = vld [vmem:[%s3997_s1 + $0x20] sm:$0xff]  }
 0x56f   :  { %2687 = vmatmul.mubr.msk.bf16.gmra.mrb[28].mxu0 %vm363_vm5, %v2957_v63 }
 0x570   :  { %2985 = vtanh.f32 %v821_v25  ;;  %477 = vmatprep.mubr.bf16.mxu0 %v3145_v23 }
 0x575   :  { %v834_v26 = vpop.permute.xlu1 %833 }
 0x576   :  { %2707 = vmatmul.mubr.msk.bf16.vlgmr.msra.gmra.mrb[16].mxu1 %vm509_vm6, %v834_v26 }
 0x577   :  { %2846 = vmatpush3.bf16.msra.mxu1 %v3268_v31  ;;  %2849 = vmatprep.mubr.msk.bf16.mxu1 %vm3146_vm2, %v3143_v7 }
 0x578   :  { %2847 = vmatprep.subr.bf16.mxu1 %v3143_v7  ;;  %2688 = vmatmul.mubr.msk.bf16.gmra.mrb[32].mxu0 %vm363_vm5, %v2958_v0 }
 0x579   :  { %487 = vmatprep.mubr.bf16.mxu0 %v3145_v23 }
 0x57a   :  { %v2986_v27 = vpop.eup %2985 }
 0x57b   :  { %825 = vrot.lane.b32.xlu0 %v2986_v27, %s3147_s3  ;;  %2848 = vmatpush3.bf16.msra.mxu1 %v3276_v32 }
 0x57c   :  { %2853 = vmatprep.subr.bf16.mxu1 %v3143_v7 }
 0x580   :  { %2689 = vmatmul.mubr.msk.bf16.gmra.mrb[36].mxu0 %vm363_vm5, %v2959_v1 }
 0x581   :  { %497 = vmatprep.mubr.bf16.mxu0 %v3145_v23 }
 0x588   :  { %2690 = vmatmul.mubr.msk.bf16.gmra.mrb[40].mxu0 %vm363_vm5, %v2960_v13 }
 0x589   :  { %1014 = vmatprep.mubr.bf16.mxu0 %v3145_v23 }
 0x5ed   :  { %v826_v33 = vpop.permute.xlu0 %825 }
 0x5ee   :  { %v828_v35 = vmul.f32 %v826_v33, %v823_v28 }
 0x5f0   :  { %v3426_v36 = vadd.f32 %v829_v34, %v828_v35  ;;  %v439_v35 = vpop.f32.mrb[16].mxu0 }
 0x5f2   :  { %v900_v37 = vpack.c.bf16 %v3426_v36, %v3426_v36 }
 0x5f4   :  { %902 = vrot.lane.b32.xlu0 %v900_v37, %s3147_s3 }
 0x649   :  { %v872_v38 = vpop.f32.mrb[16].mxu1 }
 0x64a   :  { %v881_v39 = vadd.f32 %v872_v38, %v434_v57  ;;  %v874_v40 = vpop.f32.mrb[17].mxu1  ;;  %v3488_v38 = vadd.f32 %v439_v35, %v3382_v29 }
 0x64b   :  { %v876_v41 = vpop.f32.mrb[18].mxu1  ;;  %v888_v47 = vadd.f32 %v3402_v46, %v874_v40 }
 0x64c   :  { %v2708_v42 = vmul.f32 -1.442695, %v881_v39  ;;  %v877_v43 = vpop.f32.mrb[19].mxu1  ;;  %v441_v39 = vpop.f32.mrb[17].mxu0 }
 0x64d   :  { %v443_v40 = vpop.f32.mrb[18].mxu0 }
 0x64e   :  { %2987 = vpow2.f32 %v2708_v42  ;;  %v3493_v41 = vadd.f32 %v443_v40, %v3382_v29  ;;  %v445_v42 = vpop.f32.mrb[19].mxu0 }
 0x64f   :  { %v446_v43 = vadd.f32 %v445_v42, %v3384_v30 }
 0x651   :  { %516 = vst.msk [vmem:[#allocation3 + $0x38] sm:$0xff] %vm509_vm6, %v446_v43 }
 0x658   :  { %v2988_v44 = vpop.eup %2987 }
 0x659   :  { %v885_v45 = vadd.f32 1.0, %v2988_v44  ;;  %v449_v44 = vpop.f32.mrb[20].mxu0 }
 0x65b   :  { %2989 = vrcp.f32 %v885_v45  ;;  %v3502_v45 = vadd.f32 %v449_v44, %v3382_v29 }
 0x665   :  { %v2990_v48 = vpop.eup %2989 }
 0x666   :  { %v889_v49 = vmul.f32 %v2990_v48, %v888_v47  ;;  %v903_v51 = vpop.permute.xlu0 %902  ;;  %v892_v22 = vsub.f32 1.0, %v2990_v48  ;;  %v898_v25 = vmul.f32 %v2990_v48, %v3412_v20  ;;  %v442_v20 = vadd.f32 %v441_v39, %v3384_v30  ;;  %v451_v47 = vpop.f32.mrb[21].mxu0 }
 0x667   :  { %2850 = vmatmul.mubr.msk.bf16.vlgmr.msra.gmra.mrb[20].mxu1 %vm202_vm1, %v903_v51  ;;  %v453_v51 = vpop.f32.mrb[22].mxu0 }
 0x668   :  { %2854 = vmatpush3.bf16.msra.mxu1 %v3268_v31  ;;  %2857 = vmatprep.mubr.msk.bf16.mxu1 %vm3146_vm2, %v3143_v7  ;;  %v890_v53 = vadd.f32 %v889_v49, %v880_v52  ;;  %514 = vst.msk [vmem:[#allocation3 + $0x28] sm:$0xff] %vm509_vm6, %v442_v20  ;;  %v452_v49 = vadd.f32 %v451_v47, %v3384_v30 }
 0x669   :  { %2855 = vmatprep.subr.bf16.mxu1 %v3143_v7  ;;  %v3508_v52 = vadd.f32 %v453_v51, %v3382_v29 }
 0x66a   :  { %2991 = vtanh.f32 %v890_v53  ;;  %v455_v53 = vpop.f32.mrb[23].mxu0  ;;  %518 = vst.msk [vmem:[#allocation3 + $0x48] sm:$0xff] %vm509_vm6, %v452_v49 }
 0x66b   :  { %v459_v55 = vpop.f32.mrb[24].mxu0 }
 0x66c   :  { %2856 = vmatpush3.bf16.msra.mxu1 %v3276_v32 }
 0x66d   :  { %1126 = vmatprep.subr.bf16.mxu1 %v3303_v2 }
 0x674   :  { %v2992_v60 = vpop.eup %2991 }
 0x73a   :  { %v941_v54 = vpop.f32.mrb[20].mxu1 }
 0x73b   :  { %v955_v56 = vadd.f32 %v941_v54, %v3295_v50  ;;  %v2851_v57 = vpop.f32.mrb[21].mxu1  ;;  %v948_v5 = vadd.f32 %v947_v4, %v941_v54  ;;  %v456_v54 = vadd.f32 %v455_v53, %v3384_v30 }
 0x73c   :  { %v944_v58 = vpop.f32.mrb[22].mxu1  ;;  %v461_v57 = vpop.f32.mrb[25].mxu0 }
 0x73d   :  { %957 = vrot.lane.b32.xlu1 %v955_v56, %s3144_s22  ;;  %v2852_v59 = vpop.f32.mrb[23].mxu1  ;;  %v2710_v6 = vmul.f32 -1.442695, %v948_v5  ;;  %v3515_v56 = vadd.f32 %v459_v55, %v3382_v29  ;;  %520 = vst.msk [vmem:[#allocation3 + $0x58] sm:$0xff] %vm509_vm6, %v456_v54  ;;  %v462_v58 = vadd.f32 %v461_v57, %v3384_v30 }
 0x73e   :  { %v463_v59 = vpop.f32.mrb[26].mxu0 }
 0x73f   :  { %2993 = vpow2.f32 %v2710_v6  ;;  %v465_v61 = vpop.f32.mrb[27].mxu0  ;;  %522 = vst.msk [vmem:[#allocation3 + $0x68] sm:$0xff] %vm509_vm6, %v462_v58 }
 0x740   :  { %v466_v62 = vadd.f32 %v465_v61, %v3384_v30  ;;  %v469_v63 = vpop.f32.mrb[28].mxu0 }
 0x741   :  { %894 = vrot.lane.b32.xlu1 %v2992_v60, %s3144_s22  ;;  %v3520_v60 = vadd.f32 %v463_v59, %v3382_v29  ;;  %v3525_v0 = vadd.f32 %v469_v63, %v3382_v29  ;;  %v471_v1 = vpop.f32.mrb[29].mxu0 }
 0x742   :  { %524 = vst.msk [vmem:[#allocation3 + $0x78] sm:$0xff] %vm509_vm6, %v466_v62  ;;  %v473_v5 = vpop.f32.mrb[30].mxu0 }
 0x743   :  { %v3530_v6 = vadd.f32 %v473_v5, %v3382_v29 }
 0x749   :  { %v2994_v10 = vpop.eup %2993 }
 0x74a   :  { %v952_v11 = vadd.f32 1.0, %v2994_v10  ;;  %v475_v10 = vpop.f32.mrb[31].mxu0 }
 0x74b   :  { %v479_v13 = vpop.f32.mrb[32].mxu0 }
 0x74c   :  { %2995 = vrcp.f32 %v952_v11  ;;  %v476_v11 = vadd.f32 %v475_v10, %v3384_v30 }
 0x74e   :  { %528 = vst.msk [vmem:[#allocation3 + $0x98] sm:$0xff] %vm509_vm6, %v476_v11 }
 0x756   :  { %v3477_v17 = vpop.eup %2995 }
 0x757   :  { %v967_v55 = vsub.f32 1.0, %v3477_v17  ;;  %v973_v58 = vmul.f32 %v3477_v17, %v3426_v36 }
 0x7af   :  { %v958_v18 = vpop.permute.xlu1 %957 }
 0x7b0   :  { %v960_v19 = vmul.f32 %v3477_v17, %v958_v18  ;;  %v3535_v18 = vadd.f32 %v479_v13, %v3382_v29 }
 0x7b2   :  { %962 = vrot.lane.b32.xlu0 %v960_v19, %s3144_s22  ;;  %v481_v19 = vpop.f32.mrb[33].mxu0 }
 0x7b3   :  { %v895_v24 = vpop.permute.xlu1 %894 }
 0x7b4   :  { %v897_v26 = vmul.f32 %v895_v24, %v892_v22  ;;  %v482_v22 = vadd.f32 %v481_v19, %v3384_v30  ;;  %v483_v24 = vpop.f32.mrb[34].mxu0  ;;  %v1024_v19 = vld [vmem:[#allocation3 + $0x28] sm:$0xff] }
 0x7b6   :  { %v3482_v27 = vadd.f32 %v898_v25, %v897_v26  ;;  %v484_v25 = vadd.f32 %v483_v24, %v3382_v29  ;;  %v485_v26 = vpop.f32.mrb[35].mxu0  ;;  %530 = vst.msk [vmem:[#allocation3 + $0xa8] sm:$0xff] %vm509_vm6, %v482_v22 }
 0x7b8   :  { %v975_v28 = vpack.c.bf16 %v3482_v27, %v3482_v27  ;;  %531 = vst [vmem:[#allocation3 + $0xb0] sm:$0xff] %v484_v25 }
 0x7ba   :  { %977 = vrot.lane.b32.xlu1 %v975_v28, %s3144_s22  ;;  %v486_v28 = vadd.f32 %v485_v26, %v3384_v30 }
 0x7bc   :  { %532 = vst.msk [vmem:[#allocation3 + $0xb8] sm:$0xff] %vm509_vm6, %v486_v28 }
 0x824   :  { %v963_v33 = vpop.permute.xlu0 %962 }
 0x825   :  { %v965_v34 = vadd.f32 %v963_v33, %v947_v4  ;;  %v472_v4 = vadd.f32 %v471_v1, %v3384_v30  ;;  %v489_v33 = vpop.f32.mrb[36].mxu0 }
 0x826   :  { %v491_v35 = vpop.f32.mrb[37].mxu0 }
 0x827   :  { %2997 = vtanh.f32 %v965_v34  ;;  %526 = vst.msk [vmem:[#allocation3 + $0x88] sm:$0xff] %vm509_vm6, %v472_v4  ;;  %v490_v34 = vadd.f32 %v489_v33, %v3382_v29  ;;  %v493_v39 = vpop.f32.mrb[38].mxu0 }
 0x828   :  { %v494_v20 = vadd.f32 %v493_v39, %v3382_v29  ;;  %v495_v40 = vpop.f32.mrb[39].mxu0 }
 0x829   :  { %533 = vst [vmem:[#allocation3 + $0xc0] sm:$0xff] %v490_v34  ;;  %v496_v42 = vadd.f32 %v495_v40, %v3384_v30  ;;  %v499_v43 = vpop.f32.mrb[40].mxu0 }
 0x82a   :  { %535 = vst [vmem:[#allocation3 + $0xd0] sm:$0xff] %v494_v20  ;;  %v500_v44 = vadd.f32 %v499_v43, %v3382_v29  ;;  %v501_v47 = vpop.f32.mrb[41].mxu0 }
 0x82b   :  { %536 = vst.msk [vmem:[#allocation3 + $0xd8] sm:$0xff] %vm509_vm6, %v496_v42  ;;  %v503_v49 = vpop.f32.mrb[42].mxu0 }
 0x82c   :  { %v978_v37 = vpop.permute.xlu1 %977  ;;  %537 = vst [vmem:[#allocation3 + $0xe0] sm:$0xff] %v500_v44  ;;  %v504_v51 = vadd.f32 %v503_v49, %v3382_v29  ;;  %v505_v53 = vpop.f32.mrb[43].mxu0 }
 0x82d   :  { %2711 = vmatmul.mubr.msk.bf16.vlgmr.msra.gmra.mrb[44].mxu0 %vm509_vm6, %v978_v37  ;;  %v492_v37 = vadd.f32 %v491_v35, %v3384_v30  ;;  %v506_v54 = vadd.f32 %v505_v53, %v3384_v30 }
 0x82e   :  { %2862 = vmatpush3.bf16.msra.mxu0 %v3268_v31  ;;  %2865 = vmatprep.mubr.msk.bf16.mxu0 %vm3146_vm2, %v3143_v7  ;;  %539 = vst [vmem:[#allocation3 + $0xf0] sm:$0xff] %v504_v51 }
 0x82f   :  { %2863 = vmatprep.subr.bf16.mxu0 %v3143_v7  ;;  %534 = vst.msk [vmem:[#allocation3 + $0xc8] sm:$0xff] %vm509_vm6, %v492_v37  ;;  %540 = vst.msk [vmem:[#allocation3 + $0xf8] sm:$0xff] %vm509_vm6, %v506_v54 }
 0x831   :  { %v2998_v48 = vpop.eup %2997 }
 0x832   :  { %969 = vrot.lane.b32.xlu0 %v2998_v48, %s3147_s3  ;;  %2864 = vmatpush3.bf16.msra.mxu0 %v3276_v32  ;;  %v502_v48 = vadd.f32 %v501_v47, %v3384_v30 }
 0x833   :  { %1270 = vmatprep.subr.bf16.mxu0 %v3303_v2 }
 0x834   :  { %538 = vst.msk [vmem:[#allocation3 + $0xe8] sm:$0xff] %vm509_vm6, %v502_v48 }
 0x8a4   :  { %v970_v57 = vpop.permute.xlu0 %969 }
 0x8a5   :  { %v972_v59 = vmul.f32 %v970_v57, %v967_v55 }
 0x8a7   :  { %v3558_v61 = vadd.f32 %v973_v58, %v972_v59 }
 0x8a9   :  { %v1044_v29 = vpack.c.bf16 %v3558_v61, %v3558_v61 }
 0x8ab   :  { %1046 = vrot.lane.b32.xlu0 %v1044_v29, %s3147_s3 }
 0x900   :  { %v1016_v62 = vpop.f32.mrb[44].mxu0 }
 0x901   :  { %v1025_v30 = vadd.f32 %v1016_v62, %v3488_v38  ;;  %v1018_v63 = vpop.f32.mrb[45].mxu0 }
 0x902   :  { %v1020_v1 = vpop.f32.mrb[46].mxu0  ;;  %v1032_v17 = vadd.f32 %v3402_v46, %v1018_v63 }
 0x903   :  { %v2712_v4 = vmul.f32 -1.442695, %v1025_v30  ;;  %v1021_v5 = vpop.f32.mrb[47].mxu0 }
 0x905   :  { %2999 = vpow2.f32 %v2712_v4 }
 0x90f   :  { %v3000_v10 = vpop.eup %2999 }
 0x910   :  { %v1029_v11 = vadd.f32 1.0, %v3000_v10 }
 0x912   :  { %3001 = vrcp.f32 %v1029_v11 }
 0x91c   :  { %v3002_v13 = vpop.eup %3001 }
 0x91d   :  { %v1033_v22 = vmul.f32 %v3002_v13, %v1032_v17  ;;  %v1047_v24 = vpop.permute.xlu0 %1046  ;;  %v1036_v26 = vsub.f32 1.0, %v3002_v13  ;;  %v1042_v33 = vmul.f32 %v3002_v13, %v3482_v27  ;;  %v1091_v27 = vld [vmem:[#allocation2 + $0x18] sm:$0xff] }
 0x91e   :  { %2858 = vmatmul.mubr.msk.bf16.vlgmr.msra.gmra.mrb[24].mxu1 %vm202_vm1, %v1047_v24  ;;  %v1168_v17 = vld [vmem:[#allocation3 + $0x38] sm:$0xff] }
 0x91f   :  { %v1034_v25 = vadd.f32 %v1033_v22, %v1024_v19  ;;  %1127 = vmatpush1.bf16.msra.mxu1 %v3308_v3  ;;  %1158 = vmatprep.mubr.bf16.mxu1 %v3145_v23 }
 0x920   :  { %1128 = vmatprep.subr.bf16.mxu1 %v3317_v8 }
 0x921   :  { %3003 = vtanh.f32 %v1034_v25 }
 0x923   :  { %1129 = vmatpush1.bf16.msra.mxu1 %v3322_v9 }
 0x924   :  { %1130 = vmatprep.subr.bf16.mxu1 %v3332_v12 }
 0x927   :  { %1131 = vmatpush1.bf16.msra.mxu1 %v3338_v14 }
 0x928   :  { %1132 = vmatprep.subr.bf16.mxu1 %v3343_v15 }
 0x92b   :  { %v3004_v38 = vpop.eup %3003  ;;  %1133 = vmatpush1.bf16.msra.mxu1 %v3356_v16 }
 0x92c   :  { %1038 = vrot.lane.b32.xlu0 %v3004_v38, %s3144_s22  ;;  %2869 = vmatprep.subr.bf16.mxu1 %v3143_v7 }
 0x99e   :  { %v1039_v28 = vpop.permute.xlu0 %1038 }
 0x99f   :  { %v1041_v34 = vmul.f32 %v1039_v28, %v1036_v26 }
 0x9a1   :  { %v1043_v35 = vadd.f32 %v1042_v33, %v1041_v34 }
 0x9a3   :  { %v1119_v37 = vpack.c.bf16 %v1043_v35, %v1043_v35 }
 0x9a5   :  { %1121 = vrot.lane.b32.xlu0 %v1119_v37, %s3144_s22 }
 0x9f1   :  { %v1085_v39 = vpop.f32.mrb[24].mxu1 }
 0x9f2   :  { %v1099_v20 = vadd.f32 %v1085_v39, %v3295_v50  ;;  %v2859_v40 = vpop.f32.mrb[25].mxu1  ;;  %v1092_v47 = vadd.f32 %v1091_v27, %v1085_v39 }
 0x9f3   :  { %v1088_v42 = vpop.f32.mrb[26].mxu1 }
 0x9f4   :  { %1101 = vrot.lane.b32.xlu1 %v1099_v20, %s3144_s22  ;;  %v2860_v43 = vpop.f32.mrb[27].mxu1  ;;  %v2714_v48 = vmul.f32 -1.442695, %v1092_v47  ;;  %v3626_v42 = vld [vmem:[%s3991_s5 + $0x8] sm:$0xff]  }
 0x9f6   :  { %3005 = vpow2.f32 %v2714_v48 }
 0xa00   :  { %v3006_v49 = vpop.eup %3005 }
 0xa01   :  { %v1096_v51 = vadd.f32 1.0, %v3006_v49 }
 0xa03   :  { %3007 = vrcp.f32 %v1096_v51 }
 0xa0d   :  { %v3008_v53 = vpop.eup %3007 }
 0xa0e   :  { %v1111_v22 = vsub.f32 1.0, %v3008_v53  ;;  %v1117_v24 = vmul.f32 %v3008_v53, %v3558_v61 }
 0xa17   :  { %v1122_v44 = vpop.permute.xlu0 %1121 }
 0xa18   :  { %2715 = vmatmul.mubr.msk.bf16.vlgmr.msra.gmra.mrb[28].mxu1 %vm509_vm6, %v1122_v44 }
 0xa19   :  { %2870 = vmatpush3.bf16.msra.mxu1 %v3268_v31  ;;  %2873 = vmatprep.mubr.msk.bf16.mxu1 %vm3146_vm2, %v3143_v7 }
 0xa1a   :  { %2871 = vmatprep.subr.bf16.mxu1 %v3143_v7 }
 0xa1d   :  { %2872 = vmatpush3.bf16.msra.mxu1 %v3276_v32 }
 0xa1e   :  { %1414 = vmatprep.subr.bf16.mxu1 %v3303_v2 }
 0xa66   :  { %v1102_v54 = vpop.permute.xlu1 %1101 }
 0xa67   :  { %v1104_v55 = vmul.f32 %v3008_v53, %v1102_v54 }
 0xa69   :  { %1106 = vrot.lane.b32.xlu1 %v1104_v55, %s3144_s22 }
 0xadb   :  { %v1107_v31 = vpop.permute.xlu1 %1106 }
 0xadc   :  { %v1109_v57 = vadd.f32 %v1107_v31, %v1091_v27 }
 0xade   :  { %3009 = vtanh.f32 %v1109_v57 }
 0xae8   :  { %v3010_v58 = vpop.eup %3009 }
 0xae9   :  { %1113 = vrot.lane.b32.xlu1 %v3010_v58, %s3147_s3 }
 0xaeb   :  { %v1160_v32 = vpop.f32.mrb[28].mxu1 }
 0xaec   :  { %v1169_v59 = vadd.f32 %v1160_v32, %v3493_v41  ;;  %v1162_v29 = vpop.f32.mrb[29].mxu1 }
 0xaed   :  { %v1164_v62 = vpop.f32.mrb[30].mxu1  ;;  %v1176_v5 = vadd.f32 %v3402_v46, %v1162_v29  ;;  %v1235_v29 = vld [vmem:[#allocation2 + $0x20] sm:$0xff] }
 0xaee   :  { %v2716_v30 = vmul.f32 -1.442695, %v1169_v59  ;;  %v1165_v63 = vpop.f32.mrb[31].mxu1 }
 0xaf0   :  { %3011 = vpow2.f32 %v2716_v30 }
 0xafa   :  { %v3012_v1 = vpop.eup %3011 }
 0xafb   :  { %v1173_v4 = vadd.f32 1.0, %v3012_v1 }
 0xafd   :  { %3013 = vrcp.f32 %v1173_v4 }
 0xb07   :  { %v3014_v10 = vpop.eup %3013 }
 0xb08   :  { %v1177_v11 = vmul.f32 %v3014_v10, %v1176_v5  ;;  %v1180_v28 = vsub.f32 1.0, %v3014_v10  ;;  %v1186_v34 = vmul.f32 %v3014_v10, %v1043_v35 }
 0xb0a   :  { %v1178_v13 = vadd.f32 %v1177_v11, %v1168_v17  ;;  %v1312_v17 = vld [vmem:[#allocation3 + $0x48] sm:$0xff] }
 0xb0c   :  { %3015 = vtanh.f32 %v1178_v13 }
 0xb16   :  { %v3016_v19 = vpop.eup %3015 }
 0xb17   :  { %1182 = vrot.lane.b32.xlu1 %v3016_v19, %s3144_s22 }
 0xb5b   :  { %v1114_v41 = vpop.permute.xlu1 %1113 }
 0xb5c   :  { %v1116_v25 = vmul.f32 %v1114_v41, %v1111_v22 }
 0xb5e   :  { %v3593_v38 = vadd.f32 %v1117_v24, %v1116_v25 }
 0xb60   :  { %v1188_v26 = vpack.c.bf16 %v3593_v38, %v3593_v38 }
 0xb62   :  { %1190 = vrot.lane.b32.xlu0 %v1188_v26, %s3147_s3 }
 0xb89   :  { %v1183_v33 = vpop.permute.xlu1 %1182 }
 0xb8a   :  { %v1185_v37 = vmul.f32 %v1183_v33, %v1180_v28 }
 0xb8c   :  { %v3598_v39 = vadd.f32 %v1186_v34, %v1185_v37 }
 0xb8e   :  { %v1263_v20 = vpack.c.bf16 %v3598_v39, %v3598_v39 }
 0xb90   :  { %1265 = vrot.lane.b32.xlu1 %v1263_v20, %s3144_s22 }
 0xbd4   :  { %v1191_v40 = vpop.permute.xlu0 %1190 }
 0xbd5   :  { %2866 = vmatmul.mubr.msk.bf16.vlgmr.msra.gmra.mrb[48].mxu0 %vm202_vm1, %v1191_v40 }
 0xbd6   :  { %1271 = vmatpush1.bf16.msra.mxu0 %v3308_v3  ;;  %1302 = vmatprep.mubr.bf16.mxu0 %v3145_v23  ;;  %v3617_v3 = vld [vmem:[%s3991_s5] sm:$0xff]  }
 0xbd7   :  { %1272 = vmatprep.subr.bf16.mxu0 %v3317_v8 }
 0xbda   :  { %1273 = vmatpush1.bf16.msra.mxu0 %v3322_v9 }
 0xbdb   :  { %1274 = vmatprep.subr.bf16.mxu0 %v3332_v12 }
 0xbde   :  { %1275 = vmatpush1.bf16.msra.mxu0 %v3338_v14 }
 0xbdf   :  { %1276 = vmatprep.subr.bf16.mxu0 %v3343_v15 }
 0xbe2   :  { %1277 = vmatpush1.bf16.msra.mxu0 %v3356_v16 }
 0xbe3   :  { %2877 = vmatprep.subr.bf16.mxu0 %v3143_v7 }
 0xc02   :  { %v1266_v35 = vpop.permute.xlu1 %1265 }
 0xc03   :  { %2719 = vmatmul.mubr.msk.bf16.vlgmr.msra.gmra.mrb[52].mxu0 %vm509_vm6, %v1266_v35 }
 0xc04   :  { %2878 = vmatpush3.bf16.msra.mxu0 %v3617_v3  ;;  %2881 = vmatprep.mubr.msk.bf16.mxu0 %vm3146_vm2, %v3143_v7 }
 0xc05   :  { %2879 = vmatprep.subr.bf16.mxu0 %v3143_v7 }
 0xc08   :  { %2880 = vmatpush3.bf16.msra.mxu0 %v3626_v42 }
 0xc09   :  { %1558 = vmatprep.subr.bf16.mxu0 %v3303_v2 }
 0xca8   :  { %v1229_v43 = vpop.f32.mrb[48].mxu0 }
 0xca9   :  { %v1243_v44 = vadd.f32 %v1229_v43, %v3295_v50  ;;  %v2867_v27 = vpop.f32.mrb[49].mxu0  ;;  %v1236_v62 = vadd.f32 %v1235_v29, %v1229_v43 }
 0xcaa   :  { %v1232_v47 = vpop.f32.mrb[50].mxu0 }
 0xcab   :  { %1245 = vrot.lane.b32.xlu0 %v1243_v44, %s3144_s22  ;;  %v2868_v48 = vpop.f32.mrb[51].mxu0  ;;  %v2718_v30 = vmul.f32 -1.442695, %v1236_v62 }
 0xcd6   :  { %v1304_v49 = vpop.f32.mrb[52].mxu0 }
 0xcd7   :  { %v1313_v51 = vadd.f32 %v1304_v49, %v3502_v45  ;;  %v1306_v53 = vpop.f32.mrb[53].mxu0 }
 0xcd8   :  { %v1308_v54 = vpop.f32.mrb[54].mxu0  ;;  %v1320_v2 = vadd.f32 %v3402_v46, %v1306_v53 }
 0xcd9   :  { %v2720_v55 = vmul.f32 -1.442695, %v1313_v51  ;;  %v1309_v31 = vpop.f32.mrb[55].mxu0 }
 0xcdb   :  { %3017 = vpow2.f32 %v2720_v55 }
 0xce5   :  { %v3018_v57 = vpop.eup %3017 }
 0xce6   :  { %v1317_v58 = vadd.f32 1.0, %v3018_v57 }
 0xce8   :  { %3019 = vrcp.f32 %v1317_v58  ;;  %v1379_v58 = vld [vmem:[#allocation2 + $0x28] sm:$0xff] }
 0xce9   :  { %3021 = vpow2.f32 %v2718_v30 }
 0xcf2   :  { %v3020_v32 = vpop.eup %3019 }
 0xcf3   :  { %v1321_v59 = vmul.f32 %v3020_v32, %v1320_v2  ;;  %v3022_v63 = vpop.eup %3021  ;;  %v1324_v33 = vsub.f32 1.0, %v3020_v32  ;;  %v1330_v37 = vmul.f32 %v3020_v32, %v3598_v39  ;;  %v3653_v39 = vld [vmem:[%s3995_s9] ss:$8 sps:$4 sm:$0xff]  }
 0xcf4   :  { %v1240_v1 = vadd.f32 1.0, %v3022_v63 }
 0xcf5   :  { %v1322_v13 = vadd.f32 %v1321_v59, %v1312_v17 }
 0xcf6   :  { %3023 = vrcp.f32 %v1240_v1 }
 0xd00   :  { %v3024_v45 = vpop.eup %3023 }
 0xd01   :  { %v1255_v41 = vsub.f32 1.0, %v3024_v45  ;;  %v1261_v25 = vmul.f32 %v3024_v45, %v3593_v38 }
 0xd1d   :  { %v1246_v4 = vpop.permute.xlu0 %1245 }
 0xd1e   :  { %v1248_v5 = vmul.f32 %v3024_v45, %v1246_v4  ;;  %v1456_v45 = vld [vmem:[#allocation3 + $0x58] sm:$0xff] }
 0xd20   :  { %1250 = vrot.lane.b32.xlu0 %v1248_v5, %s3144_s22 }
 0xd92   :  { %v1251_v10 = vpop.permute.xlu0 %1250 }
 0xd93   :  { %v1253_v11 = vadd.f32 %v1251_v10, %v1235_v29 }
 0xd95   :  { %3025 = vtanh.f32 %v1253_v11 }
 0xd96   :  { %3027 = vtanh.f32 %v1322_v13 }
 0xd9f   :  { %v3026_v19 = vpop.eup %3025 }
 0xda0   :  { %1257 = vrot.lane.b32.xlu1 %v3026_v19, %s3147_s3  ;;  %v3028_v22 = vpop.eup %3027 }
 0xda4   :  { %1326 = vrot.lane.b32.xlu1 %v3028_v22, %s3144_s22 }
 0xe12   :  { %v1258_v24 = vpop.permute.xlu1 %1257 }
 0xe13   :  { %v1260_v26 = vmul.f32 %v1258_v24, %v1255_v41 }
 0xe15   :  { %v3638_v28 = vadd.f32 %v1261_v25, %v1260_v26 }
 0xe16   :  { %v1327_v34 = vpop.permute.xlu1 %1326 }
 0xe17   :  { %v1329_v20 = vmul.f32 %v1327_v34, %v1324_v33  ;;  %v1332_v40 = vpack.c.bf16 %v3638_v28, %v3638_v28 }
 0xe19   :  { %v3643_v35 = vadd.f32 %v1330_v37, %v1329_v20  ;;  %1334 = vrot.lane.b32.xlu0 %v1332_v40, %s3147_s3  ;;  %v3701_v40 = vld [vmem:[%s3995_s9 + $0x14] ss:$8 sps:$4 sm:$0xff]  }
 0xe1b   :  { %v1407_v43 = vpack.c.bf16 %v3643_v35, %v3643_v35 }
 0xe1d   :  { %1409 = vrot.lane.b32.xlu0 %v1407_v43, %s3144_s22  ;;  %v3713_v43 = vld [vmem:[%s3995_s9 + $0x24] ss:$8 sps:$4 sm:$0xff]  }
 0xe8b   :  { %v1335_v44 = vpop.permute.xlu0 %1334 }
 0xe8c   :  { %2874 = vmatmul.mubr.msk.bf16.vlgmr.msra.gmra.mrb[32].mxu1 %vm202_vm1, %v1335_v44  ;;  %v3719_v44 = vld [vmem:[%s3995_s9 + $0x20] ss:$8 sps:$4 sm:$0xff]  }
 0xe8d   :  { %1415 = vmatpush1.bf16.msra.mxu1 %v3653_v39  ;;  %1446 = vmatprep.mubr.bf16.mxu1 %v3145_v23 }
 0xe8e   :  { %1416 = vmatprep.subr.bf16.mxu1 %v3317_v8  ;;  %v3673_v8 = vld [vmem:[%s3995_s9 + $0x4] ss:$8 sps:$4 sm:$0xff]  }
 0xe8f   :  { %v1410_v27 = vpop.permute.xlu0 %1409 }
 0xe91   :  { %1417 = vmatpush1.bf16.msra.mxu1 %v3322_v9 }
 0xe92   :  { %1418 = vmatprep.subr.bf16.mxu1 %v3332_v12 }
 0xe95   :  { %1419 = vmatpush1.bf16.msra.mxu1 %v3338_v14 }
 0xe96   :  { %1420 = vmatprep.subr.bf16.mxu1 %v3343_v15 }
 0xe99   :  { %1421 = vmatpush1.bf16.msra.mxu1 %v3356_v16 }
 0xe9a   :  { %2885 = vmatprep.subr.bf16.mxu1 %v3143_v7 }
 0xe9c   :  { %2723 = vmatmul.mubr.msk.bf16.vlgmr.msra.gmra.mrb[36].mxu1 %vm509_vm6, %v1410_v27  ;;  %v3725_v27 = vld [vmem:[%s3995_s9 + $0x34] ss:$8 sps:$4 sm:$0xff]  }
 0xe9d   :  { %2886 = vmatpush3.bf16.msra.mxu1 %v3617_v3  ;;  %2889 = vmatprep.mubr.msk.bf16.mxu1 %vm3146_vm2, %v3143_v7 }
 0xe9e   :  { %2887 = vmatprep.subr.bf16.mxu1 %v3143_v7 }
 0xea1   :  { %2888 = vmatpush3.bf16.msra.mxu1 %v3626_v42 }
 0xea2   :  { %1702 = vmatprep.subr.bf16.mxu1 %v3673_v8 }
 0xf5f   :  { %v1373_v9 = vpop.f32.mrb[32].mxu1 }
 0xf60   :  { %v1387_v12 = vadd.f32 %v1373_v9, %v3295_v50  ;;  %v2875_v14 = vpop.f32.mrb[33].mxu1  ;;  %v1380_v2 = vadd.f32 %v1379_v58, %v1373_v9  ;;  %v3731_v9 = vld [vmem:[%s3995_s9 + $0x30] ss:$8 sps:$4 sm:$0xff]  }
 0xf61   :  { %v1376_v15 = vpop.f32.mrb[34].mxu1 }
 0xf62   :  { %1389 = vrot.lane.b32.xlu1 %v1387_v12, %s3144_s22  ;;  %v2876_v16 = vpop.f32.mrb[35].mxu1  ;;  %v2722_v32 = vmul.f32 -1.442695, %v1380_v2 }
 0xf6f   :  { %v1448_v3 = vpop.f32.mrb[36].mxu1 }
 0xf70   :  { %v1457_v47 = vadd.f32 %v1448_v3, %v3508_v52  ;;  %v1450_v48 = vpop.f32.mrb[37].mxu1 }
 0xf71   :  { %v1452_v42 = vpop.f32.mrb[38].mxu1  ;;  %v1464_v55 = vadd.f32 %v3402_v46, %v1450_v48 }
 0xf72   :  { %v2724_v49 = vmul.f32 -1.442695, %v1457_v47  ;;  %v1453_v51 = vpop.f32.mrb[39].mxu1 }
 0xf74   :  { %3029 = vpow2.f32 %v2724_v49 }
 0xf7e   :  { %v3030_v53 = vpop.eup %3029 }
 0xf7f   :  { %v1461_v54 = vadd.f32 1.0, %v3030_v53 }
 0xf81   :  { %3031 = vrcp.f32 %v1461_v54 }
 0xf82   :  { %3033 = vpow2.f32 %v2722_v32  ;;  %v1523_v32 = vld [vmem:[#allocation2 + $0x30] sm:$0xff] }
 0xf8b   :  { %v3032_v31 = vpop.eup %3031 }
 0xf8c   :  { %v1465_v57 = vmul.f32 %v3032_v31, %v1464_v55  ;;  %v3034_v59 = vpop.eup %3033  ;;  %v1468_v41 = vsub.f32 1.0, %v3032_v31  ;;  %v1474_v25 = vmul.f32 %v3032_v31, %v3643_v35  ;;  %v3707_v35 = vld [vmem:[%s3995_s9 + $0x10] ss:$8 sps:$4 sm:$0xff]  }
 0xf8d   :  { %v1384_v29 = vadd.f32 1.0, %v3034_v59 }
 0xf8e   :  { %v1466_v4 = vadd.f32 %v1465_v57, %v1456_v45 }
 0xf8f   :  { %3035 = vrcp.f32 %v1384_v29 }
 0xf99   :  { %v3036_v52 = vpop.eup %3035 }
 0xf9a   :  { %v1399_v11 = vsub.f32 1.0, %v3036_v52  ;;  %v1405_v13 = vmul.f32 %v3036_v52, %v3638_v28 }
 0xfd4   :  { %v1390_v62 = vpop.permute.xlu1 %1389 }
 0xfd5   :  { %v1392_v30 = vmul.f32 %v3036_v52, %v1390_v62 }
 0xfd7   :  { %1394 = vrot.lane.b32.xlu0 %v1392_v30, %s3144_s22 }
0x1049   :  { %v1395_v63 = vpop.permute.xlu0 %1394 }
0x104a   :  { %v1397_v1 = vadd.f32 %v1395_v63, %v1379_v58 }
0x104c   :  { %3037 = vtanh.f32 %v1397_v1 }
0x104d   :  { %3039 = vtanh.f32 %v1466_v4 }
0x1056   :  { %v3038_v5 = vpop.eup %3037 }
0x1057   :  { %1401 = vrot.lane.b32.xlu1 %v3038_v5, %s3147_s3  ;;  %v3040_v10 = vpop.eup %3039 }
0x105b   :  { %1470 = vrot.lane.b32.xlu1 %v3040_v10, %s3144_s22 }
0x10c9   :  { %v1402_v17 = vpop.permute.xlu1 %1401 }
0x10ca   :  { %v1404_v19 = vmul.f32 %v1402_v17, %v1399_v11 }
0x10cc   :  { %v3684_v22 = vadd.f32 %v1405_v13, %v1404_v19 }
0x10cd   :  { %v1471_v24 = vpop.permute.xlu1 %1470 }
0x10ce   :  { %v1473_v26 = vmul.f32 %v1471_v24, %v1468_v41  ;;  %v1476_v33 = vpack.c.bf16 %v3684_v22, %v3684_v22 }
0x10d0   :  { %v3689_v34 = vadd.f32 %v1474_v25, %v1473_v26  ;;  %1478 = vrot.lane.b32.xlu0 %v1476_v33, %s3147_s3 }
0x10d2   :  { %v1551_v37 = vpack.c.bf16 %v3689_v34, %v3689_v34 }
0x10d4   :  { %1553 = vrot.lane.b32.xlu0 %v1551_v37, %s3144_s22 }
0x1142   :  { %v1479_v20 = vpop.permute.xlu0 %1478 }
0x1143   :  { %2882 = vmatmul.mubr.msk.bf16.vlgmr.msra.gmra.mrb[56].mxu0 %vm202_vm1, %v1479_v20 }
0x1144   :  { %1559 = vmatpush1.bf16.msra.mxu0 %v3653_v39  ;;  %1590 = vmatprep.mubr.bf16.mxu0 %v3145_v23 }
0x1145   :  { %1560 = vmatprep.subr.bf16.mxu0 %v3701_v40 }
0x1146   :  { %v1554_v12 = vpop.permute.xlu0 %1553 }
0x1148   :  { %1561 = vmatpush1.bf16.msra.mxu0 %v3707_v35 }
0x1149   :  { %1562 = vmatprep.subr.bf16.mxu0 %v3713_v43 }
0x114c   :  { %1563 = vmatpush1.bf16.msra.mxu0 %v3719_v44 }
0x114d   :  { %1564 = vmatprep.subr.bf16.mxu0 %v3725_v27 }
0x1150   :  { %1565 = vmatpush1.bf16.msra.mxu0 %v3731_v9 }
0x1151   :  { %1771 = vmatprep.subr.bf16.mxu0 %v3673_v8 }
0x1153   :  { %2727 = vmatmul.mubr.msk.bf16.vlgmr.msra.gmra.mrb[60].mxu0 %vm509_vm6, %v1554_v12 }
0x1154   :  { %1772 = vmatpush1.bf16.msra.mxu0 %v3653_v39  ;;  %1803 = vmatprep.mubr.bf16.mxu0 %v3145_v23 }
0x1155   :  { %1773 = vmatprep.subr.bf16.mxu0 %v3701_v40 }
0x1158   :  { %1774 = vmatpush1.bf16.msra.mxu0 %v3707_v35 }
0x1159   :  { %1775 = vmatprep.subr.bf16.mxu0 %v3713_v43 }
0x115c   :  { %1776 = vmatpush1.bf16.msra.mxu0 %v3719_v44 }
0x115d   :  { %1777 = vmatprep.subr.bf16.mxu0 %v3725_v27 }
0x1160   :  { %1778 = vmatpush1.bf16.msra.mxu0 %v3731_v9 }
0x1161   :  { %1909 = vmatprep.subr.bf16.mxu0 %v3673_v8 }
0x1216   :  { %v1517_v14 = vpop.f32.mrb[56].mxu0 }
0x1217   :  { %v1531_v15 = vadd.f32 %v1517_v14, %v3295_v50  ;;  %v2883_v16 = vpop.f32.mrb[57].mxu0  ;;  %v1524_v59 = vadd.f32 %v1523_v32, %v1517_v14 }
0x1218   :  { %v1520_v3 = vpop.f32.mrb[58].mxu0 }
0x1219   :  { %v2884_v47 = vpop.f32.mrb[59].mxu0  ;;  %1533 = vrot.lane.b32.xlu1 %v1531_v15, %s3144_s22  ;;  %v2726_v29 = vmul.f32 -1.442695, %v1524_v59  ;;  %v1744_v59 = vld [vmem:[#allocation3 + $0x78] sm:$0xff] }
0x1226   :  { %v1592_v48 = vpop.f32.mrb[60].mxu0 }
0x1227   :  { %v1601_v42 = vadd.f32 %v1592_v48, %v3515_v56  ;;  %v1594_v49 = vpop.f32.mrb[61].mxu0  ;;  %v1600_v56 = vld [vmem:[#allocation3 + $0x68] sm:$0xff] }
0x1228   :  { %v1596_v51 = vpop.f32.mrb[62].mxu0  ;;  %v1608_v57 = vadd.f32 %v3402_v46, %v1594_v49 }
0x1229   :  { %v2728_v53 = vmul.f32 -1.442695, %v1601_v42  ;;  %v1597_v54 = vpop.f32.mrb[63].mxu0 }
0x122b   :  { %3041 = vpow2.f32 %v2728_v53 }
0x1235   :  { %v3042_v55 = vpop.eup %3041 }
0x1236   :  { %v1605_v31 = vadd.f32 1.0, %v3042_v55 }
0x1238   :  { %3043 = vrcp.f32 %v1605_v31 }
0x1239   :  { %3045 = vpow2.f32 %v2726_v29 }
0x1242   :  { %v3044_v58 = vpop.eup %3043 }
0x1243   :  { %v1609_v2 = vmul.f32 %v3044_v58, %v1608_v57  ;;  %v3046_v52 = vpop.eup %3045  ;;  %v1612_v10 = vsub.f32 1.0, %v3044_v58  ;;  %v1618_v17 = vmul.f32 %v3044_v58, %v3689_v34  ;;  %v3786_v57 = vld [vmem:[%s3999_s11] ss:$0 sm:$0xff] }
0x1244   :  { %v1528_v62 = vadd.f32 1.0, %v3046_v52 }
0x1245   :  { %v1610_v30 = vadd.f32 %v1609_v2, %v1600_v56 }
0x1246   :  { %3047 = vrcp.f32 %v1528_v62 }
0x1247   :  { %3049 = vtanh.f32 %v1610_v30 }
0x1250   :  { %v3048_v63 = vpop.eup %3047 }
0x1251   :  { %v3050_v4 = vpop.eup %3049  ;;  %v1543_v25 = vsub.f32 1.0, %v3048_v63  ;;  %v1549_v33 = vmul.f32 %v3048_v63, %v3684_v22 }
0x128b   :  { %v1534_v1 = vpop.permute.xlu1 %1533 }
0x128c   :  { %v1536_v45 = vmul.f32 %v3048_v63, %v1534_v1 }
0x128e   :  { %1538 = vrot.lane.b32.xlu0 %v1536_v45, %s3144_s22 }
0x1292   :  { %1614 = vrot.lane.b32.xlu0 %v3050_v4, %s3144_s22 }
0x1300   :  { %v1539_v46 = vpop.permute.xlu0 %1538 }
0x1301   :  { %v1541_v5 = vadd.f32 %v1539_v46, %v1523_v32 }
0x1303   :  { %3051 = vtanh.f32 %v1541_v5 }
0x1304   :  { %v1615_v11 = vpop.permute.xlu0 %1614 }
0x1305   :  { %v1617_v13 = vmul.f32 %v1615_v11, %v1612_v10 }
0x1307   :  { %v1619_v19 = vadd.f32 %v1618_v17, %v1617_v13 }
0x1309   :  { %v1695_v41 = vpack.c.bf16 %v1619_v19, %v1619_v19 }
0x130b   :  { %1697 = vrot.lane.b32.xlu0 %v1695_v41, %s3144_s22 }
0x130d   :  { %v3052_v24 = vpop.eup %3051 }
0x130e   :  { %1545 = vrot.lane.b32.xlu1 %v3052_v24, %s3147_s3 }
0x137d   :  { %v1698_v14 = vpop.permute.xlu0 %1697 }
0x1380   :  { %v1546_v26 = vpop.permute.xlu1 %1545 }
0x1381   :  { %v1548_v37 = vmul.f32 %v1546_v26, %v1543_v25  ;;  %v1813_v26 = vld [vmem:[#allocation3 + $0x88] sm:$0xff] }
0x1383   :  { %v3755_v20 = vadd.f32 %v1549_v33, %v1548_v37 }
0x1385   :  { %v1620_v12 = vpack.c.bf16 %v3755_v20, %v3755_v20 }
0x1387   :  { %1622 = vrot.lane.b32.xlu1 %v1620_v12, %s3147_s3 }
0x13f9   :  { %v1623_v34 = vpop.permute.xlu1 %1622 }
0x13fa   :  { %2890 = vmatmul.mubr.msk.bf16.vlgmr.msra.gmra.mrb[40].mxu1 %vm202_vm1, %v1623_v34 }
0x13fb   :  { %1703 = vmatpush1.bf16.msra.mxu1 %v3653_v39  ;;  %1734 = vmatprep.mubr.bf16.mxu1 %v3145_v23 }
0x13fc   :  { %1704 = vmatprep.subr.bf16.mxu1 %v3701_v40 }
0x13ff   :  { %1705 = vmatpush1.bf16.msra.mxu1 %v3707_v35 }
0x1400   :  { %1706 = vmatprep.subr.bf16.mxu1 %v3713_v43 }
0x1403   :  { %1707 = vmatpush1.bf16.msra.mxu1 %v3719_v44 }
0x1404   :  { %1708 = vmatprep.subr.bf16.mxu1 %v3725_v27 }
0x1407   :  { %1709 = vmatpush1.bf16.msra.mxu1 %v3731_v9 }
0x1408   :  { %1840 = vmatprep.subr.bf16.mxu1 %v3673_v8 }
0x140a   :  { %2731 = vmatmul.mubr.msk.bf16.vlgmr.msra.gmra.mrb[44].mxu1 %vm509_vm6, %v1698_v14 }
0x140b   :  { %1841 = vmatpush1.bf16.msra.mxu1 %v3653_v39  ;;  %1872 = vmatprep.mubr.bf16.mxu1 %v3145_v23 }
0x140c   :  { %1842 = vmatprep.subr.bf16.mxu1 %v3701_v40 }
0x140f   :  { %1843 = vmatpush1.bf16.msra.mxu1 %v3707_v35 }
0x1410   :  { %1844 = vmatprep.subr.bf16.mxu1 %v3713_v43 }
0x1413   :  { %1845 = vmatpush1.bf16.msra.mxu1 %v3719_v44 }
0x1414   :  { %1846 = vmatprep.subr.bf16.mxu1 %v3725_v27 }
0x1417   :  { %1847 = vmatpush1.bf16.msra.mxu1 %v3731_v9 }
0x1418   :  { %1978 = vmatprep.subr.bf16.mxu1 %v3673_v8 }
0x14cd   :  { %v3780_v15 = vpop.f32.mrb[40].mxu1 }
0x14ce   :  { %v2891_v16 = vpop.f32.mrb[41].mxu1 }
0x14cf   :  { %v1664_v3 = vpop.f32.mrb[42].mxu1 }
0x14d0   :  { %v2892_v47 = vpop.f32.mrb[43].mxu1 }
0x14dd   :  { %v1736_v48 = vpop.f32.mrb[44].mxu1 }
0x14de   :  { %v1745_v42 = vadd.f32 %v1736_v48, %v3520_v60  ;;  %v1738_v49 = vpop.f32.mrb[45].mxu1 }
0x14df   :  { %v1740_v51 = vpop.f32.mrb[46].mxu1  ;;  %v1752_v58 = vadd.f32 %v3786_v57, %v1738_v49 }
0x14e0   :  { %v2732_v53 = vmul.f32 -1.442695, %v1745_v42  ;;  %v1741_v54 = vpop.f32.mrb[47].mxu1 }
0x14e2   :  { %3053 = vpow2.f32 %v2732_v53 }
0x14ec   :  { %v3054_v55 = vpop.eup %3053 }
0x14ed   :  { %v1749_v31 = vadd.f32 1.0, %v3054_v55 }
0x14ef   :  { %3055 = vrcp.f32 %v1749_v31 }
0x14f9   :  { %v3056_v2 = vpop.eup %3055 }
0x14fa   :  { %v1753_v32 = vmul.f32 %v3056_v2, %v1752_v58  ;;  %v1756_v52 = vsub.f32 1.0, %v3056_v2  ;;  %v1762_v56 = vmul.f32 %v3056_v2, %v1619_v19 }
0x14fc   :  { %v1754_v29 = vadd.f32 %v1753_v32, %v1744_v59  ;;  %v1882_v59 = vld [vmem:[#allocation3 + $0x98] sm:$0xff] }
0x14fe   :  { %3057 = vtanh.f32 %v1754_v29 }
0x1508   :  { %v3058_v60 = vpop.eup %3057 }
0x1509   :  { %1758 = vrot.lane.b32.xlu1 %v3058_v60, %s3144_s22 }
0x157b   :  { %v1759_v62 = vpop.permute.xlu1 %1758 }
0x157c   :  { %v1761_v30 = vmul.f32 %v1759_v62, %v1756_v52 }
0x157e   :  { %v1763_v63 = vadd.f32 %v1762_v56, %v1761_v30 }
0x1580   :  { %v1764_v1 = vpack.c.bf16 %v1763_v63, %v1763_v63 }
0x1582   :  { %1766 = vrot.lane.b32.xlu0 %v1764_v1, %s3144_s22 }
0x15f4   :  { %v1767_v45 = vpop.permute.xlu0 %1766 }
0x15f5   :  { %2733 = vmatmul.mubr.msk.bf16.vlgmr.msra.gmra.mrb[64].mxu0 %vm509_vm6, %v1767_v45 }
0x15f6   :  { %1910 = vmatpush1.bf16.msra.mxu0 %v3653_v39  ;;  %1941 = vmatprep.mubr.bf16.mxu0 %v3145_v23 }
0x15f7   :  { %1911 = vmatprep.subr.bf16.mxu0 %v3701_v40 }
0x15fa   :  { %1912 = vmatpush1.bf16.msra.mxu0 %v3707_v35 }
0x15fb   :  { %1913 = vmatprep.subr.bf16.mxu0 %v3713_v43 }
0x15fe   :  { %1914 = vmatpush1.bf16.msra.mxu0 %v3719_v44 }
0x15ff   :  { %1915 = vmatprep.subr.bf16.mxu0 %v3725_v27 }
0x1602   :  { %1916 = vmatpush1.bf16.msra.mxu0 %v3731_v9 }
0x1603   :  { %2047 = vmatprep.subr.bf16.mxu0 %v3673_v8 }
0x16c8   :  { %v1805_v4 = vpop.f32.mrb[64].mxu0 }
0x16c9   :  { %v1814_v46 = vadd.f32 %v1805_v4, %v3525_v0  ;;  %v1807_v5 = vpop.f32.mrb[65].mxu0 }
0x16ca   :  { %v1809_v10 = vpop.f32.mrb[66].mxu0  ;;  %v1821_v41 = vadd.f32 %v3786_v57, %v1807_v5 }
0x16cb   :  { %v2734_v11 = vmul.f32 -1.442695, %v1814_v46  ;;  %v1810_v17 = vpop.f32.mrb[67].mxu0 }
0x16cd   :  { %3059 = vpow2.f32 %v2734_v11 }
0x16d7   :  { %v3060_v13 = vpop.eup %3059 }
0x16d8   :  { %v1818_v19 = vadd.f32 1.0, %v3060_v13 }
0x16da   :  { %3061 = vrcp.f32 %v1818_v19 }
0x16e4   :  { %v3062_v24 = vpop.eup %3061 }
0x16e5   :  { %v1822_v25 = vmul.f32 %v3062_v24, %v1821_v41  ;;  %v1825_v12 = vsub.f32 1.0, %v3062_v24  ;;  %v1831_v34 = vmul.f32 %v3062_v24, %v1763_v63 }
0x16e7   :  { %v1823_v33 = vadd.f32 %v1822_v25, %v1813_v26  ;;  %v1951_v25 = vld [vmem:[#allocation3 + $0xa8] sm:$0xff] }
0x16e9   :  { %3063 = vtanh.f32 %v1823_v33 }
0x16f3   :  { %v3064_v37 = vpop.eup %3063 }
0x16f4   :  { %1827 = vrot.lane.b32.xlu1 %v3064_v37, %s3144_s22 }
0x1766   :  { %v1828_v0 = vpop.permute.xlu1 %1827 }
0x1767   :  { %v1830_v14 = vmul.f32 %v1828_v0, %v1825_v12 }
0x1769   :  { %v1832_v16 = vadd.f32 %v1831_v34, %v1830_v14 }
0x176b   :  { %v1833_v3 = vpack.c.bf16 %v1832_v16, %v1832_v16 }
0x176d   :  { %1835 = vrot.lane.b32.xlu0 %v1833_v3, %s3144_s22 }
0x17df   :  { %v1836_v47 = vpop.permute.xlu0 %1835 }
0x17e0   :  { %2735 = vmatmul.mubr.msk.bf16.vlgmr.msra.gmra.mrb[48].mxu1 %vm509_vm6, %v1836_v47  ;;  %v3142_v47 = vld [vmem:[#allocation3 + $0xb0] sm:$0xff] }
0x17e1   :  { %1979 = vmatpush1.bf16.msra.mxu1 %v3653_v39  ;;  %2010 = vmatprep.mubr.bf16.mxu1 %v3145_v23 }
0x17e2   :  { %1980 = vmatprep.subr.bf16.mxu1 %v3701_v40 }
0x17e5   :  { %1981 = vmatpush1.bf16.msra.mxu1 %v3707_v35 }
0x17e6   :  { %1982 = vmatprep.subr.bf16.mxu1 %v3713_v43 }
0x17e9   :  { %1983 = vmatpush1.bf16.msra.mxu1 %v3719_v44 }
0x17ea   :  { %1984 = vmatprep.subr.bf16.mxu1 %v3725_v27 }
0x17ed   :  { %1985 = vmatpush1.bf16.msra.mxu1 %v3731_v9 }
0x17ee   :  { %2116 = vmatprep.subr.bf16.mxu1 %v3673_v8 }
0x18b3   :  { %v1874_v48 = vpop.f32.mrb[48].mxu1 }
0x18b4   :  { %v1883_v42 = vadd.f32 %v1874_v48, %v3530_v6  ;;  %v1876_v49 = vpop.f32.mrb[49].mxu1 }
0x18b5   :  { %v1878_v51 = vpop.f32.mrb[50].mxu1  ;;  %v1890_v58 = vadd.f32 %v3786_v57, %v1876_v49 }
0x18b6   :  { %v2736_v53 = vmul.f32 -1.442695, %v1883_v42  ;;  %v1879_v54 = vpop.f32.mrb[51].mxu1 }
0x18b8   :  { %3065 = vpow2.f32 %v2736_v53 }
0x18c2   :  { %v3066_v55 = vpop.eup %3065 }
0x18c3   :  { %v1887_v31 = vadd.f32 1.0, %v3066_v55 }
0x18c5   :  { %3067 = vrcp.f32 %v1887_v31 }
0x18cf   :  { %v3068_v2 = vpop.eup %3067 }
0x18d0   :  { %v1891_v32 = vmul.f32 %v3068_v2, %v1890_v58  ;;  %v1894_v52 = vsub.f32 1.0, %v3068_v2  ;;  %v1900_v62 = vmul.f32 %v3068_v2, %v1832_v16 }
0x18d2   :  { %v1892_v29 = vadd.f32 %v1891_v32, %v1882_v59  ;;  %v2020_v32 = vld [vmem:[#allocation3 + $0xb8] sm:$0xff] }
0x18d4   :  { %3069 = vtanh.f32 %v1892_v29 }
0x18de   :  { %v3070_v60 = vpop.eup %3069 }
0x18df   :  { %1896 = vrot.lane.b32.xlu1 %v3070_v60, %s3144_s22 }
0x1951   :  { %v1897_v6 = vpop.permute.xlu1 %1896 }
0x1952   :  { %v1899_v56 = vmul.f32 %v1897_v6, %v1894_v52 }
0x1954   :  { %v1901_v30 = vadd.f32 %v1900_v62, %v1899_v56 }
0x1956   :  { %v1902_v63 = vpack.c.bf16 %v1901_v30, %v1901_v30 }
0x1958   :  { %1904 = vrot.lane.b32.xlu0 %v1902_v63, %s3144_s22 }
0x19ca   :  { %v1905_v1 = vpop.permute.xlu0 %1904 }
0x19cb   :  { %2737 = vmatmul.mubr.msk.bf16.vlgmr.msra.gmra.mrb[68].mxu0 %vm509_vm6, %v1905_v1  ;;  %v2088_v1 = vld [vmem:[#allocation3 + $0xc0] sm:$0xff] }
0x19cc   :  { %2048 = vmatpush1.bf16.msra.mxu0 %v3653_v39  ;;  %2079 = vmatprep.mubr.bf16.mxu0 %v3145_v23 }
0x19cd   :  { %2049 = vmatprep.subr.bf16.mxu0 %v3701_v40 }
0x19d0   :  { %2050 = vmatpush1.bf16.msra.mxu0 %v3707_v35 }
0x19d1   :  { %2051 = vmatprep.subr.bf16.mxu0 %v3713_v43 }
0x19d4   :  { %2052 = vmatpush1.bf16.msra.mxu0 %v3719_v44 }
0x19d5   :  { %2053 = vmatprep.subr.bf16.mxu0 %v3725_v27 }
0x19d8   :  { %2054 = vmatpush1.bf16.msra.mxu0 %v3731_v9 }
0x19d9   :  { %2185 = vmatprep.subr.bf16.mxu0 %v3673_v8 }
0x1a9e   :  { %v1943_v45 = vpop.f32.mrb[68].mxu0 }
0x1a9f   :  { %v1952_v4 = vadd.f32 %v1943_v45, %v3535_v18  ;;  %v1945_v46 = vpop.f32.mrb[69].mxu0 }
0x1aa0   :  { %v1947_v5 = vpop.f32.mrb[70].mxu0  ;;  %v1959_v19 = vadd.f32 %v3786_v57, %v1945_v46 }
0x1aa1   :  { %v2738_v10 = vmul.f32 -1.442695, %v1952_v4  ;;  %v1948_v11 = vpop.f32.mrb[71].mxu0 }
0x1aa3   :  { %3071 = vpow2.f32 %v2738_v10 }
0x1aad   :  { %v3072_v17 = vpop.eup %3071 }
0x1aae   :  { %v1956_v13 = vadd.f32 1.0, %v3072_v17 }
0x1ab0   :  { %3073 = vrcp.f32 %v1956_v13 }
0x1aba   :  { %v3074_v41 = vpop.eup %3073 }
0x1abb   :  { %v1960_v24 = vmul.f32 %v3074_v41, %v1959_v19  ;;  %v1963_v37 = vsub.f32 1.0, %v3074_v41  ;;  %v1969_v12 = vmul.f32 %v3074_v41, %v1901_v30 }
0x1abd   :  { %v1961_v26 = vadd.f32 %v1960_v24, %v1951_v25  ;;  %v2089_v24 = vld [vmem:[#allocation3 + $0xc8] sm:$0xff] }
0x1abf   :  { %3075 = vtanh.f32 %v1961_v26 }
0x1ac9   :  { %v3076_v33 = vpop.eup %3075 }
0x1aca   :  { %1965 = vrot.lane.b32.xlu1 %v3076_v33, %s3144_s22 }
0x1b3c   :  { %v1966_v18 = vpop.permute.xlu1 %1965 }
0x1b3d   :  { %v1968_v0 = vmul.f32 %v1966_v18, %v1963_v37 }
0x1b3f   :  { %v1970_v34 = vadd.f32 %v1969_v12, %v1968_v0 }
0x1b41   :  { %v1971_v14 = vpack.c.bf16 %v1970_v34, %v1970_v34 }
0x1b43   :  { %1973 = vrot.lane.b32.xlu0 %v1971_v14, %s3144_s22 }
0x1bb5   :  { %v1974_v16 = vpop.permute.xlu0 %1973 }
0x1bb6   :  { %2739 = vmatmul.mubr.msk.bf16.vlgmr.msra.gmra.mrb[52].mxu1 %vm509_vm6, %v1974_v16 }
0x1bb7   :  { %2117 = vmatpush1.bf16.msra.mxu1 %v3653_v39  ;;  %2148 = vmatprep.mubr.bf16.mxu1 %v3145_v23 }
0x1bb8   :  { %2118 = vmatprep.subr.bf16.mxu1 %v3701_v40 }
0x1bbb   :  { %2119 = vmatpush1.bf16.msra.mxu1 %v3707_v35 }
0x1bbc   :  { %2120 = vmatprep.subr.bf16.mxu1 %v3713_v43 }
0x1bbf   :  { %2121 = vmatpush1.bf16.msra.mxu1 %v3719_v44 }
0x1bc0   :  { %2122 = vmatprep.subr.bf16.mxu1 %v3725_v27 }
0x1bc3   :  { %2123 = vmatpush1.bf16.msra.mxu1 %v3731_v9 }
0x1bc4   :  { %2254 = vmatprep.subr.bf16.mxu1 %v3673_v8 }
0x1c89   :  { %v2012_v3 = vpop.f32.mrb[52].mxu1 }
0x1c8a   :  { %v2021_v48 = vadd.f32 %v3142_v47, %v2012_v3  ;;  %v2014_v42 = vpop.f32.mrb[53].mxu1  ;;  %v2157_v3 = vld [vmem:[#allocation3 + $0xd0] sm:$0xff] }
0x1c8b   :  { %v2016_v49 = vpop.f32.mrb[54].mxu1  ;;  %v2028_v31 = vadd.f32 %v3786_v57, %v2014_v42 }
0x1c8c   :  { %v2740_v51 = vmul.f32 -1.442695, %v2021_v48  ;;  %v2017_v53 = vpop.f32.mrb[55].mxu1 }
0x1c8e   :  { %3077 = vpow2.f32 %v2740_v51 }
0x1c98   :  { %v3078_v54 = vpop.eup %3077 }
0x1c99   :  { %v2025_v55 = vadd.f32 1.0, %v3078_v54 }
0x1c9b   :  { %3079 = vrcp.f32 %v2025_v55 }
0x1ca5   :  { %v3080_v58 = vpop.eup %3079 }
0x1ca6   :  { %v2029_v2 = vmul.f32 %v3080_v58, %v2028_v31  ;;  %v2032_v8 = vsub.f32 1.0, %v3080_v58  ;;  %v2038_v52 = vmul.f32 %v3080_v58, %v1970_v34 }
0x1ca8   :  { %v2030_v59 = vadd.f32 %v2029_v2, %v2020_v32  ;;  %v1675_v32 = vadd.f32 %v3780_v15, %v3295_v50 }
0x1caa   :  { %3081 = vtanh.f32 %v2030_v59  ;;  %v1667_v59 = vld [vmem:[#allocation2 + $0x38] sm:$0xff] }
0x1cb4   :  { %v3082_v29 = vpop.eup %3081 }
0x1cb5   :  { %2034 = vrot.lane.b32.xlu1 %v3082_v29, %s3144_s22  ;;  %v1668_v29 = vadd.f32 %v1667_v59, %v3780_v15 }
0x1d27   :  { %v2035_v60 = vpop.permute.xlu1 %2034 }
0x1d28   :  { %v2037_v6 = vmul.f32 %v2035_v60, %v2032_v8  ;;  %v2730_v8 = vmul.f32 -1.442695, %v1668_v29 }
0x1d2a   :  { %v2039_v62 = vadd.f32 %v2038_v52, %v2037_v6 }
0x1d2c   :  { %v2040_v56 = vpack.c.bf16 %v2039_v62, %v2039_v62 }
0x1d2e   :  { %2042 = vrot.lane.b32.xlu0 %v2040_v56, %s3144_s22 }
0x1da0   :  { %v2043_v30 = vpop.permute.xlu0 %2042 }
0x1da1   :  { %2741 = vmatmul.mubr.msk.bf16.vlgmr.msra.gmra.mrb[72].mxu0 %vm509_vm6, %v2043_v30 }
0x1da2   :  { %2186 = vmatpush1.bf16.msra.mxu0 %v3653_v39  ;;  %2217 = vmatprep.mubr.bf16.mxu0 %v3145_v23 }
0x1da3   :  { %2187 = vmatprep.subr.bf16.mxu0 %v3701_v40 }
0x1da6   :  { %2188 = vmatpush1.bf16.msra.mxu0 %v3707_v35 }
0x1da7   :  { %2189 = vmatprep.subr.bf16.mxu0 %v3713_v43 }
0x1daa   :  { %2190 = vmatpush1.bf16.msra.mxu0 %v3719_v44 }
0x1dab   :  { %2191 = vmatprep.subr.bf16.mxu0 %v3725_v27 }
0x1dae   :  { %2192 = vmatpush1.bf16.msra.mxu0 %v3731_v9 }
0x1daf   :  { %2893 = vmatprep.subr.bf16.mxu0 %v3143_v7 }
0x1e74   :  { %v2081_v63 = vpop.f32.mrb[72].mxu0 }
0x1e75   :  { %v2090_v45 = vadd.f32 %v2088_v1, %v2081_v63  ;;  %v2083_v4 = vpop.f32.mrb[73].mxu0  ;;  %v2226_v63 = vld [vmem:[#allocation3 + $0xe0] sm:$0xff] }
0x1e76   :  { %v2085_v46 = vpop.f32.mrb[74].mxu0  ;;  %v2097_v13 = vadd.f32 %v3786_v57, %v2083_v4 }
0x1e77   :  { %v2742_v5 = vmul.f32 -1.442695, %v2090_v45  ;;  %v2086_v10 = vpop.f32.mrb[75].mxu0 }
0x1e79   :  { %3083 = vpow2.f32 %v2742_v5 }
0x1e83   :  { %v3084_v11 = vpop.eup %3083 }
0x1e84   :  { %v2094_v17 = vadd.f32 1.0, %v3084_v11 }
0x1e86   :  { %3085 = vrcp.f32 %v2094_v17 }
0x1e90   :  { %v3086_v19 = vpop.eup %3085 }
0x1e91   :  { %v2098_v41 = vmul.f32 %v3086_v19, %v2097_v13  ;;  %v2101_v33 = vsub.f32 1.0, %v3086_v19  ;;  %v2107_v18 = vmul.f32 %v3086_v19, %v2039_v62  ;;  %v2227_v19 = vld [vmem:[#allocation3 + $0xe8] sm:$0xff] }
0x1e93   :  { %v2099_v25 = vadd.f32 %v2098_v41, %v2089_v24 }
0x1e95   :  { %3087 = vtanh.f32 %v2099_v25 }
0x1e9f   :  { %v3088_v26 = vpop.eup %3087 }
0x1ea0   :  { %2103 = vrot.lane.b32.xlu1 %v3088_v26, %s3144_s22 }
0x1f12   :  { %v2104_v37 = vpop.permute.xlu1 %2103 }
0x1f13   :  { %v2106_v12 = vmul.f32 %v2104_v37, %v2101_v33 }
0x1f15   :  { %v2108_v0 = vadd.f32 %v2107_v18, %v2106_v12 }
0x1f17   :  { %v2109_v34 = vpack.c.bf16 %v2108_v0, %v2108_v0 }
0x1f19   :  { %2111 = vrot.lane.b32.xlu0 %v2109_v34, %s3144_s22 }
0x1f8b   :  { %v2112_v14 = vpop.permute.xlu0 %2111 }
0x1f8c   :  { %2743 = vmatmul.mubr.msk.bf16.vlgmr.msra.gmra.mrb[56].mxu1 %vm509_vm6, %v2112_v14 }
0x1f8d   :  { %2255 = vmatpush1.bf16.msra.mxu1 %v3653_v39  ;;  %2286 = vmatprep.mubr.bf16.mxu1 %v3145_v23 }
0x1f8e   :  { %2256 = vmatprep.subr.bf16.mxu1 %v3701_v40 }
0x1f91   :  { %2257 = vmatpush1.bf16.msra.mxu1 %v3707_v35 }
0x1f92   :  { %2258 = vmatprep.subr.bf16.mxu1 %v3713_v43 }
0x1f95   :  { %2259 = vmatpush1.bf16.msra.mxu1 %v3719_v44 }
0x1f96   :  { %2260 = vmatprep.subr.bf16.mxu1 %v3725_v27  ;;  %v2158_v27 = vld [vmem:[#allocation3 + $0xd8] sm:$0xff] }
0x1f99   :  { %2261 = vmatpush1.bf16.msra.mxu1 %v3731_v9 }
0x1f9a   :  { %2909 = vmatprep.subr.bf16.mxu1 %v3143_v7 }
0x205f   :  { %v2150_v16 = vpop.f32.mrb[56].mxu1 }
0x2060   :  { %v2159_v47 = vadd.f32 %v2157_v3, %v2150_v16  ;;  %v2152_v39 = vpop.f32.mrb[57].mxu1 }
0x2061   :  { %v2154_v48 = vpop.f32.mrb[58].mxu1  ;;  %v2166_v43 = vadd.f32 %v3786_v57, %v2152_v39 }
0x2062   :  { %v2744_v23 = vmul.f32 -1.442695, %v2159_v47  ;;  %v2155_v42 = vpop.f32.mrb[59].mxu1 }
0x2064   :  { %3089 = vpow2.f32 %v2744_v23 }
0x206e   :  { %v3090_v40 = vpop.eup %3089 }
0x206f   :  { %v2163_v35 = vadd.f32 1.0, %v3090_v40 }
0x2071   :  { %3091 = vrcp.f32 %v2163_v35 }
0x207b   :  { %v3092_v44 = vpop.eup %3091 }
0x207c   :  { %v2167_v49 = vmul.f32 %v3092_v44, %v2166_v43  ;;  %v2170_v53 = vsub.f32 1.0, %v3092_v44  ;;  %v2176_v55 = vmul.f32 %v3092_v44, %v2108_v0 }
0x207e   :  { %v2168_v51 = vadd.f32 %v2167_v49, %v2158_v27 }
0x2080   :  { %3093 = vtanh.f32 %v2168_v51 }
0x2081   :  { %3095 = vpow2.f32 %v2730_v8 }
0x208a   :  { %v3094_v9 = vpop.eup %3093 }
0x208b   :  { %2172 = vrot.lane.b32.xlu1 %v3094_v9, %s3144_s22  ;;  %v3096_v60 = vpop.eup %3095 }
0x208c   :  { %v1672_v52 = vadd.f32 1.0, %v3096_v60 }
0x208e   :  { %3097 = vrcp.f32 %v1672_v52 }
0x2098   :  { %v3098_v62 = vpop.eup %3097 }
0x2099   :  { %v1687_v3 = vsub.f32 1.0, %v3098_v62  ;;  %v1693_v39 = vmul.f32 %v3098_v62, %v3755_v20 }
0x20fd   :  { %v2173_v54 = vpop.permute.xlu1 %2172 }
0x20fe   :  { %v2175_v31 = vmul.f32 %v2173_v54, %v2170_v53 }
0x2100   :  { %v2177_v58 = vadd.f32 %v2176_v55, %v2175_v31 }
0x2102   :  { %v2178_v2 = vpack.c.bf16 %v2177_v58, %v2177_v58 }
0x2104   :  { %2180 = vrot.lane.b32.xlu0 %v2178_v2, %s3144_s22 }
0x2108   :  { %1677 = vrot.lane.b32.xlu0 %v1675_v32, %s3144_s22 }
0x2176   :  { %v2181_v6 = vpop.permute.xlu0 %2180 }
0x2177   :  { %2745 = vmatmul.mubr.msk.bf16.vlgmr.msra.gmra.mrb[76].mxu0 %vm509_vm6, %v2181_v6 }
0x2178   :  { %2897 = vmatprep.mubr.msk.bf16.mxu0 %vm3146_vm2, %v3143_v7 }
0x217a   :  { %v1678_v56 = vpop.permute.xlu0 %1677 }
0x217b   :  { %v1680_v30 = vmul.f32 %v3098_v62, %v1678_v56 }
0x217d   :  { %1682 = vrot.lane.b32.xlu0 %v1680_v30, %s3144_s22  ;;  %v2961_v30 = vld [vmem:[%s4000_s13] sm:$0xff]  }
0x217e   :  { %2894 = vmatpush3.bf16.msra.mxu0 %v2961_v30 }
0x217f   :  { %2895 = vmatprep.subr.bf16.mxu0 %v3143_v7 }
0x21ef   :  { %v1683_v25 = vpop.permute.xlu0 %1682 }
0x21f0   :  { %v1685_v26 = vadd.f32 %v1683_v25, %v1667_v59 }
0x224a   :  { %v2219_v50 = vpop.f32.mrb[76].mxu0 }
0x224b   :  { %v2228_v1 = vadd.f32 %v2226_v63, %v2219_v50  ;;  %v2221_v15 = vpop.f32.mrb[77].mxu0  ;;  %v2962_v63 = vld [vmem:[%s4000_s13 + $0x8] sm:$0xff]  }
0x224c   :  { %v2223_v45 = vpop.f32.mrb[78].mxu0  ;;  %v2235_v11 = vadd.f32 %v3786_v57, %v2221_v15  ;;  %2896 = vmatpush3.bf16.msra.mxu0 %v2962_v63  ;;  %v2295_v15 = vld [vmem:[#allocation3 + $0xf0] sm:$0xff] }
0x224d   :  { %v2746_v4 = vmul.f32 -1.442695, %v2228_v1  ;;  %v2224_v46 = vpop.f32.mrb[79].mxu0  ;;  %2901 = vmatprep.subr.bf16.mxu0 %v3143_v7 }
0x224f   :  { %3099 = vpow2.f32 %v2746_v4 }
0x2259   :  { %v3100_v5 = vpop.eup %3099 }
0x225a   :  { %v2232_v10 = vadd.f32 1.0, %v3100_v5 }
0x225c   :  { %3101 = vrcp.f32 %v2232_v10 }
0x2266   :  { %v3102_v17 = vpop.eup %3101 }
0x2267   :  { %v2236_v13 = vmul.f32 %v3102_v17, %v2235_v11  ;;  %v2239_v33 = vsub.f32 1.0, %v3102_v17  ;;  %v2245_v18 = vmul.f32 %v3102_v17, %v2177_v58 }
0x2269   :  { %v2237_v41 = vadd.f32 %v2236_v13, %v2227_v19 }
0x226b   :  { %3103 = vtanh.f32 %v2237_v41 }
0x226c   :  { %3105 = vtanh.f32 %v1685_v26 }
0x2275   :  { %v3104_v24 = vpop.eup %3103 }
0x2276   :  { %2241 = vrot.lane.b32.xlu1 %v3104_v24, %s3144_s22  ;;  %v3106_v14 = vpop.eup %3105  ;;  %v2296_v24 = vld [vmem:[#allocation3 + $0xf8] sm:$0xff] }
0x22e8   :  { %v2242_v37 = vpop.permute.xlu1 %2241 }
0x22e9   :  { %v2244_v12 = vmul.f32 %v2242_v37, %v2239_v33 }
0x22eb   :  { %v3882_v0 = vadd.f32 %v2245_v18, %v2244_v12 }
0x22ed   :  { %v2247_v34 = vpack.c.bf16 %v3882_v0, %v3882_v0 }
0x22ef   :  { %2249 = vrot.lane.b32.xlu1 %v2247_v34, %s3144_s22 }
0x22f3   :  { %1689 = vrot.lane.b32.xlu1 %v3106_v14, %s3147_s3 }
0x2361   :  { %v2250_v16 = vpop.permute.xlu1 %2249 }
0x2362   :  { %2747 = vmatmul.mubr.msk.bf16.vlgmr.msra.gmra.mrb[60].mxu1 %vm509_vm6, %v2250_v16 }
0x2363   :  { %2917 = vmatprep.mubr.msk.bf16.mxu1 %vm3146_vm2, %v3143_v7 }
0x2365   :  { %v1690_v47 = vpop.permute.xlu1 %1689 }
0x2366   :  { %v1692_v48 = vmul.f32 %v1690_v47, %v1687_v3 }
0x2368   :  { %v3892_v23 = vadd.f32 %v1693_v39, %v1692_v48 }
0x236a   :  { %v2324_v42 = vmul.f32 %v3892_v23, %v3426_v36  ;;  %v2316_v40 = vmul.f32 %v3892_v23, %v3374_v21  ;;  %v2340_v35 = vmul.f32 %v3892_v23, %v3593_v38  ;;  %v2332_v43 = vmul.f32 %v3892_v23, %v3558_v61 }
0x236b   :  { %v2356_v44 = vmul.f32 %v3892_v23, %v3684_v22  ;;  %v2348_v49 = vmul.f32 %v3892_v23, %v3638_v28  ;;  %v2372_v27 = vmul.f32 %v3892_v23, %v3892_v23  ;;  %v2364_v51 = vmul.f32 %v3892_v23, %v3755_v20 }
0x236c   :  { %2326 = vrot.lane.b32.xlu1 %v2324_v42, %s3147_s3  ;;  %2318 = vrot.lane.b32.xlu0 %v2316_v40, %s3147_s3  ;;  %v2440_v50 = vpack.c.bf16 %v3892_v23, %v3892_v23 }
0x2370   :  { %2342 = vrot.lane.b32.xlu1 %v2340_v35, %s3147_s3  ;;  %2334 = vrot.lane.b32.xlu0 %v2332_v43, %s3147_s3  ;;  %v2963_v43 = vld [vmem:[%s4001_s12] sm:$0xff]  }
0x2374   :  { %2358 = vrot.lane.b32.xlu1 %v2356_v44, %s3147_s3  ;;  %2350 = vrot.lane.b32.xlu0 %v2348_v49, %s3147_s3 }
0x2378   :  { %2374 = vrot.lane.b32.xlu1 %v2372_v27, %s3147_s3  ;;  %2366 = vrot.lane.b32.xlu0 %v2364_v51, %s3147_s3 }
0x23de   :  { %v2327_v9 = vpop.permute.xlu1 %2326  ;;  %v2319_v53 = vpop.permute.xlu0 %2318 }
0x23df   :  { %v2329_v54 = vsel %vm202_vm1, %v2327_v9, 0.0  ;;  %v2321_v55 = vsel %vm202_vm1, %v2319_v53, 0.0 }
0x23e0   :  { %2330 = vadd.xlane.f32.xlu1 %v2329_v54  ;;  %2322 = vadd.xlane.f32.xlu0 %v2321_v55 }
0x23e2   :  { %v2343_v31 = vpop.permute.xlu1 %2342  ;;  %v2335_v58 = vpop.permute.xlu0 %2334 }
0x23e3   :  { %v2337_v2 = vsel %vm202_vm1, %v2335_v58, 0.0  ;;  %v2345_v29 = vsel %vm202_vm1, %v2343_v31, 0.0  ;;  %v2964_v58 = vld [vmem:[%s4001_s12 + $0x8] sm:$0xff]  }
0x23e4   :  { %2338 = vadd.xlane.f32.xlu0 %v2337_v2 }
0x23e6   :  { %v2359_v32 = vpop.permute.xlu1 %2358  ;;  %v2351_v59 = vpop.permute.xlu0 %2350 }
0x23e7   :  { %v2353_v8 = vsel %vm202_vm1, %v2351_v59, 0.0  ;;  %v2361_v52 = vsel %vm202_vm1, %v2359_v32, 0.0 }
0x23e8   :  { %2346 = vadd.xlane.f32.xlu0 %v2345_v29  ;;  %2354 = vadd.xlane.f32.xlu1 %v2353_v8 }
0x23ea   :  { %v2367_v60 = vpop.permute.xlu0 %2366  ;;  %v2375_v62 = vpop.permute.xlu1 %2374 }
0x23eb   :  { %v2369_v6 = vsel %vm202_vm1, %v2367_v60, 0.0  ;;  %v2377_v56 = vsel %vm202_vm1, %v2375_v62, 0.0 }
0x23ec   :  { %2362 = vadd.xlane.f32.xlu0 %v2361_v52  ;;  %2370 = vadd.xlane.f32.xlu1 %v2369_v6 }
0x23f0   :  { %2378 = vadd.xlane.f32.xlu0 %v2377_v56 }
0x2406   :  { %2446 = vrot.lane.b32.xlu0 %v2440_v50, %s3147_s3 }
0x2435   :  { %v2288_v1 = vpop.f32.mrb[60].mxu1 }
0x2436   :  { %v2297_v45 = vadd.f32 %v2295_v15, %v2288_v1  ;;  %v2290_v4 = vpop.f32.mrb[61].mxu1 }
0x2437   :  { %v2292_v46 = vpop.f32.mrb[62].mxu1  ;;  %v2304_v13 = vadd.f32 %v3786_v57, %v2290_v4 }
0x2438   :  { %v2748_v5 = vmul.f32 -1.442695, %v2297_v45  ;;  %v2293_v10 = vpop.f32.mrb[63].mxu1 }
0x243a   :  { %3107 = vpow2.f32 %v2748_v5 }
0x2444   :  { %v3108_v11 = vpop.eup %3107 }
0x2445   :  { %v2301_v17 = vadd.f32 1.0, %v3108_v11 }
0x2447   :  { %3109 = vrcp.f32 %v2301_v17 }
0x2451   :  { %v3938_v19 = vpop.eup %3109 }
0x2452   :  { %v2305_v41 = vmul.f32 %v3938_v19, %v2304_v13 }
0x2454   :  { %v2306_v25 = vadd.f32 %v2305_v41, %v2296_v24 }
0x2456   :  { %3111 = vtanh.f32 %v2306_v25 }
0x2460   :  { %v3112_v26 = vpop.eup %3111 }
0x2461   :  { %2310 = vrot.lane.b32.xlu1 %v3112_v26, %s3144_s22 }
0x246d   :  { %v2323_v33 = vpop.xlane.xlu0 %2322  ;;  %v2331_v37 = vpop.xlane.xlu1 %2330 }
0x246e   :  { %v2380_v12 = vmax.f32 %v2323_v33, %v2331_v37 }
0x2471   :  { %v2339_v18 = vpop.xlane.xlu0 %2338 }
0x2472   :  { %v2381_v34 = vmax.f32 %v2380_v12, %v2339_v18 }
0x2475   :  { %v2355_v14 = vpop.xlane.xlu1 %2354  ;;  %v2347_v16 = vpop.xlane.xlu0 %2346 }
0x2476   :  { %v2382_v3 = vmax.f32 %v2381_v34, %v2347_v16 }
0x2478   :  { %v2383_v47 = vmax.f32 %v2382_v3, %v2355_v14 }
0x2479   :  { %v2363_v57 = vpop.xlane.xlu0 %2362  ;;  %v2371_v48 = vpop.xlane.xlu1 %2370 }
0x247a   :  { %v2384_v39 = vmax.f32 %v2383_v47, %v2363_v57 }
0x247c   :  { %v2385_v42 = vmax.f32 %v2384_v39, %v2371_v48  ;;  %v2968_v39 = vld [vmem:[%s4002_s14 + $0x18] sm:$0xff]  }
0x247d   :  { %v2379_v40 = vpop.xlane.xlu0 %2378 }
0x247e   :  { %v2386_v35 = vmax.f32 %v2385_v42, %v2379_v40  ;;  %v2314_v42 = vmul.f32 %v3938_v19, %v3882_v0 }
0x2480   :  { %v2387_v44 = vsub.f32 %v2323_v33, %v2386_v35  ;;  %v2390_v49 = vsub.f32 %v2331_v37, %v2386_v35  ;;  %v2393_v27 = vsub.f32 %v2339_v18, %v2386_v35  ;;  %v2396_v51 = vsub.f32 %v2347_v16, %v2386_v35 }
0x2481   :  { %v2447_v9 = vpop.permute.xlu0 %2446  ;;  %v2399_v31 = vsub.f32 %v2355_v14, %v2386_v35  ;;  %v2402_v32 = vsub.f32 %v2363_v57, %v2386_v35  ;;  %v2405_v29 = vsub.f32 %v2371_v48, %v2386_v35  ;;  %v2408_v60 = vsub.f32 %v2379_v40, %v2386_v35 }
0x2482   :  { %v2388_v53 = vmul.f32 1.442695, %v2387_v44  ;;  %v2391_v54 = vmul.f32 1.442695, %v2390_v49  ;;  %v2394_v55 = vmul.f32 1.442695, %v2393_v27  ;;  %2898 = vmatmul.mubr.msk.bf16.vlgmr.msra.gmra.mrb[80].mxu0 %vm202_vm1, %v2447_v9 }
0x2483   :  { %2902 = vmatpush3.bf16.msra.mxu0 %v2963_v43  ;;  %2905 = vmatprep.mubr.msk.bf16.mxu0 %vm3146_vm2, %v3143_v7  ;;  %v2397_v2 = vmul.f32 1.442695, %v2396_v51  ;;  %v2400_v59 = vmul.f32 1.442695, %v2399_v31  ;;  %v2403_v8 = vmul.f32 1.442695, %v2402_v32 }
0x2484   :  { %3113 = vpow2.f32 %v2388_v53  ;;  %2903 = vmatprep.subr.bf16.mxu0 %v3143_v7  ;;  %v2406_v52 = vmul.f32 1.442695, %v2405_v29  ;;  %v2409_v6 = vmul.f32 1.442695, %v2408_v60 }
0x2485   :  { %3115 = vpow2.f32 %v2391_v54 }
0x2486   :  { %3117 = vpow2.f32 %v2394_v55 }
0x2487   :  { %2904 = vmatpush3.bf16.msra.mxu0 %v2964_v58  ;;  %3119 = vpow2.f32 %v2397_v2  ;;  %v2760_v58 = vld [vmem:[%s4003_s15] ss:$0 sm:$0xff] }
0x2488   :  { %3121 = vpow2.f32 %v2400_v59 }
0x2489   :  { %3123 = vpow2.f32 %v2403_v8 }
0x248a   :  { %3125 = vpow2.f32 %v2406_v52 }
0x248b   :  { %3127 = vpow2.f32 %v2409_v6 }
0x248e   :  { %v3114_v62 = vpop.eup %3113 }
0x248f   :  { %v3116_v56 = vpop.eup %3115  ;;  %v2419_v30 = vmul.f32 %v3114_v62, %v3374_v21 }
0x2490   :  { %v3118_v50 = vpop.eup %3117  ;;  %v2411_v63 = vadd.f32 %v3116_v56, %v3114_v62  ;;  %v2420_v1 = vmul.f32 %v3116_v56, %v3426_v36 }
0x2491   :  { %v3120_v15 = vpop.eup %3119  ;;  %v2422_v46 = vmul.f32 %v3118_v50, %v3558_v61 }
0x2492   :  { %v2412_v45 = vadd.f32 %v3118_v50, %v2411_v63  ;;  %v2421_v4 = vadd.f32 %v2420_v1, %v2419_v30  ;;  %v3122_v11 = vpop.eup %3121  ;;  %v2424_v17 = vmul.f32 %v3120_v15, %v3593_v38  ;;  %v2965_v38 = vld [vmem:[%s4002_s14] sm:$0xff]  }
0x2493   :  { %v3124_v41 = vpop.eup %3123  ;;  %v2426_v26 = vmul.f32 %v3122_v11, %v3638_v28  ;;  %2910 = vmatpush3.bf16.msra.mxu1 %v2965_v38  ;;  %v2966_v28 = vld [vmem:[%s4002_s14 + $0x8] sm:$0xff]  }
0x2494   :  { %v2413_v5 = vadd.f32 %v3120_v15, %v2412_v45  ;;  %v2423_v10 = vadd.f32 %v2422_v46, %v2421_v4  ;;  %v3126_v21 = vpop.eup %3125  ;;  %v2428_v12 = vmul.f32 %v3124_v41, %v3684_v22  ;;  %2911 = vmatprep.subr.bf16.mxu1 %v3143_v7  ;;  %v2967_v22 = vld [vmem:[%s4002_s14 + $0x10] sm:$0xff]  }
0x2495   :  { %v3128_v36 = vpop.eup %3127  ;;  %v2430_v34 = vmul.f32 %v3126_v21, %v3755_v20 }
0x2496   :  { %v2414_v13 = vadd.f32 %v3122_v11, %v2413_v5  ;;  %v2425_v24 = vadd.f32 %v2424_v17, %v2423_v10  ;;  %v2432_v16 = vmul.f32 %v3128_v36, %v3892_v23  ;;  %v2308_v23 = vsub.f32 1.0, %v3938_v19 }
0x2497   :  { %2912 = vmatpush3.bf16.msra.mxu1 %v2966_v28 }
0x2498   :  { %v2415_v25 = vadd.f32 %v3124_v41, %v2414_v13  ;;  %v2427_v37 = vadd.f32 %v2426_v26, %v2425_v24  ;;  %2913 = vmatprep.subr.bf16.mxu1 %v3143_v7 }
0x249a   :  { %v2416_v33 = vadd.f32 %v3126_v21, %v2415_v25  ;;  %v2429_v61 = vadd.f32 %v2428_v12, %v2427_v37 }
0x249b   :  { %2914 = vmatpush3.bf16.msra.mxu1 %v2967_v22 }
0x249c   :  { %v2417_v18 = vadd.f32 %v3128_v36, %v2416_v33  ;;  %v2431_v14 = vadd.f32 %v2430_v34, %v2429_v61  ;;  %2915 = vmatprep.subr.bf16.mxu1 %v3143_v7 }
0x249e   :  { %3129 = vrcp.f32 %v2417_v18  ;;  %v2433_v3 = vadd.f32 %v2432_v16, %v2431_v14 }
0x249f   :  { %2916 = vmatpush3.bf16.msra.mxu1 %v2968_v39 }
0x24a8   :  { %v3130_v20 = vpop.eup %3129 }
0x24a9   :  { %v2434_v47 = vmul.f32 %v3130_v20, %v2433_v3 }
0x24ab   :  { %v2435_v57 = vpack.c.bf16 %v2434_v47, %v2434_v47 }
0x24ad   :  { %2504 = vrot.lane.b32.xlu1 %v2435_v57, %s3147_s3 }
0x24d3   :  { %v2311_v48 = vpop.permute.xlu1 %2310 }
0x24d4   :  { %v2313_v40 = vmul.f32 %v2311_v48, %v2308_v23 }
0x24d6   :  { %v2315_v35 = vadd.f32 %v2314_v42, %v2313_v40 }
0x24d8   :  { %v2561_v43 = vpack.c.bf16 %v2315_v35, %v2315_v35 }
0x24da   :  { %2571 = vrot.lane.b32.xlu1 %v2561_v43, %s3144_s22 }
0x251f   :  { %v2505_v44 = vpop.permute.xlu1 %2504 }
0x2520   :  { %2906 = vmatmul.mubr.msk.bf16.vlgmr.msra.gmra.mrb[84].mxu0 %vm202_vm1, %v2505_v44 }
0x254c   :  { %v2572_v49 = vpop.permute.xlu1 %2571 }
0x254d   :  { %2918 = vmatmul.mubr.msk.bf16.vlgmr.msra.gmra.mrb[64].mxu1 %vm509_vm6, %v2572_v49 }
0x2555   :  { %v2497_v7 = vpop.f32.mrb[80].mxu0 }
0x2556   :  { %v2899_v27 = vpop.f32.mrb[81].mxu0 }
0x2557   :  { %v2500_v51 = vpop.f32.mrb[82].mxu0 }
0x2558   :  { %v2900_v9 = vpop.f32.mrb[83].mxu0 }
0x25f3   :  { %v2555_v53 = vpop.f32.mrb[84].mxu0 }
0x25f4   :  { %v2556_v54 = vadd.f32 %v2555_v53, %v2497_v7  ;;  %v2907_v55 = vpop.f32.mrb[85].mxu0 }
0x25f5   :  { %v2558_v31 = vpop.f32.mrb[86].mxu0 }
0x25f6   :  { %v2908_v0 = vpop.f32.mrb[87].mxu0 }
0x2620   :  { %v2634_v19 = vpop.f32.mrb[64].mxu1 }
0x2621   :  { %v2640_v2 = vadd.f32 %v2634_v19, %v2556_v54  ;;  %v2919_v32 = vpop.f32.mrb[65].mxu1 }
0x2622   :  { %v2637_v59 = vpop.f32.mrb[66].mxu1 }
0x2623   :  { %v2648_v29 = vadd.f32 %v2760_v58, %v2640_v2  ;;  %v2920_v8 = vpop.f32.mrb[67].mxu1 }
0x2625   :  { %2650 = vst.msk [vmem:[%s4004_s16] sm:$0xff] %vm2649_vm7, %v2648_v29 }

</bundles_post_ra>
